<compile_context>
chip_gen: v6e
topology: v6e:2x2x1
jax: 0.10.0
libtpu: 0.0.40
codegen_flags: <defaults>
</compile_context>

<pallas_src>
import numpy as np
import jax
import jax.numpy as jnp
from jax.experimental import pallas as pl
from jax.experimental.pallas import tpu as pltpu

# ---- problem sizes (consistent with the module: M2 = antenna_num**2, etc.) ----
BATCH = 2
ANTENNA_NUM = 8
M2 = ANTENNA_NUM ** 2          # 64
SEARCH_NUMBERS = 9             # args.search_numbers
NUM_GRIDS = 128                # args.num_meshes
NUM_LAYERS = 4                 # args_unfolding.num_layers
ALPHA = 1.0
C_LIGHT = 3.0e8


# -------------------------------------------------------------------------------------
# Pallas kernel: full ISTA unrolling for one batch (all searches at once).
# Kernel-visible shapes (batch dim squeezed away by the BlockSpec):
#   p_ref     : (S, G, 2*M2) bf16   -- [Re A^T | Im A^T] packed on the lane/K axis
#   c_ref     : (S, 2, 2*M2) bf16   -- [[cov_re|cov_im], [cov_im|-cov_re]]
#   big_ref   : (S, 2G, G)   bf16   -- [Re(A^H A) ; Im(A^H A)] stacked on the output axis
#   gamma_ref : (S, 1, 1)    f32
# Outputs:
#   res_norm : (S, G)      res_ave : (1, G)      res_all : (L, S, G)
# -------------------------------------------------------------------------------------
def ista_kernel(p_ref, c_ref, big_ref, gamma_ref,
                res_norm_ref, res_ave_ref, res_all_ref):
    f32 = jnp.float32
    bf16 = jnp.bfloat16
    G = NUM_GRIDS
    S = SEARCH_NUMBERS

    def dot_nt(x, y):
        # Batched "contract last dim of both operands": (S, A, K) x (S, B, K) -> (S, A, B)
        return jax.lax.dot_general(
            x, y, (((2,), (2,)), ((0,), (0,))), preferred_element_type=f32)

    p = p_ref[...]                         # (S, G, 128) bf16
    c = c_ref[...]                         # (S, 2, 128) bf16
    big = big_ref[...]                     # (S, 2G, G)  bf16
    gamma = gamma_ref[...]                 # (S, 1, 1)   f32

    # z = A^H cov: one batched K=128 matmul; row 0 -> Re, row 1 -> Im.
    z = dot_nt(c, p)                       # (S, 2, G) f32
    z_re = z[:, 0:1, :]                    # (S, 1, G)
    z_im = z[:, 1:2, :]                    # (S, 1, G)

    # result_init = Re(A^H cov), L2-normalized over the grid axis (EXACT division:
    # this value feeds every subsequent layer).
    zr2 = z_re * z_re
    nrm = jnp.sqrt(jnp.sum(zr2, axis=2, keepdims=True))           # (S, 1, 1)
    r = z_re / (nrm + 1e-20)

    # theta = alpha * lambda * gamma,  lambda = 0.5 * max_g |A^H cov|
    z_abs = jnp.sqrt(zr2 + z_im * z_im)
    lam = 0.5 * jnp.max(z_abs, axis=2, keepdims=True)              # (S, 1, 1)
    theta = ALPHA * lam * gamma

    # Hoisted broadcasts / loop invariants (JAX does not CSE broadcast_in_dim).
    gamma_b = jnp.broadcast_to(gamma, (S, 1, G))
    theta_b = jnp.broadcast_to(theta, (S, 1, G))
    gz_re = gamma_b * z_re                 # gamma * Re(A^H cov)
    gz_im = gamma_b * z_im                 # gamma * Im(A^H cov)

    # Unrolled ISTA:  s = (I - gamma A^H A) r + gamma A^H cov ;  r = relu(|s| - theta)
    r_d = None
    for li in range(NUM_LAYERS):
        v = dot_nt(r.astype(bf16), big)    # (S, 1, 2G): [ (A^H A r)_re | (A^H A r)_im ]
        v_re = v[:, :, :G]
        v_im = v[:, :, G:]
        s_re = r + gz_re - gamma_b * v_re
        s_im = gz_im - gamma_b * v_im
        s_abs = jnp.sqrt(s_re * s_re + s_im * s_im)
        r = jnp.maximum(s_abs - theta_b, 0.0)
        r_d = r[:, 0, :]                   # dense (S, G) view of this layer's result
        res_all_ref[li] = r_d              # direct per-layer (9,128) slab store

    # per-(batch, search) min-max normalization of the final result
    rmin = jnp.min(r_d, axis=1, keepdims=True)
    rmax = jnp.max(r_d, axis=1, keepdims=True)
    res_norm_ref[...] = (r_d - rmin) * pl.reciprocal(rmax - rmin + 1e-20, approx=True)

    # result_ave = mean over searches of the UN-normalized final result, then min-max
    ave = jnp.mean(r_d, axis=0, keepdims=True)                     # (1, G)
    amin = jnp.min(ave, axis=1, keepdims=True)
    amax = jnp.max(ave, axis=1, keepdims=True)
    res_ave_ref[...] = (ave - amin) * pl.reciprocal(amax - amin + 1e-20, approx=True)


# -------------------------------------------------------------------------------------
# Dictionary-only precomputation (hoisted Gram + packed plane + gamma_init).
# Runs once per dictionary in plain XLA, NOT inside the Pallas kernel.
# -------------------------------------------------------------------------------------
def prepare_dictionary_operator(dict_band):
    # dict_band: (B, S, M2, G) complex64
    a_t = jnp.swapaxes(dict_band, 2, 3)                                  # (B, S, G, M2)
    p_plane = jnp.concatenate(
        [jnp.real(a_t), jnp.imag(a_t)], axis=-1).astype(jnp.bfloat16)    # (B, S, G, 2*M2)

    # Split-complex Gram operator: rows 0:G -> Re(A^H A), rows G:2G -> Im(A^H A).
    aha = jnp.einsum('bsmg,bsmh->bsgh', jnp.conj(dict_band), dict_band)  # (B, S, G, G)
    big = jnp.concatenate(
        [jnp.real(aha), jnp.imag(aha)], axis=2).astype(jnp.bfloat16)     # (B, S, 2G, G)

    # gamma_init = 1 / max|eigvals(A^H A)|.
    # TODO(synk): torch.linalg.eigvals has no Pallas/TPU equivalent; A^H A is Hermitian
    # PSD, so use eigvalsh on its real 2Gx2G embedding (same spectrum, doubled mult.).
    hre = jnp.real(aha).astype(jnp.float32)
    him = jnp.imag(aha).astype(jnp.float32)
    top = jnp.concatenate([hre, -him], axis=-1)
    bot = jnp.concatenate([him, hre], axis=-1)
    emb = jnp.concatenate([top, bot], axis=-2)                           # (B, S, 2G, 2G)
    ev = jnp.linalg.eigvalsh(emb)
    gamma_init = (1.0 / jnp.max(jnp.abs(ev), axis=-1)).astype(jnp.float32)   # (B, S)
    return p_plane, big, gamma_init


# -------------------------------------------------------------------------------------
# Wrapper: per-call packing of the covariance, pallas_call, final reshapes.
# -------------------------------------------------------------------------------------
def ista_forward(p_plane, big, gamma_init, cov_matrix):
    B, S, M, _ = cov_matrix.shape
    m2 = M * M
    G = p_plane.shape[2]
    L = NUM_LAYERS

    # covariance_vector = cov.transpose(2,3).reshape(B, S, M2) -> packed rows
    # row 0 = [cov_re | cov_im], row 1 = [cov_im | -cov_re]   (K = 2*M2 = 128 lanes)
    cov_vec = jnp.swapaxes(cov_matrix, 2, 3).reshape(B, S, m2)
    c_re = jnp.real(cov_vec).astype(jnp.float32)
    c_im = jnp.imag(cov_vec).astype(jnp.float32)
    c_pack = jnp.stack(
        [jnp.concatenate([c_re, c_im], axis=-1),
         jnp.concatenate([c_im, -c_re], axis=-1)], axis=2).astype(jnp.bfloat16)  # (B,S,2,128)

    gamma4 = gamma_init.reshape(B, S, 1, 1).astype(jnp.float32)

    sq = pl.Squeezed()
    grid_spec = pltpu.PrefetchScalarGridSpec(
        num_scalar_prefetch=0,
        grid=(B,),
        in_specs=[
            pl.BlockSpec((sq, S, G, 2 * m2), lambda b: (b, 0, 0, 0)),   # P plane
            pl.BlockSpec((sq, S, 2, 2 * m2), lambda b: (b, 0, 0, 0)),   # packed cov rows
            pl.BlockSpec((sq, S, 2 * G, G), lambda b: (b, 0, 0, 0)),    # Gram operator
            pl.BlockSpec((sq, S, 1, 1), lambda b: (b, 0, 0, 0)),        # gamma
        ],
        out_specs=[
            pl.BlockSpec((sq, S, G), lambda b: (b, 0, 0)),              # res_norm (9,128)
            pl.BlockSpec((sq, 1, G), lambda b: (b, 0, 0)),              # res_ave  (1,128)
            pl.BlockSpec((sq, L, S, G), lambda b: (b, 0, 0, 0)),        # res_all  (4,9,128)
        ],
    )

    # Advisory cost hint so XLA overlaps this tiny call with surrounding ops.
    flops = B * S * (2 * 2 * (2 * m2) * G + L * 2 * 1 * (2 * G) * G)
    transcendentals = B * S * G * (L + 2)
    bytes_accessed = int(p_plane.size * 2 + c_pack.size * 2 + big.size * 2
                         + gamma4.size * 4
                         + B * S * G * 4 + B * G * 4 + B * L * S * G * 4)

    res_norm, res_ave, res_all = pl.pallas_call(
        ista_kernel,
        out_shape=(
            jax.ShapeDtypeStruct((B, S, G), jnp.float32),
            jax.ShapeDtypeStruct((B, 1, G), jnp.float32),
            jax.ShapeDtypeStruct((B, L, S, G), jnp.float32),
        ),
        grid_spec=grid_spec,
        compiler_params=pltpu.CompilerParams(
            dimension_semantics=("parallel",)),   # one batch per TensorCore on v7x
        cost_estimate=pl.CostEstimate(
            flops=flops, transcendentals=transcendentals,
            bytes_accessed=bytes_accessed),
    )(p_plane, c_pack, big, gamma4)

    # Match the torch module's output shapes (metadata-only reshapes / one transpose).
    result = res_norm.reshape(B, S, G, 1)
    result_ave = res_ave.reshape(B, 1, G, 1)
    result_init_all = jnp.transpose(res_all, (0, 2, 1, 3)).reshape(B, S, L, G, 1)
    return result, result_ave, result_init_all


# -------------------------------------------------------------------------------------
# Deterministic parameter / dictionary construction (synthetic stand-in for cal_dictionary)
# -------------------------------------------------------------------------------------
def cal_dictionary(freq, spacing, antenna_num, num_grids):
    # TODO(synk): the original cal_dictionary() is external; this is a deterministic
    # ULA covariance-domain dictionary (columns = vec(a(theta) a(theta)^H)).
    m = np.arange(antenna_num)
    angles = np.linspace(-60.0, 60.0, num_grids) * np.pi / 180.0
    phase = 2.0 * np.pi * freq * spacing / C_LIGHT * np.outer(m, np.sin(angles))
    a = np.exp(1j * phase)                                       # (M, G)
    D = (a[:, None, :] * np.conj(a)[None, :, :]).reshape(antenna_num ** 2, num_grids)
    return D.astype(np.complex64)


def build_dictionary_band(freq_center, spacing):
    narrow_band = np.array([int(f / 20) for f in freq_center], dtype=np.float64)
    blocks = []
    for bat in range(BATCH):
        rows = []
        for i in range(SEARCH_NUMBERS):
            f_nb = freq_center[bat] + (i - SEARCH_NUMBERS // 2) * narrow_band[bat]
            rows.append(cal_dictionary(f_nb, spacing, ANTENNA_NUM, NUM_GRIDS))
        blocks.append(np.stack(rows, axis=0))
    return jnp.asarray(np.stack(blocks, axis=0))                 # (B, S, M2, G) complex64


if __name__ == "__main__":
    key = jax.random.PRNGKey(0)
    k1, k2 = jax.random.split(key)
    cov_re = jax.random.normal(k1, (BATCH, SEARCH_NUMBERS, ANTENNA_NUM, ANTENNA_NUM),
                               dtype=jnp.float32)
    cov_im = jax.random.normal(k2, (BATCH, SEARCH_NUMBERS, ANTENNA_NUM, ANTENNA_NUM),
                               dtype=jnp.float32)
    cov_matrix = (cov_re + 1j * cov_im).astype(jnp.complex64)

    freq_center = np.array([1.0e6, 1.5e6], dtype=np.float64)    # per-batch center frequencies
    spacing = 100.0                                              # antenna spacing (m)
    dict_band = build_dictionary_band(freq_center, spacing)

    # Dictionary-only operator precomputation (hoisted Gram), done once per dictionary.
    p_plane, big_op, gamma_init = jax.block_until_ready(
        prepare_dictionary_operator(dict_band))

    fwd = jax.jit(ista_forward)
    result, result_ave, result_init_all = fwd(p_plane, big_op, gamma_init, cov_matrix)
    jax.block_until_ready((result, result_ave, result_init_all))

    assert result.shape == (BATCH, SEARCH_NUMBERS, NUM_GRIDS, 1)
    assert result_ave.shape == (BATCH, 1, NUM_GRIDS, 1)
    assert result_init_all.shape == (BATCH, SEARCH_NUMBERS, NUM_LAYERS, NUM_GRIDS, 1)
    assert bool(jnp.all(jnp.isfinite(result)))
    assert bool(jnp.all(jnp.isfinite(result_ave)))
    assert bool(jnp.all(jnp.isfinite(result_init_all)))
    print("KERNEL_OK")
</pallas_src>

<mosaic_0001>
module attributes {stable_mosaic.version = 11 : i64} {
  func.func @ista_kernel(%arg0: i32, %arg1: memref<1x9x128x128xbf16, #tpu.memory_space<vmem>>, %arg2: memref<1x9x2x128xbf16, #tpu.memory_space<vmem>>, %arg3: memref<1x9x256x128xbf16, #tpu.memory_space<vmem>>, %arg4: memref<1x9x1x1xf32, #tpu.memory_space<vmem>>, %arg5: memref<1x9x128xf32, #tpu.memory_space<vmem>>, %arg6: memref<1x1x128xf32, #tpu.memory_space<vmem>>, %arg7: memref<1x4x9x128xf32, #tpu.memory_space<vmem>>) attributes {dimension_semantics = [#tpu.dimension_semantics<parallel>], iteration_bounds = array<i64: 2>, scalar_prefetch = 0 : i64, scratch_operands = 0 : i64, tpu.core_type = #tpu.core_type<tc>, window_params = [{transform_indices = @transform_0, window_bounds = array<i64: 1, 9, 128, 128>}, {transform_indices = @transform_1, window_bounds = array<i64: 1, 9, 2, 128>}, {transform_indices = @transform_2, window_bounds = array<i64: 1, 9, 256, 128>}, {transform_indices = @transform_3, window_bounds = array<i64: 1, 9, 1, 1>}, {transform_indices = @transform_4, window_bounds = array<i64: 1, 9, 128>}, {transform_indices = @transform_5, window_bounds = array<i64: 1, 1, 128>}, {transform_indices = @transform_6, window_bounds = array<i64: 1, 4, 9, 128>}]} {
    %c0 = arith.constant 0 : index
    %c0_0 = arith.constant 0 : index
    %c0_1 = arith.constant 0 : index
    %c0_2 = arith.constant 0 : index
    %0 = vector.load %arg1[%c0, %c0_0, %c0_1, %c0_2] : memref<1x9x128x128xbf16, #tpu.memory_space<vmem>>, vector<1x9x128x128xbf16>
    %1 = vector.shape_cast %0 : vector<1x9x128x128xbf16> to vector<9x128x128xbf16>
    %c0_3 = arith.constant 0 : index
    %c0_4 = arith.constant 0 : index
    %c0_5 = arith.constant 0 : index
    %c0_6 = arith.constant 0 : index
    %2 = vector.load %arg2[%c0_3, %c0_4, %c0_5, %c0_6] : memref<1x9x2x128xbf16, #tpu.memory_space<vmem>>, vector<1x9x2x128xbf16>
    %3 = vector.shape_cast %2 : vector<1x9x2x128xbf16> to vector<9x2x128xbf16>
    %c0_7 = arith.constant 0 : index
    %c0_8 = arith.constant 0 : index
    %c0_9 = arith.constant 0 : index
    %c0_10 = arith.constant 0 : index
    %4 = vector.load %arg3[%c0_7, %c0_8, %c0_9, %c0_10] : memref<1x9x256x128xbf16, #tpu.memory_space<vmem>>, vector<1x9x256x128xbf16>
    %5 = vector.shape_cast %4 : vector<1x9x256x128xbf16> to vector<9x256x128xbf16>
    %c0_11 = arith.constant 0 : index
    %c0_12 = arith.constant 0 : index
    %c0_13 = arith.constant 0 : index
    %c0_14 = arith.constant 0 : index
    %6 = vector.load %arg4[%c0_11, %c0_12, %c0_13, %c0_14] : memref<1x9x1x1xf32, #tpu.memory_space<vmem>>, vector<1x9x1x1xf32>
    %7 = vector.shape_cast %6 : vector<1x9x1x1xf32> to vector<9x1x1xf32>
    %cst = arith.constant dense<0.000000e+00> : vector<9x2x128xf32>
    %8 = tpu.matmul %3, %1, %cst {dimension_numbers = #tpu.dot_dimension_numbers<[2], [2], [1], [1], [0, 0, 0, 1, 1, 1], [0], [0]>} : vector<9x2x128xbf16>, vector<9x128x128xbf16>, vector<9x2x128xf32> -> vector<9x2x128xf32>
    %9 = vector.extract_strided_slice %8 {offsets = [0, 0, 0], sizes = [9, 1, 128], strides = [1, 1, 1]} : vector<9x2x128xf32> to vector<9x1x128xf32>
    %10 = vector.extract_strided_slice %8 {offsets = [0, 1, 0], sizes = [9, 1, 128], strides = [1, 1, 1]} : vector<9x2x128xf32> to vector<9x1x128xf32>
    %11 = arith.mulf %9, %9 : vector<9x1x128xf32>
    %cst_15 = arith.constant dense<0.000000e+00> : vector<9x1xf32>
    %12 = vector.multi_reduction <add>, %11, %cst_15 [2] : vector<9x1x128xf32> to vector<9x1xf32>
    %13 = vector.shape_cast %12 : vector<9x1xf32> to vector<9x1x1xf32>
    %14 = math.sqrt %13 : vector<9x1x1xf32>
    %cst_16 = arith.constant 9.99999968E-21 : f32
    %15 = vector.broadcast %cst_16 : f32 to vector<9x1x1xf32>
    %16 = arith.addf %14, %15 : vector<9x1x1xf32>
    %17 = vector.broadcast %16 : vector<9x1x1xf32> to vector<9x1x128xf32>
    %18 = arith.divf %9, %17 : vector<9x1x128xf32>
    %19 = arith.mulf %10, %10 : vector<9x1x128xf32>
    %20 = arith.addf %11, %19 : vector<9x1x128xf32>
    %21 = math.sqrt %20 : vector<9x1x128xf32>
    %cst_17 = arith.constant dense<0xFF800000> : vector<9x1xf32>
    %22 = vector.multi_reduction <maximumf>, %21, %cst_17 [2] : vector<9x1x128xf32> to vector<9x1xf32>
    %23 = vector.shape_cast %22 : vector<9x1xf32> to vector<9x1x1xf32>
    %cst_18 = arith.constant 5.000000e-01 : f32
    %24 = vector.broadcast %cst_18 : f32 to vector<9x1x1xf32>
    %25 = arith.mulf %24, %23 : vector<9x1x1xf32>
    %cst_19 = arith.constant 1.000000e+00 : f32
    %26 = vector.broadcast %cst_19 : f32 to vector<9x1x1xf32>
    %27 = arith.mulf %26, %25 : vector<9x1x1xf32>
    %28 = arith.mulf %27, %7 : vector<9x1x1xf32>
    %29 = vector.shape_cast %7 : vector<9x1x1xf32> to vector<9x1x1xf32>
    %30 = vector.broadcast %29 : vector<9x1x1xf32> to vector<9x1x128xf32>
    %31 = vector.shape_cast %28 : vector<9x1x1xf32> to vector<9x1x1xf32>
    %32 = vector.broadcast %31 : vector<9x1x1xf32> to vector<9x1x128xf32>
    %33 = arith.mulf %30, %9 : vector<9x1x128xf32>
    %34 = arith.mulf %30, %10 : vector<9x1x128xf32>
    %35 = arith.truncf %18 : vector<9x1x128xf32> to vector<9x1x128xbf16>
    %cst_20 = arith.constant dense<0.000000e+00> : vector<9x1x256xf32>
    %36 = tpu.matmul %35, %5, %cst_20 {dimension_numbers = #tpu.dot_dimension_numbers<[2], [2], [1], [1], [0, 0, 0, 1, 1, 1], [0], [0]>} : vector<9x1x128xbf16>, vector<9x256x128xbf16>, vector<9x1x256xf32> -> vector<9x1x256xf32>
    %37 = vector.extract_strided_slice %36 {offsets = [0, 0, 0], sizes = [9, 1, 128], strides = [1, 1, 1]} : vector<9x1x256xf32> to vector<9x1x128xf32>
    %38 = vector.extract_strided_slice %36 {offsets = [0, 0, 128], sizes = [9, 1, 128], strides = [1, 1, 1]} : vector<9x1x256xf32> to vector<9x1x128xf32>
    %39 = arith.addf %18, %33 : vector<9x1x128xf32>
    %40 = arith.mulf %30, %37 : vector<9x1x128xf32>
    %41 = arith.subf %39, %40 : vector<9x1x128xf32>
    %42 = arith.mulf %30, %38 : vector<9x1x128xf32>
    %43 = arith.subf %34, %42 : vector<9x1x128xf32>
    %44 = arith.mulf %41, %41 : vector<9x1x128xf32>
    %45 = arith.mulf %43, %43 : vector<9x1x128xf32>
    %46 = arith.addf %44, %45 : vector<9x1x128xf32>
    %47 = math.sqrt %46 : vector<9x1x128xf32>
    %48 = arith.subf %47, %32 : vector<9x1x128xf32>
    %cst_21 = arith.constant 0.000000e+00 : f32
    %49 = vector.broadcast %cst_21 : f32 to vector<9x1x128xf32>
    %50 = arith.maximumf %48, %49 : vector<9x1x128xf32>
    %51 = vector.shape_cast %50 : vector<9x1x128xf32> to vector<9x128xf32>
    %c0_22 = arith.constant 0 : index
    %c0_23 = arith.constant 0 : index
    %c0_24 = arith.constant 0 : index
    %c0_25 = arith.constant 0 : index
    %52 = vector.load %arg7[%c0_22, %c0_23, %c0_24, %c0_25] : memref<1x4x9x128xf32, #tpu.memory_space<vmem>>, vector<1x1x9x128xf32>
    %53 = vector.shape_cast %52 : vector<1x1x9x128xf32> to vector<9x128xf32>
    %54 = vector.shape_cast %51 : vector<9x128xf32> to vector<1x1x9x128xf32>
    tpu.vector_store %arg7[%c0_22, %c0_23, %c0_24, %c0_25], %54 {strides = array<i32>} : memref<1x4x9x128xf32, #tpu.memory_space<vmem>>, vector<1x1x9x128xf32>,
    %55 = arith.truncf %50 : vector<9x1x128xf32> to vector<9x1x128xbf16>
    %cst_26 = arith.constant dense<0.000000e+00> : vector<9x1x256xf32>
    %56 = tpu.matmul %55, %5, %cst_26 {dimension_numbers = #tpu.dot_dimension_numbers<[2], [2], [1], [1], [0, 0, 0, 1, 1, 1], [0], [0]>} : vector<9x1x128xbf16>, vector<9x256x128xbf16>, vector<9x1x256xf32> -> vector<9x1x256xf32>
    %57 = vector.extract_strided_slice %56 {offsets = [0, 0, 0], sizes = [9, 1, 128], strides = [1, 1, 1]} : vector<9x1x256xf32> to vector<9x1x128xf32>
    %58 = vector.extract_strided_slice %56 {offsets = [0, 0, 128], sizes = [9, 1, 128], strides = [1, 1, 1]} : vector<9x1x256xf32> to vector<9x1x128xf32>
    %59 = arith.addf %50, %33 : vector<9x1x128xf32>
    %60 = arith.mulf %30, %57 : vector<9x1x128xf32>
    %61 = arith.subf %59, %60 : vector<9x1x128xf32>
    %62 = arith.mulf %30, %58 : vector<9x1x128xf32>
    %63 = arith.subf %34, %62 : vector<9x1x128xf32>
    %64 = arith.mulf %61, %61 : vector<9x1x128xf32>
    %65 = arith.mulf %63, %63 : vector<9x1x128xf32>
    %66 = arith.addf %64, %65 : vector<9x1x128xf32>
    %67 = math.sqrt %66 : vector<9x1x128xf32>
    %68 = arith.subf %67, %32 : vector<9x1x128xf32>
    %cst_27 = arith.constant 0.000000e+00 : f32
    %69 = vector.broadcast %cst_27 : f32 to vector<9x1x128xf32>
    %70 = arith.maximumf %68, %69 : vector<9x1x128xf32>
    %71 = vector.shape_cast %70 : vector<9x1x128xf32> to vector<9x128xf32>
    %c0_28 = arith.constant 0 : index
    %c1 = arith.constant 1 : index
    %c0_29 = arith.constant 0 : index
    %c0_30 = arith.constant 0 : index
    %72 = vector.load %arg7[%c0_28, %c1, %c0_29, %c0_30] : memref<1x4x9x128xf32, #tpu.memory_space<vmem>>, vector<1x1x9x128xf32>
    %73 = vector.shape_cast %72 : vector<1x1x9x128xf32> to vector<9x128xf32>
    %74 = vector.shape_cast %71 : vector<9x128xf32> to vector<1x1x9x128xf32>
    tpu.vector_store %arg7[%c0_28, %c1, %c0_29, %c0_30], %74 {strides = array<i32>} : memref<1x4x9x128xf32, #tpu.memory_space<vmem>>, vector<1x1x9x128xf32>,
    %75 = arith.truncf %70 : vector<9x1x128xf32> to vector<9x1x128xbf16>
    %cst_31 = arith.constant dense<0.000000e+00> : vector<9x1x256xf32>
    %76 = tpu.matmul %75, %5, %cst_31 {dimension_numbers = #tpu.dot_dimension_numbers<[2], [2], [1], [1], [0, 0, 0, 1, 1, 1], [0], [0]>} : vector<9x1x128xbf16>, vector<9x256x128xbf16>, vector<9x1x256xf32> -> vector<9x1x256xf32>
    %77 = vector.extract_strided_slice %76 {offsets = [0, 0, 0], sizes = [9, 1, 128], strides = [1, 1, 1]} : vector<9x1x256xf32> to vector<9x1x128xf32>
    %78 = vector.extract_strided_slice %76 {offsets = [0, 0, 128], sizes = [9, 1, 128], strides = [1, 1, 1]} : vector<9x1x256xf32> to vector<9x1x128xf32>
    %79 = arith.addf %70, %33 : vector<9x1x128xf32>
    %80 = arith.mulf %30, %77 : vector<9x1x128xf32>
    %81 = arith.subf %79, %80 : vector<9x1x128xf32>
    %82 = arith.mulf %30, %78 : vector<9x1x128xf32>
    %83 = arith.subf %34, %82 : vector<9x1x128xf32>
    %84 = arith.mulf %81, %81 : vector<9x1x128xf32>
    %85 = arith.mulf %83, %83 : vector<9x1x128xf32>
    %86 = arith.addf %84, %85 : vector<9x1x128xf32>
    %87 = math.sqrt %86 : vector<9x1x128xf32>
    %88 = arith.subf %87, %32 : vector<9x1x128xf32>
    %cst_32 = arith.constant 0.000000e+00 : f32
    %89 = vector.broadcast %cst_32 : f32 to vector<9x1x128xf32>
    %90 = arith.maximumf %88, %89 : vector<9x1x128xf32>
    %91 = vector.shape_cast %90 : vector<9x1x128xf32> to vector<9x128xf32>
    %c0_33 = arith.constant 0 : index
    %c2 = arith.constant 2 : index
    %c0_34 = arith.constant 0 : index
    %c0_35 = arith.constant 0 : index
    %92 = vector.load %arg7[%c0_33, %c2, %c0_34, %c0_35] : memref<1x4x9x128xf32, #tpu.memory_space<vmem>>, vector<1x1x9x128xf32>
    %93 = vector.shape_cast %92 : vector<1x1x9x128xf32> to vector<9x128xf32>
    %94 = vector.shape_cast %91 : vector<9x128xf32> to vector<1x1x9x128xf32>
    tpu.vector_store %arg7[%c0_33, %c2, %c0_34, %c0_35], %94 {strides = array<i32>} : memref<1x4x9x128xf32, #tpu.memory_space<vmem>>, vector<1x1x9x128xf32>,
    %95 = arith.truncf %90 : vector<9x1x128xf32> to vector<9x1x128xbf16>
    %cst_36 = arith.constant dense<0.000000e+00> : vector<9x1x256xf32>
    %96 = tpu.matmul %95, %5, %cst_36 {dimension_numbers = #tpu.dot_dimension_numbers<[2], [2], [1], [1], [0, 0, 0, 1, 1, 1], [0], [0]>} : vector<9x1x128xbf16>, vector<9x256x128xbf16>, vector<9x1x256xf32> -> vector<9x1x256xf32>
    %97 = vector.extract_strided_slice %96 {offsets = [0, 0, 0], sizes = [9, 1, 128], strides = [1, 1, 1]} : vector<9x1x256xf32> to vector<9x1x128xf32>
    %98 = vector.extract_strided_slice %96 {offsets = [0, 0, 128], sizes = [9, 1, 128], strides = [1, 1, 1]} : vector<9x1x256xf32> to vector<9x1x128xf32>
    %99 = arith.addf %90, %33 : vector<9x1x128xf32>
    %100 = arith.mulf %30, %97 : vector<9x1x128xf32>
    %101 = arith.subf %99, %100 : vector<9x1x128xf32>
    %102 = arith.mulf %30, %98 : vector<9x1x128xf32>
    %103 = arith.subf %34, %102 : vector<9x1x128xf32>
    %104 = arith.mulf %101, %101 : vector<9x1x128xf32>
    %105 = arith.mulf %103, %103 : vector<9x1x128xf32>
    %106 = arith.addf %104, %105 : vector<9x1x128xf32>
    %107 = math.sqrt %106 : vector<9x1x128xf32>
    %108 = arith.subf %107, %32 : vector<9x1x128xf32>
    %cst_37 = arith.constant 0.000000e+00 : f32
    %109 = vector.broadcast %cst_37 : f32 to vector<9x1x128xf32>
    %110 = arith.maximumf %108, %109 : vector<9x1x128xf32>
    %111 = vector.shape_cast %110 : vector<9x1x128xf32> to vector<9x128xf32>
    %c0_38 = arith.constant 0 : index
    %c3 = arith.constant 3 : index
    %c0_39 = arith.constant 0 : index
    %c0_40 = arith.constant 0 : index
    %112 = vector.load %arg7[%c0_38, %c3, %c0_39, %c0_40] : memref<1x4x9x128xf32, #tpu.memory_space<vmem>>, vector<1x1x9x128xf32>
    %113 = vector.shape_cast %112 : vector<1x1x9x128xf32> to vector<9x128xf32>
    %114 = vector.shape_cast %111 : vector<9x128xf32> to vector<1x1x9x128xf32>
    tpu.vector_store %arg7[%c0_38, %c3, %c0_39, %c0_40], %114 {strides = array<i32>} : memref<1x4x9x128xf32, #tpu.memory_space<vmem>>, vector<1x1x9x128xf32>,
    %cst_41 = arith.constant dense<0x7F800000> : vector<9xf32>
    %115 = vector.multi_reduction <minimumf>, %111, %cst_41 [1] : vector<9x128xf32> to vector<9xf32>
    %116 = vector.shape_cast %115 : vector<9xf32> to vector<9x1xf32>
    %cst_42 = arith.constant dense<0xFF800000> : vector<9xf32>
    %117 = vector.multi_reduction <maximumf>, %111, %cst_42 [1] : vector<9x128xf32> to vector<9xf32>
    %118 = vector.shape_cast %117 : vector<9xf32> to vector<9x1xf32>
    %119 = vector.broadcast %116 : vector<9x1xf32> to vector<9x128xf32>
    %120 = arith.subf %111, %119 : vector<9x128xf32>
    %121 = arith.subf %118, %116 : vector<9x1xf32>
    %cst_43 = arith.constant 9.99999968E-21 : f32
    %122 = vector.broadcast %cst_43 : f32 to vector<9x1xf32>
    %123 = arith.addf %121, %122 : vector<9x1xf32>
    %124 = tpu.reciprocal %123 {approx = true} : vector<9x1xf32> -> vector<9x1xf32>
    %125 = vector.broadcast %124 : vector<9x1xf32> to vector<9x128xf32>
    %126 = arith.mulf %120, %125 : vector<9x128xf32>
    %c0_44 = arith.constant 0 : index
    %c0_45 = arith.constant 0 : index
    %c0_46 = arith.constant 0 : index
    %127 = vector.load %arg5[%c0_44, %c0_45, %c0_46] : memref<1x9x128xf32, #tpu.memory_space<vmem>>, vector<1x9x128xf32>
    %128 = vector.shape_cast %127 : vector<1x9x128xf32> to vector<9x128xf32>
    %129 = vector.shape_cast %126 : vector<9x128xf32> to vector<1x9x128xf32>
    tpu.vector_store %arg5[%c0_44, %c0_45, %c0_46], %129 {strides = array<i32>} : memref<1x9x128xf32, #tpu.memory_space<vmem>>, vector<1x9x128xf32>,
    %cst_47 = arith.constant dense<0.000000e+00> : vector<128xf32>
    %130 = vector.multi_reduction <add>, %111, %cst_47 [0] : vector<9x128xf32> to vector<128xf32>
    %131 = vector.shape_cast %130 : vector<128xf32> to vector<1x128xf32>
    %cst_48 = arith.constant 9.000000e+00 : f32
    %132 = vector.broadcast %cst_48 : f32 to vector<1x128xf32>
    %133 = arith.divf %131, %132 : vector<1x128xf32>
    %cst_49 = arith.constant dense<0x7F800000> : vector<1xf32>
    %134 = vector.multi_reduction <minimumf>, %133, %cst_49 [1] : vector<1x128xf32> to vector<1xf32>
    %135 = vector.shape_cast %134 : vector<1xf32> to vector<1x1xf32>
    %cst_50 = arith.constant dense<0xFF800000> : vector<1xf32>
    %136 = vector.multi_reduction <maximumf>, %133, %cst_50 [1] : vector<1x128xf32> to vector<1xf32>
    %137 = vector.shape_cast %136 : vector<1xf32> to vector<1x1xf32>
    %138 = vector.broadcast %135 : vector<1x1xf32> to vector<1x128xf32>
    %139 = arith.subf %133, %138 : vector<1x128xf32>
    %140 = arith.subf %137, %135 : vector<1x1xf32>
    %cst_51 = arith.constant 9.99999968E-21 : f32
    %141 = vector.broadcast %cst_51 : f32 to vector<1x1xf32>
    %142 = arith.addf %140, %141 : vector<1x1xf32>
    %143 = tpu.reciprocal %142 {approx = true} : vector<1x1xf32> -> vector<1x1xf32>
    %144 = vector.broadcast %143 : vector<1x1xf32> to vector<1x128xf32>
    %145 = arith.mulf %139, %144 : vector<1x128xf32>
    %c0_52 = arith.constant 0 : index
    %c0_53 = arith.constant 0 : index
    %c0_54 = arith.constant 0 : index
    %146 = vector.load %arg6[%c0_52, %c0_53, %c0_54] : memref<1x1x128xf32, #tpu.memory_space<vmem>>, vector<1x1x128xf32>
    %147 = vector.shape_cast %146 : vector<1x1x128xf32> to vector<1x128xf32>
    %148 = vector.shape_cast %145 : vector<1x128xf32> to vector<1x1x128xf32>
    tpu.vector_store %arg6[%c0_52, %c0_53, %c0_54], %148 {strides = array<i32>} : memref<1x1x128xf32, #tpu.memory_space<vmem>>, vector<1x1x128xf32>,
    return
  }
  func.func @transform_0(%arg0: i32) -> (i32, i32, i32, i32) {
    %c0_i32 = arith.constant 0 : i32
    %c0_i32_0 = arith.constant 0 : i32
    %c0_i32_1 = arith.constant 0 : i32
    %c0_i32_2 = arith.constant 0 : i32
    return %arg0, %c0_i32, %c0_i32_0, %c0_i32_1 : i32, i32, i32, i32
  }
  func.func @transform_1(%arg0: i32) -> (i32, i32, i32, i32) {
    %c0_i32 = arith.constant 0 : i32
    %c0_i32_0 = arith.constant 0 : i32
    %c0_i32_1 = arith.constant 0 : i32
    %c0_i32_2 = arith.constant 0 : i32
    return %arg0, %c0_i32, %c0_i32_0, %c0_i32_1 : i32, i32, i32, i32
  }
  func.func @transform_2(%arg0: i32) -> (i32, i32, i32, i32) {
    %c0_i32 = arith.constant 0 : i32
    %c0_i32_0 = arith.constant 0 : i32
    %c0_i32_1 = arith.constant 0 : i32
    %c0_i32_2 = arith.constant 0 : i32
    return %arg0, %c0_i32, %c0_i32_0, %c0_i32_1 : i32, i32, i32, i32
  }
  func.func @transform_3(%arg0: i32) -> (i32, i32, i32, i32) {
    %c0_i32 = arith.constant 0 : i32
    %c0_i32_0 = arith.constant 0 : i32
    %c0_i32_1 = arith.constant 0 : i32
    %c0_i32_2 = arith.constant 0 : i32
    return %arg0, %c0_i32, %c0_i32_0, %c0_i32_1 : i32, i32, i32, i32
  }
  func.func @transform_4(%arg0: i32) -> (i32, i32, i32) {
    %c0_i32 = arith.constant 0 : i32
    %c0_i32_0 = arith.constant 0 : i32
    %c0_i32_1 = arith.constant 0 : i32
    return %arg0, %c0_i32, %c0_i32_0 : i32, i32, i32
  }
  func.func @transform_5(%arg0: i32) -> (i32, i32, i32) {
    %c0_i32 = arith.constant 0 : i32
    %c0_i32_0 = arith.constant 0 : i32
    %c0_i32_1 = arith.constant 0 : i32
    return %arg0, %c0_i32, %c0_i32_0 : i32, i32, i32
  }
  func.func @transform_6(%arg0: i32) -> (i32, i32, i32, i32) {
    %c0_i32 = arith.constant 0 : i32
    %c0_i32_0 = arith.constant 0 : i32
    %c0_i32_1 = arith.constant 0 : i32
    %c0_i32_2 = arith.constant 0 : i32
    return %arg0, %c0_i32, %c0_i32_0, %c0_i32_1 : i32, i32, i32, i32
  }
}

</mosaic_0001>

<bundles_post_ra>
// kernel: custom-call
= control target key start
LH: loop header
LB: loop body
LE: loop exit
PB: predicated region body
PF: predicated region fallthrough
CT: control target
= control target key end

     0   :  { %2 = vsyncpa [#allocation0], 0  ;;  %s47_s0 = inlined_call_operand.hbm [shape: c64[2,9,8,8], index: 0, kind: input, shape index: {}]   ;;  %s48_s1 = inlined_call_operand.vmem [shape: f32[2,9,8,8], index: 1, kind: output, shape index: {}]  }
   0x1   :  { %s3_s8 = sshll.u32 %s48_s1, 4  ;;  %s4_s8 = int_to_ptr.vmem [resolvable:$true] %s3_s8 }
   0x2   :  { %s17_s9 = scalar_lea.vmem %s4_s8, 2048  ;;  %p22_p1 = scmp.lt.s32.totalorder %s4_s8, %s4_s8 }
   0x3   :  { %p18_p0 = scmp.ne.s32.totalorder %s4_s8, %s17_s9  ;;  %p23_p2 = scmp.lt.s32.totalorder %s17_s9, %s17_s9 }
   0x5   :  { %p24_p3 = por %p23_p2, %p22_p1 }
   0x7   :  { %p25_p4 = pnand %p24_p3, %p18_p0 }
   0x9   :  { %28 = shalt.err (!%p25_p4)  }
   0xa   :  { %6 = dma.hbm_to_vmem [thread:$0]  %s47_s0, 2048, %s4_s8, [#allocation0] }
   0xb   :  { %29 = dma.done.wait [#allocation0], 2048  }
   0xc   :  { %30 = vsyncadd [#allocation0], 4294965248 }
   0xd   :  { %8 = vsyncpa [#allocation0], 1 }

// kernel: custom-call.1
= control target key start
LH: loop header
LB: loop body
LE: loop exit
PB: predicated region body
PF: predicated region fallthrough
CT: control target
= control target key end

     0   :  { %s51_s0 = inlined_call_operand.hbm [shape: c64[2,9,8,8], index: 0, kind: input, shape index: {}]   ;;  %s52_s1 = inlined_call_operand.vmem [shape: f32[2,9,8,8], index: 1, kind: output, shape index: {}]  }
   0x1   :  { %s2_s8 = scalar_lea.hbm %s51_s0, 2048 }
   0x2   :  { %3 = vsyncpa [#allocation0], 0  ;;  %s4_s11 = sshll.u32 %s52_s1, 4  ;;  %s5_s11 = int_to_ptr.vmem [resolvable:$true] %s4_s11 }
   0x3   :  { %s20_s12 = scalar_lea.vmem %s5_s11, 2048  ;;  %p25_p1 = scmp.lt.s32.totalorder %s5_s11, %s5_s11 }
   0x4   :  { %p21_p0 = scmp.ne.s32.totalorder %s5_s11, %s20_s12  ;;  %p26_p2 = scmp.lt.s32.totalorder %s20_s12, %s20_s12 }
   0x6   :  { %p27_p3 = por %p26_p2, %p25_p1 }
   0x8   :  { %p28_p4 = pnand %p27_p3, %p21_p0 }
   0xa   :  { %31 = shalt.err (!%p28_p4)  }
   0xb   :  { %7 = dma.hbm_to_vmem [thread:$0]  %s2_s8, 2048, %s5_s11, [#allocation0] }
   0xc   :  { %33 = dma.done.wait [#allocation0], 2048  }
   0xd   :  { %34 = vsyncadd [#allocation0], 4294965248 }
   0xe   :  { %9 = vsyncpa [#allocation0], 1 }

// kernel: ista_forward.1
= control target key start
LH: loop header
LB: loop body
LE: loop exit
PB: predicated region body
PF: predicated region fallthrough
CT: control target
= control target key end

     0   :  { %12 = vsyncpa [#allocation3], 0  ;;  %s10015_s0 = inlined_call_operand.vmem [shape: bf16[2,9,128,128], index: 0, kind: input, shape index: {}]   ;;  %s10016_s1 = inlined_call_operand.vmem [shape: bf16[2,9,2,128], index: 1, kind: input, shape index: {}]   ;;  %s10017_s2 = inlined_call_operand.hbm [shape: bf16[2,9,256,128], index: 2, kind: input, shape index: {}]   ;;  %s10018_s3 = inlined_call_operand.vmem [shape: f32[2,9,1,1], index: 3, kind: input, shape index: {}]   ;;  %s10019_s4 = inlined_call_operand.vmem [shape: f32[2,9,128], index: 4, kind: output, shape index: {0}]   ;;  %s10020_s5 = inlined_call_operand.hbm [shape: f32[2,1,128], index: 5, kind: output, shape index: {1}]   ;;  %s10021_s6 = inlined_call_operand.vmem [shape: f32[2,4,9,128], index: 6, kind: output, shape index: {2}]  }
   0x1   :  { %14 = vsyncpa [#allocation3 + $0x1], 0 }
   0x2   :  { %15 = vsyncpa [#allocation4], 0 }
   0x3   :  { %17 = vsyncpa [#allocation4 + $0x1], 0  ;;  %s7562_s21 = smov 0   ;;  %s7564_s22 = smov 0  }
   0x4   :  { %s7566_s23 = smov 0   ;;  %s7568_s24 = smov 0  }
   0x5 LB: > { %s7583_s25 = sadd.s32 4294967295, %s7518_s24   ;;  %s5619_s26 = sadd.s32 4294967294, %s7518_s24   ;;  %s7518_s24 = sphi %s7568_s24, %s10443_s24   ;;  %s7514_s23 = sphi %s7566_s23, %s10442_s23   ;;  %s7510_s22 = sphi %s7564_s22, %s10441_s22   ;;  %s7506_s21 = sphi %s7562_s21, %s10440_s21  }
   0x6   : > { %s7587_s27 = sadd.s32 1, %s7518_s24   ;;  %s82_s28 = sadd.s32 1, %s7514_s23 }
   0x7   : > { %s79_s29 = ssub.s32 %s7518_s24, %s7587_s27  ;;  %p89_p0 = scmp.ne.s32.totalorder %s7514_s23, %s7510_s22 }
   0x8   : > { %p80_p1 = scmp.eq.s32.totalorder %s79_s29, 0  ;;  %p90_p2 = scmp.eq.s32.totalorder %s7518_s24, 0 }
   0x9   : > { %p95_p3 = scmp.ne.s32.totalorder %s7510_s22, %s7506_s21  ;;  %p96_p4 = scmp.eq.s32.totalorder %s7583_s25, 0 }
   0xa   : > { %s7599_s30 = scalar_select %p80_p1, %s7514_s23, %s82_s28  }
   0xb   : > { %p91_p5 = por %p90_p2, %p89_p0  ;;  %p7601_p6 = por %p96_p4, %p95_p3 }
   0xc   : > { %p171_p7 = scmp.eq.s32.totalorder %s7583_s25, 1  ;;  %p177_p8 = scmp.eq.s32.totalorder %s5619_s26, 1 }
   0xd   : > { %s10172_s7 = scalar_select %p7601_p6, 1, 0 }
   0xe   : > { %p6782_p10 = scmp.lt.s32.totalorder %s7518_s24, 2  ;;  %p7608_p11 = por %p171_p7, %p89_p0 }
   0xf   : > { %p7612_p12 = por %p177_p8, %p95_p3  ;;  %s238_s10 = sand.u32 1, %s7514_s23  }
  0x10   : > { %s10173_s8 = scalar_select %p7608_p11, 1, 0 }
  0x11   : > { %s10174_s9 = scalar_select %p7612_p12, 1, 0 }
  0x12   : > { %s6766_s11 = smul.u32 18432, %s7518_s24  ;;  %p7623_p13 = pnand %p6782_p10, %p91_p5 }
  0x13   : > { %s6765_s12 = smul.u32 1152, %s238_s10  ;;  %s7629_s19 = scalar_lea.sflag [#allocation3], %s238_s10 }
  0x14   : > { %s7621_s15 = scalar_lea.hbm %s10017_s2, %s6766_s11  ;;  %p7428_p1 = pneg %p7623_p13 }
  0x15   : > { %s242_s17 = scalar_lea.vmem [#allocation2], %s6765_s12  ;;  %s7426_s20 = scalar_lea.hbm %s7621_s15, 18432 }
  0x16   : > { %s249_s18 = sshll.u32 %s242_s17, 4  ;;  %p7427_p0 = scmp.ne.s32.totalorder %s7621_s15, %s7426_s20  ;;  %s7627_s18 = int_to_ptr.vmem [resolvable:$true] %s249_s18 }
  0x17   : > { %s7431_s29 = scalar_lea.hbm %s10017_s2, 36864  ;;  %p7432_p4 = scmp.lt.s32.totalorder %s7621_s15, %s10017_s2 }
  0x18   : > { %p7429_p2 = pnand %p7428_p1, %p7427_p0  ;;  %p7433_p5 = scmp.lt.s32.totalorder %s7431_s29, %s7426_s20 }
  0x1a   : > { %p7430_p3 = pneg %p7429_p2  ;;  %p7434_p7 = por %p7433_p5, %p7432_p4 }
  0x1c   : > { %p7435_p8 = pnand %p7434_p7, %p7430_p3 }
  0x1e   : > { %7438 = shalt.err (!%p7435_p8)
}
  0x1f   : > { %s7439_s10 = scalar_lea.vmem %s7627_s18, 18432  ;;  %s7520_s12 = smov [#allocation2]  }
  0x20   : > { %p7440_p10 = scmp.ne.s32.totalorder %s7627_s18, %s7439_s10  ;;  %s7444_s14 = sshll.u32 %s7520_s12, 4  ;;  %s7445_s14 = int_to_ptr.vmem [resolvable:$false] %s7444_s14 }
  0x21   : > { %s7446_s17 = scalar_lea.vmem %s7445_s14, 36864  ;;  %p7447_p2 = scmp.lt.s32.totalorder %s7627_s18, %s7445_s14 }
  0x22   : > { %p7442_p9 = pnand %p7440_p10, %p7428_p1  ;;  %p7448_p12 = scmp.lt.s32.totalorder %s7446_s17, %s7439_s10 }
  0x24   : > { %p7443_p0 = pneg %p7442_p9  ;;  %p7449_p11 = por %p7448_p12, %p7447_p2 }
  0x26   : > { %p7450_p6 = pnand %p7449_p11, %p7443_p0 }
  0x28   : > { %7453 = shalt.err (!%p7450_p6)
}
  0x29   : > { %s7521_s20 = smov 64   ;;  %s7522_s26 = smov 4  }
  0x2a   : > { %6777 = dma.hbm_to_vmem [thread:$0]  (!%p7623_p13), %s7621_s15, 18432, %s7627_s18, %s7629_s19, %s7521_s20, %s7521_s20, %s7522_s26  }
  0x2b   : > { %p5623_p9 = scmp.ge.s32.totalorder %s7518_s24, 1  ;;  %p264_p1 = scmp.lt.s32.totalorder %s7518_s24, 3 }
  0x2d   : > { %p265_p3 = pnand %p5623_p9, %p264_p1 }
  0x2f   : > { %268 = sbr.rel (%p265_p3) target bundleno = 2153 (0x869), region = 36 }
  0x34   : > { %s7653_s28 = sand.u32 1, %s7510_s22   ;;  %p10176_p6 = scmp.ne.s32.totalorder %s10172_s7, 0 }
  0x35   : > { %s6767_s29 = smul.u32 1152, %s7653_s28  ;;  %s271_s11 = scalar_lea.sflag [#allocation3], %s7653_s28 }
  0x37   : > { %s7657_s13 = scalar_lea.vmem [#allocation2], %s6767_s29 }
  0x38   : > { %7497 = dma.done.wait (%p10176_p6), %s271_s11, 18432  }
  0x39   : > { %7499 = vsyncadd (%p10176_p6), %s271_s11, 4294948864  ;;  %p325_p11 = scmp.lt.s32.totalorder %s7583_s25, 1  ;;  %v7523_v0 = vmov 0.0   ;;  %vm7524_vm0 = vmmov 0   ;;  %vm1600_vm1 = vcmask 1040384   ;;  %s317_s14 = scalar_lea.vmem [#allocation5], %s7653_s28 }
  0x3a   : > { %6585 = vmatprep.subr.bf16.mxu0 %v7523_v0  ;;  %6605 = vmatprep.subr.bf16.mxu1 %v7523_v0  ;;  %p10437_p13 = scmp.ne.s32.totalorder %s10173_s8, 0 }
  0x3b   : > { %s7667_s15 = scalar_select %p325_p11, %s7583_s25, 1  ;;  %6601 = vmatprep.mubr.msk.bf16.mxu0 %vm7524_vm0, %v7523_v0  ;;  %6621 = vmatprep.mubr.msk.bf16.mxu1 %vm7524_vm0, %v7523_v0 }
  0x3d   : > { %s6768_s7 = smul.u32 576, %s7667_s15  ;;  %s5855_s11 = sshll.u32 %s7667_s15, 6 }
  0x3e   : > { %s6769_s10 = smul.u32 9, %s7667_s15  ;;  %s8945_s18 = scalar_lea.vmem %s10021_s6, %s5855_s11 }
  0x3f   : > { %s7677_s19 = scalar_lea.vmem %s10015_s0, %s6768_s7  ;;  %s7526_s7 = smov [#allocation5]  }
  0x40   : > { %v6823_v1 = vld [vmem:[%s7677_s19 + $0x38] sm:$0xff]   ;;  %v6825_v3 = vld [vmem:[%s7677_s19 + $0x30] sm:$0xff]   ;;  %v6827_v5 = vld [vmem:[%s7677_s19 + $0x28] sm:$0xff]   ;;  %s7715_s17 = scalar_lea.vmem %s10016_s1, %s6769_s10  ;;  %s7988_s29 = scalar_lea.vmem %s10018_s3, %s6769_s10 }
  0x41   : > { %v6824_v2 = vld [vmem:[%s7677_s19 + $0x78] sm:$0xff]   ;;  %6586 = vmatpush3.bf16.xpose.msra.mxu0 %v6823_v1  ;;  %v6826_v4 = vld [vmem:[%s7677_s19 + $0x70] sm:$0xff]   ;;  %v6828_v6 = vld [vmem:[%s7677_s19 + $0x68] sm:$0xff]   ;;  %s7458_s16 = sshll.u32 %s7526_s7, 4  ;;  %s7459_s16 = int_to_ptr.vmem [resolvable:$false] %s7458_s16 }
  0x42   : > { %6606 = vmatpush3.bf16.xpose.msra.mxu1 %v6824_v2  ;;  %6587 = vmatprep.subr.bf16.mxu0 %v7523_v0  ;;  %v6829_v7 = vld [vmem:[%s7677_s19 + $0x20] sm:$0xff]   ;;  %v6831_v9 = vld [vmem:[%s7677_s19 + $0x18] sm:$0xff]   ;;  %v6833_v11 = vld [vmem:[%s7677_s19 + $0x10] sm:$0xff]  }
  0x43   : > { %6607 = vmatprep.subr.bf16.mxu1 %v7523_v0  ;;  %v6830_v8 = vld [vmem:[%s7677_s19 + $0x60] sm:$0xff]   ;;  %v6832_v10 = vld [vmem:[%s7677_s19 + $0x58] sm:$0xff]   ;;  %v6834_v12 = vld [vmem:[%s7677_s19 + $0x50] sm:$0xff]  }
  0x44   : > { %v6835_v13 = vld [vmem:[%s7677_s19 + $0x8] sm:$0xff]   ;;  %v6837_v15 = vld [vmem:[%s7677_s19] sm:$0xff]   ;;  %v6839_v18 = vld [vmem:[%s7677_s19 + $0xb8] sm:$0xff]  }
  0x45   : > { %v6836_v14 = vld [vmem:[%s7677_s19 + $0x48] sm:$0xff]   ;;  %v6838_v16 = vld [vmem:[%s7677_s19 + $0x40] sm:$0xff]   ;;  %v6840_v20 = vld [vmem:[%s7677_s19 + $0xf8] sm:$0xff]  }
  0x46   : > { %v493_v17 = vld [vmem:[%s7715_s17] sm:$0x1]  ;;  %v494_v19 = vld [vmem:[%s7715_s17 + $0x1] sm:$0x1]  ;;  %v6841_v21 = vld [vmem:[%s7677_s19 + $0xb0] sm:$0xff]  }
  0x47   : > { %v6842_v22 = vld [vmem:[%s7677_s19 + $0xf0] sm:$0xff]   ;;  %v6843_v23 = vld [vmem:[%s7677_s19 + $0xa8] sm:$0xff]   ;;  %v6845_v25 = vld [vmem:[%s7677_s19 + $0xa0] sm:$0xff]  }
  0x48   : > { %v6844_v24 = vld [vmem:[%s7677_s19 + $0xe8] sm:$0xff]   ;;  %v6846_v26 = vld [vmem:[%s7677_s19 + $0xe0] sm:$0xff]   ;;  %v6847_v27 = vld [vmem:[%s7677_s19 + $0x98] sm:$0xff]  }
  0x49   : > { %6588 = vmatpush3.bf16.xpose.msra.mxu0 %v6825_v3  ;;  %v6848_v28 = vld [vmem:[%s7677_s19 + $0xd8] sm:$0xff]   ;;  %v6849_v29 = vld [vmem:[%s7677_s19 + $0x90] sm:$0xff]   ;;  %v6851_v31 = vld [vmem:[%s7677_s19 + $0x88] sm:$0xff]  }
  0x4a   : > { %6608 = vmatpush3.bf16.xpose.msra.mxu1 %v6826_v4  ;;  %6589 = vmatprep.subr.bf16.mxu0 %v7523_v0  ;;  %v6850_v30 = vld [vmem:[%s7677_s19 + $0xd0] sm:$0xff]   ;;  %v6852_v32 = vld [vmem:[%s7677_s19 + $0xc8] sm:$0xff]   ;;  %v6853_v33 = vld [vmem:[%s7677_s19 + $0x80] sm:$0xff]  }
  0x4b   : > { %6609 = vmatprep.subr.bf16.mxu1 %v7523_v0  ;;  %v6854_v34 = vld [vmem:[%s7677_s19 + $0xc0] sm:$0xff]   ;;  %v6855_v36 = vld [vmem:[%s7677_s19 + $0x138] sm:$0xff]   ;;  %v6857_v39 = vld [vmem:[%s7677_s19 + $0x130] sm:$0xff]  }
  0x4c   : > { %v495_v35 = vld [vmem:[%s7715_s17 + $0x2] sm:$0x1]  ;;  %v496_v37 = vld [vmem:[%s7715_s17 + $0x3] sm:$0x1]  ;;  %v6856_v38 = vld [vmem:[%s7677_s19 + $0x178] sm:$0xff]  }
  0x4d   : > { %v6858_v40 = vld [vmem:[%s7677_s19 + $0x170] sm:$0xff]   ;;  %v6859_v41 = vld [vmem:[%s7677_s19 + $0x128] sm:$0xff]   ;;  %v6861_v43 = vld [vmem:[%s7677_s19 + $0x120] sm:$0xff]  }
  0x4e   : > { %v6860_v42 = vld [vmem:[%s7677_s19 + $0x168] sm:$0xff]   ;;  %v6862_v44 = vld [vmem:[%s7677_s19 + $0x160] sm:$0xff]   ;;  %v6863_v45 = vld [vmem:[%s7677_s19 + $0x118] sm:$0xff]  }
  0x4f   : > { %v6864_v46 = vld [vmem:[%s7677_s19 + $0x158] sm:$0xff]   ;;  %v6865_v47 = vld [vmem:[%s7677_s19 + $0x110] sm:$0xff]   ;;  %v6867_v49 = vld [vmem:[%s7677_s19 + $0x108] sm:$0xff]  }
  0x50   : > { %v6866_v48 = vld [vmem:[%s7677_s19 + $0x150] sm:$0xff]   ;;  %v6868_v50 = vld [vmem:[%s7677_s19 + $0x148] sm:$0xff]   ;;  %v6869_v51 = vld [vmem:[%s7677_s19 + $0x100] sm:$0xff]  }
  0x51   : > { %6590 = vmatpush3.bf16.xpose.msra.mxu0 %v6827_v5  ;;  %v6870_v52 = vld [vmem:[%s7677_s19 + $0x140] sm:$0xff]   ;;  %v6871_v54 = vld [vmem:[%s7677_s19 + $0x1b8] sm:$0xff]   ;;  %v6873_v57 = vld [vmem:[%s7677_s19 + $0x1b0] sm:$0xff]  }
  0x52   : > { %6610 = vmatpush3.bf16.xpose.msra.mxu1 %v6828_v6  ;;  %6591 = vmatprep.subr.bf16.mxu0 %v7523_v0  ;;  %v497_v53 = vld [vmem:[%s7715_s17 + $0x4] sm:$0x1]  ;;  %v498_v55 = vld [vmem:[%s7715_s17 + $0x5] sm:$0x1]  ;;  %v6872_v56 = vld [vmem:[%s7677_s19 + $0x1f8] sm:$0xff]  }
  0x53   : > { %6611 = vmatprep.subr.bf16.mxu1 %v7523_v0  ;;  %v6874_v58 = vld [vmem:[%s7677_s19 + $0x1f0] sm:$0xff]   ;;  %v6875_v59 = vld [vmem:[%s7677_s19 + $0x1a8] sm:$0xff]   ;;  %v6877_v61 = vld [vmem:[%s7677_s19 + $0x1a0] sm:$0xff]  }
  0x54   : > { %v6876_v60 = vld [vmem:[%s7677_s19 + $0x1e8] sm:$0xff]   ;;  %v6878_v62 = vld [vmem:[%s7677_s19 + $0x1e0] sm:$0xff]   ;;  %v6879_v63 = vld [vmem:[%s7677_s19 + $0x198] sm:$0xff]  }
  0x55   : > { %v6880_v1 = vld [vmem:[%s7677_s19 + $0x1d8] sm:$0xff]   ;;  %v6881_v2 = vld [vmem:[%s7677_s19 + $0x190] sm:$0xff]   ;;  %v6883_v4 = vld [vmem:[%s7677_s19 + $0x188] sm:$0xff]  }
  0x56   : > { %v6882_v3 = vld [vmem:[%s7677_s19 + $0x1d0] sm:$0xff]   ;;  %v6884_v5 = vld [vmem:[%s7677_s19 + $0x1c8] sm:$0xff]   ;;  %v6885_v6 = vld [vmem:[%s7677_s19 + $0x180] sm:$0xff]  }
  0x59   : > { %6592 = vmatpush3.bf16.xpose.msra.mxu0 %v6829_v7  ;;  %v6886_v7 = vld [vmem:[%s7677_s19 + $0x1c0] sm:$0xff]  }
  0x5a   : > { %6612 = vmatpush3.bf16.xpose.msra.mxu1 %v6830_v8  ;;  %6593 = vmatprep.subr.bf16.mxu0 %v7523_v0  ;;  %v6895_v8 = vld [vmem:[%s7657_s13 + $0x78] sm:$0xff]  }
  0x5b   : > { %6613 = vmatprep.subr.bf16.mxu1 %v7523_v0 }
  0x61   : > { %6594 = vmatpush3.bf16.xpose.msra.mxu0 %v6831_v9  ;;  %v499_v9 = vld [vmem:[%s7715_s17 + $0x6] sm:$0x1] }
  0x62   : > { %6614 = vmatpush3.bf16.xpose.msra.mxu1 %v6832_v10  ;;  %6595 = vmatprep.subr.bf16.mxu0 %v7523_v0  ;;  %v6887_v10 = vld [vmem:[%s7677_s19 + $0x238] sm:$0xff]  }
  0x63   : > { %6615 = vmatprep.subr.bf16.mxu1 %v7523_v0 }
  0x69   : > { %6596 = vmatpush3.bf16.xpose.msra.mxu0 %v6833_v11  ;;  %v500_v11 = vld [vmem:[%s7715_s17 + $0x7] sm:$0x1] }
  0x6a   : > { %6616 = vmatpush3.bf16.xpose.msra.mxu1 %v6834_v12  ;;  %6597 = vmatprep.subr.bf16.mxu0 %v7523_v0  ;;  %v6896_v12 = vld [vmem:[%s7657_s13 + $0x38] sm:$0xff]  }
  0x6b   : > { %6617 = vmatprep.subr.bf16.mxu1 %v7523_v0 }
  0x71   : > { %6598 = vmatpush3.bf16.xpose.msra.mxu0 %v6835_v13 }
  0x72   : > { %6618 = vmatpush3.bf16.xpose.msra.mxu1 %v6836_v14  ;;  %6599 = vmatprep.subr.bf16.mxu0 %v7523_v0  ;;  %v6899_v14 = vld [vmem:[%s7657_s13 + $0x70] sm:$0xff]  }
  0x73   : > { %6619 = vmatprep.subr.bf16.mxu1 %v7523_v0 }
  0x79   : > { %6600 = vmatpush3.bf16.xpose.msra.mxu0 %v6837_v15 }
  0x7a   : > { %6620 = vmatpush3.bf16.xpose.msra.mxu1 %v6838_v16  ;;  %6625 = vmatprep.subr.bf16.mxu0 %v7523_v0 }
  0x7b   : > { %6645 = vmatprep.subr.bf16.mxu1 %v7523_v0 }
  0x80   : > { %6602 = vmatmul.mubr.bf16.vlgmr.msra.gmra.mxu0 %v493_v17 }
  0x81   : > { %6622 = vmatmul.mubr.bf16.vlgmr.msra.gmra.mxu1 %v494_v19  ;;  %6626 = vmatpush3.bf16.xpose.msra.mxu0 %v6839_v18 }
  0x82   : > { %6646 = vmatpush3.bf16.xpose.msra.mxu1 %v6840_v20  ;;  %6627 = vmatprep.subr.bf16.mxu0 %v7523_v0 }
  0x83   : > { %6647 = vmatprep.subr.bf16.mxu1 %v7523_v0  ;;  %6641 = vmatprep.mubr.msk.bf16.mxu0 %vm7524_vm0, %v7523_v0 }
  0x84   : > { %6661 = vmatprep.mubr.msk.bf16.mxu1 %vm7524_vm0, %v7523_v0 }
  0x89   : > { %6628 = vmatpush3.bf16.xpose.msra.mxu0 %v6841_v21 }
  0x8a   : > { %6648 = vmatpush3.bf16.xpose.msra.mxu1 %v6842_v22  ;;  %6629 = vmatprep.subr.bf16.mxu0 %v7523_v0 }
  0x8b   : > { %6649 = vmatprep.subr.bf16.mxu1 %v7523_v0 }
  0x91   : > { %6630 = vmatpush3.bf16.xpose.msra.mxu0 %v6843_v23  ;;  %v6888_v23 = vld [vmem:[%s7677_s19 + $0x230] sm:$0xff]  }
  0x92   : > { %6650 = vmatpush3.bf16.xpose.msra.mxu1 %v6844_v24  ;;  %6631 = vmatprep.subr.bf16.mxu0 %v7523_v0 }
  0x93   : > { %6651 = vmatprep.subr.bf16.mxu1 %v7523_v0 }
  0x99   : > { %6632 = vmatpush3.bf16.xpose.msra.mxu0 %v6845_v25 }
  0x9a   : > { %6652 = vmatpush3.bf16.xpose.msra.mxu1 %v6846_v26  ;;  %6633 = vmatprep.subr.bf16.mxu0 %v7523_v0 }
  0x9b   : > { %6653 = vmatprep.subr.bf16.mxu1 %v7523_v0 }
  0xa1   : > { %6634 = vmatpush3.bf16.xpose.msra.mxu0 %v6847_v27  ;;  %v6900_v27 = vld [vmem:[%s7657_s13 + $0x30] sm:$0xff]  }
  0xa2   : > { %6654 = vmatpush3.bf16.xpose.msra.mxu1 %v6848_v28  ;;  %6635 = vmatprep.subr.bf16.mxu0 %v7523_v0  ;;  %v6903_v28 = vld [vmem:[%s7657_s13 + $0x68] sm:$0xff]  }
  0xa3   : > { %6655 = vmatprep.subr.bf16.mxu1 %v7523_v0 }
  0xa9   : > { %6636 = vmatpush3.bf16.xpose.msra.mxu0 %v6849_v29  ;;  %v6889_v29 = vld [vmem:[%s7677_s19 + $0x228] sm:$0xff]  }
  0xaa   : > { %6656 = vmatpush3.bf16.xpose.msra.mxu1 %v6850_v30  ;;  %6637 = vmatprep.subr.bf16.mxu0 %v7523_v0  ;;  %v6904_v30 = vld [vmem:[%s7657_s13 + $0x28] sm:$0xff]  }
  0xab   : > { %6657 = vmatprep.subr.bf16.mxu1 %v7523_v0 }
  0xb1   : > { %6638 = vmatpush3.bf16.xpose.msra.mxu0 %v6851_v31  ;;  %v6907_v31 = vld [vmem:[%s7657_s13 + $0x60] sm:$0xff]  }
  0xb2   : > { %6658 = vmatpush3.bf16.xpose.msra.mxu1 %v6852_v32  ;;  %6639 = vmatprep.subr.bf16.mxu0 %v7523_v0  ;;  %v6890_v32 = vld [vmem:[%s7677_s19 + $0x220] sm:$0xff]  }
  0xb3   : > { %6659 = vmatprep.subr.bf16.mxu1 %v7523_v0 }
  0xb9   : > { %6640 = vmatpush3.bf16.xpose.msra.mxu0 %v6853_v33  ;;  %v6908_v33 = vld [vmem:[%s7657_s13 + $0x20] sm:$0xff]  }
  0xba   : > { %6660 = vmatpush3.bf16.xpose.msra.mxu1 %v6854_v34  ;;  %6665 = vmatprep.subr.bf16.mxu0 %v7523_v0  ;;  %v6911_v34 = vld [vmem:[%s7657_s13 + $0x58] sm:$0xff]  }
  0xbb   : > { %6685 = vmatprep.subr.bf16.mxu1 %v7523_v0 }
  0xc0   : > { %6642 = vmatmul.mubr.bf16.vlgmr.msra.gmra.mxu0 %v495_v35  ;;  %v6891_v35 = vld [vmem:[%s7677_s19 + $0x218] sm:$0xff]  }
  0xc1   : > { %6662 = vmatmul.mubr.bf16.vlgmr.msra.gmra.mxu1 %v496_v37  ;;  %6666 = vmatpush3.bf16.xpose.msra.mxu0 %v6855_v36  ;;  %v6912_v36 = vld [vmem:[%s7657_s13 + $0x18] sm:$0xff]   ;;  %v6915_v37 = vld [vmem:[%s7657_s13 + $0x50] sm:$0xff]  }
  0xc2   : > { %6686 = vmatpush3.bf16.xpose.msra.mxu1 %v6856_v38  ;;  %6667 = vmatprep.subr.bf16.mxu0 %v7523_v0  ;;  %v6892_v38 = vld [vmem:[%s7677_s19 + $0x210] sm:$0xff]  }
  0xc3   : > { %6687 = vmatprep.subr.bf16.mxu1 %v7523_v0  ;;  %6681 = vmatprep.mubr.msk.bf16.mxu0 %vm7524_vm0, %v7523_v0 }
  0xc4   : > { %6701 = vmatprep.mubr.msk.bf16.mxu1 %vm7524_vm0, %v7523_v0 }
  0xc9   : > { %6668 = vmatpush3.bf16.xpose.msra.mxu0 %v6857_v39  ;;  %v6916_v39 = vld [vmem:[%s7657_s13 + $0x10] sm:$0xff]  }
  0xca   : > { %6688 = vmatpush3.bf16.xpose.msra.mxu1 %v6858_v40  ;;  %6669 = vmatprep.subr.bf16.mxu0 %v7523_v0  ;;  %v6919_v40 = vld [vmem:[%s7657_s13 + $0x48] sm:$0xff]  }
  0xcb   : > { %6689 = vmatprep.subr.bf16.mxu1 %v7523_v0 }
  0xd1   : > { %6670 = vmatpush3.bf16.xpose.msra.mxu0 %v6859_v41  ;;  %v6893_v41 = vld [vmem:[%s7677_s19 + $0x208] sm:$0xff]  }
  0xd2   : > { %6690 = vmatpush3.bf16.xpose.msra.mxu1 %v6860_v42  ;;  %6671 = vmatprep.subr.bf16.mxu0 %v7523_v0  ;;  %v6920_v42 = vld [vmem:[%s7657_s13 + $0x8] sm:$0xff]  }
  0xd3   : > { %6691 = vmatprep.subr.bf16.mxu1 %v7523_v0 }
  0xd9   : > { %6672 = vmatpush3.bf16.xpose.msra.mxu0 %v6861_v43  ;;  %v6923_v43 = vld [vmem:[%s7657_s13 + $0x40] sm:$0xff]  }
  0xda   : > { %6692 = vmatpush3.bf16.xpose.msra.mxu1 %v6862_v44  ;;  %6673 = vmatprep.subr.bf16.mxu0 %v7523_v0  ;;  %v6894_v44 = vld [vmem:[%s7677_s19 + $0x200] sm:$0xff]  }
  0xdb   : > { %6693 = vmatprep.subr.bf16.mxu1 %v7523_v0 }
  0xe1   : > { %6674 = vmatpush3.bf16.xpose.msra.mxu0 %v6863_v45  ;;  %v6897_v45 = vld [vmem:[%s7657_s13 + $0xf8] sm:$0xff]  }
  0xe2   : > { %6694 = vmatpush3.bf16.xpose.msra.mxu1 %v6864_v46  ;;  %6675 = vmatprep.subr.bf16.mxu0 %v7523_v0  ;;  %v6924_v46 = vld [vmem:[%s7657_s13] sm:$0xff]  }
  0xe3   : > { %6695 = vmatprep.subr.bf16.mxu1 %v7523_v0 }
  0xe9   : > { %6676 = vmatpush3.bf16.xpose.msra.mxu0 %v6865_v47  ;;  %v6927_v47 = vld [vmem:[%s7657_s13 + $0x178] sm:$0xff]  }
  0xea   : > { %6696 = vmatpush3.bf16.xpose.msra.mxu1 %v6866_v48  ;;  %6677 = vmatprep.subr.bf16.mxu0 %v7523_v0  ;;  %v501_v48 = vld [vmem:[%s7715_s17 + $0x8] sm:$0x1]  ;;  %s5464_s17 = sshll.u32 %s317_s14, 4  ;;  %s9972_s17 = int_to_ptr.vmem [resolvable:$true] %s5464_s17 }
  0xeb   : > { %6697 = vmatprep.subr.bf16.mxu1 %v7523_v0  ;;  %s7454_s11 = scalar_lea.vmem %s9972_s17, 16  ;;  %p7461_p7 = scmp.lt.s32.totalorder %s9972_s17, %s7459_s16 }
  0xec   : > { %p7455_p12 = scmp.ne.s32.totalorder %s9972_s17, %s7454_s11 }
  0xee   : > { %p7456_p4 = pnand %p7455_p12, %p10437_p13 }
  0xf0   : > { %p7457_p5 = pneg %p7456_p4 }
  0xf1   : > { %6678 = vmatpush3.bf16.xpose.msra.mxu0 %v6867_v49  ;;  %v6898_v49 = vld [vmem:[%s7657_s13 + $0xb8] sm:$0xff]  }
  0xf2   : > { %6698 = vmatpush3.bf16.xpose.msra.mxu1 %v6868_v50  ;;  %6679 = vmatprep.subr.bf16.mxu0 %v7523_v0  ;;  %v6901_v50 = vld [vmem:[%s7657_s13 + $0xf0] sm:$0xff]  }
  0xf3   : > { %6699 = vmatprep.subr.bf16.mxu1 %v7523_v0 }
  0xf9   : > { %6680 = vmatpush3.bf16.xpose.msra.mxu0 %v6869_v51 }
  0xfa   : > { %6700 = vmatpush3.bf16.xpose.msra.mxu1 %v6870_v52  ;;  %6705 = vmatprep.subr.bf16.mxu0 %v7523_v0 }
  0xfb   : > { %6725 = vmatprep.subr.bf16.mxu1 %v7523_v0 }
 0x100   : > { %6682 = vmatmul.mubr.bf16.vlgmr.msra.gmra.mxu0 %v497_v53 }
 0x101   : > { %6702 = vmatmul.mubr.bf16.vlgmr.msra.gmra.mxu1 %v498_v55  ;;  %6706 = vmatpush3.bf16.xpose.msra.mxu0 %v6871_v54 }
 0x102   : > { %6726 = vmatpush3.bf16.xpose.msra.mxu1 %v6872_v56  ;;  %6707 = vmatprep.subr.bf16.mxu0 %v7523_v0 }
 0x103   : > { %6727 = vmatprep.subr.bf16.mxu1 %v7523_v0  ;;  %6721 = vmatprep.mubr.msk.bf16.mxu0 %vm7524_vm0, %v7523_v0 }
 0x104   : > { %6741 = vmatprep.mubr.msk.bf16.mxu1 %vm7524_vm0, %v7523_v0 }
 0x109   : > { %6708 = vmatpush3.bf16.xpose.msra.mxu0 %v6873_v57 }
 0x10a   : > { %6728 = vmatpush3.bf16.xpose.msra.mxu1 %v6874_v58  ;;  %6709 = vmatprep.subr.bf16.mxu0 %v7523_v0 }
 0x10b   : > { %6729 = vmatprep.subr.bf16.mxu1 %v7523_v0 }
 0x111   : > { %6710 = vmatpush3.bf16.xpose.msra.mxu0 %v6875_v59 }
 0x112   : > { %6730 = vmatpush3.bf16.xpose.msra.mxu1 %v6876_v60  ;;  %6711 = vmatprep.subr.bf16.mxu0 %v7523_v0  ;;  %v6902_v60 = vld [vmem:[%s7657_s13 + $0xb0] sm:$0xff]  }
 0x113   : > { %6731 = vmatprep.subr.bf16.mxu1 %v7523_v0 }
 0x119   : > { %6712 = vmatpush3.bf16.xpose.msra.mxu0 %v6877_v61 }
 0x11a   : > { %6732 = vmatpush3.bf16.xpose.msra.mxu1 %v6878_v62  ;;  %6713 = vmatprep.subr.bf16.mxu0 %v7523_v0  ;;  %v6905_v62 = vld [vmem:[%s7657_s13 + $0xe8] sm:$0xff]  }
 0x11b   : > { %6733 = vmatprep.subr.bf16.mxu1 %v7523_v0 }
 0x121   : > { %6714 = vmatpush3.bf16.xpose.msra.mxu0 %v6879_v63 }
 0x122   : > { %6734 = vmatpush3.bf16.xpose.msra.mxu1 %v6880_v1  ;;  %6715 = vmatprep.subr.bf16.mxu0 %v7523_v0  ;;  %v6906_v1 = vld [vmem:[%s7657_s13 + $0xa8] sm:$0xff]  }
 0x123   : > { %6735 = vmatprep.subr.bf16.mxu1 %v7523_v0 }
 0x129   : > { %6716 = vmatpush3.bf16.xpose.msra.mxu0 %v6881_v2  ;;  %v6909_v2 = vld [vmem:[%s7657_s13 + $0xe0] sm:$0xff]  }
 0x12a   : > { %6736 = vmatpush3.bf16.xpose.msra.mxu1 %v6882_v3  ;;  %6717 = vmatprep.subr.bf16.mxu0 %v7523_v0  ;;  %v6910_v3 = vld [vmem:[%s7657_s13 + $0xa0] sm:$0xff]  }
 0x12b   : > { %6737 = vmatprep.subr.bf16.mxu1 %v7523_v0 }
 0x131   : > { %6718 = vmatpush3.bf16.xpose.msra.mxu0 %v6883_v4  ;;  %v6913_v4 = vld [vmem:[%s7657_s13 + $0xd8] sm:$0xff]  }
 0x132   : > { %6738 = vmatpush3.bf16.xpose.msra.mxu1 %v6884_v5  ;;  %6719 = vmatprep.subr.bf16.mxu0 %v7523_v0  ;;  %v6914_v5 = vld [vmem:[%s7657_s13 + $0x98] sm:$0xff]  }
 0x133   : > { %6739 = vmatprep.subr.bf16.mxu1 %v7523_v0 }
 0x139   : > { %6720 = vmatpush3.bf16.xpose.msra.mxu0 %v6885_v6  ;;  %v6917_v6 = vld [vmem:[%s7657_s13 + $0xd0] sm:$0xff]  }
 0x13a   : > { %6740 = vmatpush3.bf16.xpose.msra.mxu1 %v6886_v7  ;;  %6745 = vmatprep.subr.bf16.mxu0 %v7523_v0  ;;  %v7525_v7 = vmov 0  }
 0x13b   : > { %5937 = vmatprep.subr.bf16.mxu1 %v6895_v8  ;;  %6821 = vset.pattern.permute.xlu0 %v7525_v7  ;;  %v6918_v8 = vld [vmem:[%s7657_s13 + $0x90] sm:$0xff]  }
 0x13c   : > { %6822 = vset.pattern.permute.xlu1 %v7525_v7  ;;  %v6936_v7 = vld [vmem:[%s7657_s13 + $0x128] sm:$0xff]  }
 0x140   : > { %v7837_v13 = vpop.f32.mrf.mxu0  ;;  %6722 = vmatmul.mubr.bf16.vlgmr.msra.gmra.mxu0 %v499_v9  ;;  %v6921_v9 = vld [vmem:[%s7657_s13 + $0xc8] sm:$0xff]  }
 0x141   : > { %v7842_v15 = vmul.f32 %v7837_v13, %v7837_v13  ;;  %6742 = vmatmul.mubr.bf16.vlgmr.msra.gmra.mxu1 %v500_v11  ;;  %6746 = vmatpush3.bf16.xpose.msra.mxu0 %v6887_v10  ;;  %v7844_v16 = vpop.f32.mrf.mxu1  ;;  %v6922_v10 = vld [vmem:[%s7657_s13 + $0x88] sm:$0xff]   ;;  %v6925_v11 = vld [vmem:[%s7657_s13 + $0xc0] sm:$0xff]  }
 0x142   : > { %v6603_v17 = vpop.f32.mrf.mxu0  ;;  %v7848_v18 = vmul.f32 %v7844_v16, %v7844_v16  ;;  %6747 = vmatprep.subr.bf16.mxu0 %v7523_v0  ;;  %6761 = vmatprep.mubr.msk.bf16.mxu0 %vm7524_vm0, %v7523_v0 }
 0x143   : > { %v1601_v19 = vsel %vm1600_vm1, %v7842_v15, 0.0  ;;  %v6623_v20 = vpop.f32.mrf.mxu1  ;;  %5938 = vmatpush3.bf16.xpose.msra.mxu1 %v6896_v12  ;;  %v6926_v12 = vld [vmem:[%s7657_s13 + $0x80] sm:$0xff]  }
 0x144   : > { %1602 = vadd.xlane.f32.xlu0 %v1601_v19  ;;  %v884_v21 = vpop.f32.mrf.mxu0  ;;  %5939 = vmatprep.subr.bf16.mxu1 %v6899_v14  ;;  %v1604_v22 = vsel %vm1600_vm1, %v7848_v18, 0.0  ;;  %v6929_v14 = vld [vmem:[%s7657_s13 + $0x1f8] sm:$0xff]  }
 0x145   : > { %v972_v24 = vpop.f32.mrf.mxu1 }
 0x146   : > { %v6604_v25 = vpop.f32.mrf.mxu0 }
 0x147   : > { %v6624_v26 = vpop.f32.mrf.mxu1 }
 0x148   : > { %1605 = vadd.xlane.f32.xlu0 %v1604_v22 }
 0x149   : > { %6748 = vmatpush3.bf16.xpose.msra.mxu0 %v6888_v23 }
 0x14a   : > { %6749 = vmatprep.subr.bf16.mxu0 %v7523_v0 }
 0x14b   : > { %5940 = vmatpush3.bf16.xpose.msra.mxu1 %v6900_v27 }
 0x14c   : > { %5941 = vmatprep.subr.bf16.mxu1 %v6903_v28 }
 0x151   : > { %6750 = vmatpush3.bf16.xpose.msra.mxu0 %v6889_v29 }
 0x152   : > { %6751 = vmatprep.subr.bf16.mxu0 %v7523_v0 }
 0x153   : > { %5942 = vmatpush3.bf16.xpose.msra.mxu1 %v6904_v30 }
 0x154   : > { %5943 = vmatprep.subr.bf16.mxu1 %v6907_v31 }
 0x159   : > { %6752 = vmatpush3.bf16.xpose.msra.mxu0 %v6890_v32 }
 0x15a   : > { %6753 = vmatprep.subr.bf16.mxu0 %v7523_v0 }
 0x15b   : > { %5944 = vmatpush3.bf16.xpose.msra.mxu1 %v6908_v33 }
 0x15c   : > { %5945 = vmatprep.subr.bf16.mxu1 %v6911_v34 }
 0x161   : > { %6754 = vmatpush3.bf16.xpose.msra.mxu0 %v6891_v35 }
 0x162   : > { %6755 = vmatprep.subr.bf16.mxu0 %v7523_v0 }
 0x163   : > { %5946 = vmatpush3.bf16.xpose.msra.mxu1 %v6912_v36 }
 0x164   : > { %5947 = vmatprep.subr.bf16.mxu1 %v6915_v37 }
 0x169   : > { %6756 = vmatpush3.bf16.xpose.msra.mxu0 %v6892_v38 }
 0x16a   : > { %6757 = vmatprep.subr.bf16.mxu0 %v7523_v0 }
 0x16b   : > { %5948 = vmatpush3.bf16.xpose.msra.mxu1 %v6916_v39 }
 0x16c   : > { %5949 = vmatprep.subr.bf16.mxu1 %v6919_v40 }
 0x171   : > { %6758 = vmatpush3.bf16.xpose.msra.mxu0 %v6893_v41 }
 0x172   : > { %6759 = vmatprep.subr.bf16.mxu0 %v7523_v0 }
 0x173   : > { %5950 = vmatpush3.bf16.xpose.msra.mxu1 %v6920_v42 }
 0x174   : > { %5951 = vmatprep.subr.bf16.mxu1 %v6923_v43 }
 0x179   : > { %6760 = vmatpush3.bf16.xpose.msra.mxu0 %v6894_v44  ;;  %v1727_v44 = vrot.slane %v7842_v15, 1 }
 0x17a   : > { %5955 = vmatprep.subr.bf16.mxu0 %v6897_v45 }
 0x17b   : > { %5952 = vmatpush3.bf16.xpose.msra.mxu1 %v6924_v46  ;;  %v1745_v45 = vadd.f32 %v1727_v44, %v7842_v15 }
 0x17c   : > { %5973 = vmatprep.subr.bf16.mxu1 %v6927_v47 }
 0x17d   : > { %vm1756_vm6 = vcmp.eq.f32.partialorder %v1745_v45, inf  ;;  %vm1758_vm7 = vcmp.eq.f32.partialorder %v1745_v45, 0.0 }
 0x180   : > { %v7888_v51 = vpop.f32.mrf.mxu0  ;;  %6762 = vmatmul.mubr.bf16.vlgmr.msra.gmra.mxu0 %v501_v48 }
 0x181   : > { %v7892_v0 = vmul.f32 %v7888_v51, %v7888_v51  ;;  %v7894_v52 = vpop.f32.mrf.mxu1  ;;  %5956 = vmatpush3.bf16.xpose.msra.mxu0 %v6898_v49  ;;  %v6928_v49 = vld [vmem:[%s7657_s13 + $0x138] sm:$0xff]  }
 0x182   : > { %v6643_v53 = vpop.f32.mrf.mxu0  ;;  %v7898_v54 = vmul.f32 %v7894_v52, %v7894_v52  ;;  %5957 = vmatprep.subr.bf16.mxu0 %v6901_v50 }
 0x183   : > { %v1607_v55 = vsel %vm1600_vm1, %v7892_v0, 0.0  ;;  %v6663_v56 = vpop.f32.mrf.mxu1  ;;  %v6931_v53 = vld [vmem:[%s7657_s13 + $0x170] sm:$0xff]  }
 0x184   : > { %1608 = vadd.xlane.f32.xlu1 %v1607_v55  ;;  %v1060_v57 = vpop.f32.mrf.mxu0  ;;  %v1610_v58 = vsel %vm1600_vm1, %v7898_v54, 0.0  ;;  %v6930_v56 = vld [vmem:[%s7657_s13 + $0x1b8] sm:$0xff]  }
 0x185   : > { %v1148_v59 = vpop.f32.mrf.mxu1  ;;  %v6933_v57 = vld [vmem:[%s7657_s13 + $0x1f0] sm:$0xff]  }
 0x186   : > { %v6644_v61 = vpop.f32.mrf.mxu0  ;;  %v6932_v59 = vld [vmem:[%s7657_s13 + $0x130] sm:$0xff]  }
 0x187   : > { %v6664_v63 = vpop.f32.mrf.mxu1 }
 0x188   : > { %1611 = vadd.xlane.f32.xlu1 %v1610_v58  ;;  %v6937_v63 = vld [vmem:[%s7657_s13 + $0x1e8] sm:$0xff]  }
 0x189   : > { %5958 = vmatpush3.bf16.xpose.msra.mxu0 %v6902_v60  ;;  %v6935_v60 = vld [vmem:[%s7657_s13 + $0x168] sm:$0xff]  }
 0x18a   : > { %5959 = vmatprep.subr.bf16.mxu0 %v6905_v62  ;;  %v6934_v62 = vld [vmem:[%s7657_s13 + $0x1b0] sm:$0xff]  }
 0x191   : > { %5960 = vmatpush3.bf16.xpose.msra.mxu0 %v6906_v1 }
 0x192   : > { %5961 = vmatprep.subr.bf16.mxu0 %v6909_v2 }
 0x199   : > { %5962 = vmatpush3.bf16.xpose.msra.mxu0 %v6910_v3 }
 0x19a   : > { %5963 = vmatprep.subr.bf16.mxu0 %v6913_v4 }
 0x1a1   : > { %5964 = vmatpush3.bf16.xpose.msra.mxu0 %v6914_v5 }
 0x1a2   : > { %5965 = vmatprep.subr.bf16.mxu0 %v6917_v6 }
 0x1a9   : > { %5966 = vmatpush3.bf16.xpose.msra.mxu0 %v6918_v8  ;;  %v1759_v8 = vand.u32 2147483648, %v1745_v45 }
 0x1aa   : > { %5967 = vmatprep.subr.bf16.mxu0 %v6921_v9 }
 0x1b1   : > { %5968 = vmatpush3.bf16.xpose.msra.mxu0 %v6922_v10  ;;  %v6939_v10 = vld [vmem:[%s7657_s13 + $0x160] sm:$0xff]  }
 0x1b2   : > { %5969 = vmatprep.subr.bf16.mxu0 %v6925_v11 }
 0x1b9   : > { %5970 = vmatpush3.bf16.xpose.msra.mxu0 %v6926_v12 }
 0x1ba   : > { %5991 = vmatprep.subr.bf16.mxu0 %v6929_v14 }
 0x1c0   : > { %v7918_v17 = vpop.f32.mrf.mxu0 }
 0x1c1   : > { %v7922_v19 = vmul.f32 %v7918_v17, %v7918_v17  ;;  %v7924_v20 = vpop.f32.mrf.mxu1 }
 0x1c2   : > { %10177 = vst [vmem:[#allocation8_spill] sm:$0xff] %v7924_v20  ;;  %v7928_v21 = vmul.f32 %v7924_v20, %v7924_v20  ;;  %v6683_v22 = vpop.f32.mrf.mxu0 }
 0x1c3   : > { %v1613_v23 = vsel %vm1600_vm1, %v7922_v19, 0.0  ;;  %v6703_v24 = vpop.f32.mrf.mxu1 }
 0x1c4   : > { %v1616_v25 = vsel %vm1600_vm1, %v7928_v21, 0.0  ;;  %1614 = vadd.xlane.f32.xlu0 %v1613_v23  ;;  %v1236_v26 = vpop.f32.mrf.mxu0 }
 0x1c5   : > { %1617 = vadd.xlane.f32.xlu1 %v1616_v25  ;;  %v1324_v27 = vpop.f32.mrf.mxu1  ;;  %v6938_v25 = vld [vmem:[%s7657_s13 + $0x1a8] sm:$0xff]  }
 0x1c6   : > { %v6684_v28 = vpop.f32.mrf.mxu0  ;;  %v6941_v27 = vld [vmem:[%s7657_s13 + $0x1e0] sm:$0xff]  }
 0x1c7   : > { %v6704_v29 = vpop.f32.mrf.mxu1 }
 0x1c8   : > { %v6940_v29 = vld [vmem:[%s7657_s13 + $0x120] sm:$0xff]  }
 0x1cd   : > { %v1603_v30 = vpop.xlane.xlu0 %1602 }
 0x1ce   : > { %7039 = vrsqrt.f32 %v1603_v30  ;;  %vm1630_vm2 = vcmp.eq.f32.partialorder %v1603_v30, inf  ;;  %v1633_v34 = vand.u32 2147483648, %v1603_v30  ;;  %vm1632_vm3 = vcmp.eq.f32.partialorder %v1603_v30, 0.0 }
 0x1d1   : > { %v1606_v31 = vpop.xlane.xlu0 %1605 }
 0x1d2   : > { %7041 = vrsqrt.f32 %v1606_v31  ;;  %vm1637_vm4 = vcmp.eq.f32.partialorder %v1606_v31, inf  ;;  %v1640_v38 = vand.u32 2147483648, %v1606_v31  ;;  %vm1639_vm5 = vcmp.eq.f32.partialorder %v1606_v31, 0.0 }
 0x1db   : > { %v7040_v32 = vpop.eup %7039 }
 0x1dc   : > { %v1629_v33 = vmul.f32 %v7040_v32, %v1603_v30  ;;  %v6942_v32 = vld [vmem:[%s7657_s13 + $0x1a0] sm:$0xff]  }
 0x1de   : > { %v1631_v35 = vsel %vm1630_vm2, %v1603_v30, %v1629_v33  ;;  %v6943_v30 = vld [vmem:[%s7657_s13 + $0x158] sm:$0xff]  }
 0x1df   : > { %v7042_v36 = vpop.eup %7041  ;;  %v1634_v37 = vsel %vm1632_vm3, %v1633_v34, %v1631_v35  ;;  %v6945_v33 = vld [vmem:[%s7657_s13 + $0x1d8] sm:$0xff]  }
 0x1e0   : > { %v1691_v39 = vadd.f32 1e-20, %v1634_v37  ;;  %v1636_v40 = vmul.f32 %v7042_v36, %v1606_v31  ;;  %v6944_v35 = vld [vmem:[%s7657_s13 + $0x118] sm:$0xff]   ;;  %v6947_v36 = vld [vmem:[%s7657_s13 + $0x150] sm:$0xff]  }
 0x1e1   : > { %v6946_v37 = vld [vmem:[%s7657_s13 + $0x198] sm:$0xff]  }
 0x1e2   : > { %7043 = vrcp.f32 %v1691_v39  ;;  %v1638_v41 = vsel %vm1637_vm4, %v1606_v31, %v1636_v40  ;;  %v1731_v39 = vrot.slane %v7922_v19, 1  ;;  %v6948_v40 = vld [vmem:[%s7657_s13 + $0x110] sm:$0xff]  }
 0x1e3   : > { %v1641_v42 = vsel %vm1639_vm5, %v1640_v38, %v1638_v41  ;;  %v6949_v38 = vld [vmem:[%s7657_s13 + $0x1d0] sm:$0xff]  }
 0x1e4   : > { %v1692_v43 = vadd.f32 1e-20, %v1641_v42  ;;  %v7993_v42 = vld [vmem:[%s7988_s29] sm:$0x1] }
 0x1e6   : > { %7045 = vrcp.f32 %v1692_v43  ;;  %v6951_v43 = vld [vmem:[%s7657_s13 + $0x148] sm:$0xff]  }
 0x1e7   : > { %7047 = vrsqrt.f32 %v1745_v45 }
 0x1ef   : > { %v7044_v46 = vpop.eup %7043 }
 0x1f0   : > { %v7937_v47 = vmul.f32 %v7044_v46, %v7837_v13 }
 0x1f2   : > { %v1997_v48 = vpack.c.bf16 %v7937_v47, %v7937_v47 }
 0x1f3   : > { %v7046_v50 = vpop.eup %7045 }
 0x1f4   : > { %5953 = vmatprep.mubr.bf16.mxu1 %v1997_v48  ;;  %v7944_v55 = vmul.f32 %v7046_v50, %v7844_v16  ;;  %v7048_v58 = vpop.eup %7047 }
 0x1f5   : > { %5954 = vmatmul.mubr.bf16.vlgmr.msra.gmra.mxu1 %v1997_v48  ;;  %v1755_v61 = vmul.f32 %v7048_v58, %v1745_v45 }
 0x1f6   : > { %5974 = vmatpush3.bf16.xpose.msra.mxu1 %v6928_v49  ;;  %v1998_v15 = vpack.c.bf16 %v7944_v55, %v7944_v55  ;;  %v6950_v49 = vld [vmem:[%s7657_s13 + $0x190] sm:$0xff]  }
 0x1f7   : > { %5975 = vmatprep.subr.bf16.mxu1 %v6931_v53  ;;  %v1757_v4 = vsel %vm1756_vm6, %v1745_v45, %v1755_v61  ;;  %v7997_v45 = vadd.f32 %v1731_v39, %v7922_v19  ;;  %v8007_v61 = vld [vmem:[%s7657_s13 + $0x140] sm:$0xff]  }
 0x1f8   : > { %5971 = vmatprep.mubr.bf16.mxu0 %v1998_v15  ;;  %v1760_v22 = vsel %vm1758_vm7, %v1759_v8, %v1757_v4  ;;  %v6954_v4 = vld [vmem:[%s7657_s13 + $0x188] sm:$0xff]   ;;  %v1729_v8 = vrot.slane %v7892_v0, 1 }
 0x1f9   : > { %5972 = vmatmul.mubr.bf16.vlgmr.msra.gmra.mxu0 %v1998_v15  ;;  %v1817_v26 = vsel %vm1600_vm1, %v1760_v22, -inf  ;;  %vm1784_vm12 = vcmp.eq.f32.partialorder %v7997_v45, inf  ;;  %vm1786_vm13 = vcmp.eq.f32.partialorder %v7997_v45, 0.0 }
 0x1fa   : > { %5992 = vmatpush3.bf16.xpose.msra.mxu0 %v6930_v56  ;;  %v6953_v56 = vld [vmem:[%s7657_s13 + $0x1c8] sm:$0xff]  }
 0x1fb   : > { %5993 = vmatprep.subr.bf16.mxu0 %v6933_v57 }
 0x1fe   : > { %5976 = vmatpush3.bf16.xpose.msra.mxu1 %v6932_v59  ;;  %v8004_v59 = vld [vmem:[%s7657_s13 + $0x108] sm:$0xff]  }
 0x1ff   : > { %5977 = vmatprep.subr.bf16.mxu1 %v6935_v60 }
 0x200   : > { %v7954_v1 = vpop.f32.mrf.mxu0 }
 0x201   : > { %10178 = vst [vmem:[#allocation9_spill] sm:$0xff] %v7954_v1  ;;  %v7958_v2 = vmul.f32 %v7954_v1, %v7954_v1  ;;  %v7960_v3 = vpop.f32.mrf.mxu1 }
 0x202   : > { %10179 = vst [vmem:[#allocation10_spill] sm:$0xff] %v7960_v3  ;;  %v7964_v5 = vmul.f32 %v7960_v3, %v7960_v3  ;;  %5994 = vmatpush3.bf16.xpose.msra.mxu0 %v6934_v62  ;;  %v6723_v6 = vpop.f32.mrf.mxu0 }
 0x203   : > { %v1619_v9 = vsel %vm1600_vm1, %v7958_v2, 0.0  ;;  %5995 = vmatprep.subr.bf16.mxu0 %v6937_v63  ;;  %v6743_v11 = vpop.f32.mrf.mxu1  ;;  %v1728_v63 = vrot.slane %v7848_v18, 1  ;;  %v6957_v6 = vld [vmem:[%s7657_s13 + $0x1c0] sm:$0xff]  }
 0x204   : > { %v1622_v12 = vsel %vm1600_vm1, %v7964_v5, 0.0  ;;  %1620 = vadd.xlane.f32.xlu0 %v1619_v9  ;;  %v1412_v14 = vpop.f32.mrf.mxu0  ;;  %v6956_v9 = vld [vmem:[%s7657_s13 + $0x100] sm:$0xff]   ;;  %v8021_v11 = vadd.f32 %v1729_v8, %v7892_v0 }
 0x205   : > { %1623 = vadd.xlane.f32.xlu1 %v1622_v12  ;;  %v1500_v23 = vpop.f32.mrf.mxu1  ;;  %v6958_v14 = vld [vmem:[%s7657_s13 + $0x180] sm:$0xff]  }
 0x206   : > { %v6724_v24 = vpop.f32.mrf.mxu0  ;;  %5978 = vmatpush3.bf16.xpose.msra.mxu1 %v6936_v7  ;;  %v8015_v7 = vadd.f32 %v1728_v63, %v7848_v18  ;;  %v6961_v18 = vld [vmem:[%s7657_s13 + $0x2f8] sm:$0xff]   ;;  %vm1770_vm0 = vcmp.eq.f32.partialorder %v8021_v11, inf  ;;  %vm1772_vm2 = vcmp.eq.f32.partialorder %v8021_v11, 0.0  ;;  %v8081_v8 = vld [vmem:[%s7657_s13 + $0x220] sm:$0xff]  }
 0x207   : > { %5979 = vmatprep.subr.bf16.mxu1 %v6939_v10  ;;  %v6744_v28 = vpop.f32.mrf.mxu1  ;;  %v6959_v10 = vld [vmem:[%s7657_s13 + $0x278] sm:$0xff]  }
 0x208   : > { %1818 = vmax.xlane.f32.xlu0 %v1817_v26  ;;  %v6960_v24 = vld [vmem:[%s7657_s13 + $0x238] sm:$0xff]   ;;  %vm1763_vm14 = vcmp.eq.f32.partialorder %v8015_v7, inf  ;;  %vm1765_vm15 = vcmp.eq.f32.partialorder %v8015_v7, 0.0 }
 0x20a   : > { %5996 = vmatpush3.bf16.xpose.msra.mxu0 %v6938_v25 }
 0x20b   : > { %5997 = vmatprep.subr.bf16.mxu0 %v6941_v27  ;;  %v6963_v27 = vld [vmem:[%s7657_s13 + $0x270] sm:$0xff]  }
 0x20d   : > { %v1609_v31 = vpop.xlane.xlu1 %1608 }
 0x20e   : > { %7049 = vrsqrt.f32 %v1609_v31  ;;  %5980 = vmatpush3.bf16.xpose.msra.mxu1 %v6940_v29  ;;  %vm1644_vm8 = vcmp.eq.f32.partialorder %v1609_v31, inf  ;;  %v1647_v46 = vand.u32 2147483648, %v1609_v31  ;;  %vm1646_vm9 = vcmp.eq.f32.partialorder %v1609_v31, 0.0 }
 0x20f   : > { %5981 = vmatprep.subr.bf16.mxu1 %v6943_v30  ;;  %v6962_v30 = vld [vmem:[%s7657_s13 + $0x2b8] sm:$0xff]  }
 0x211   : > { %v1612_v34 = vpop.xlane.xlu1 %1611 }
 0x212   : > { %5998 = vmatpush3.bf16.xpose.msra.mxu0 %v6942_v32  ;;  %7051 = vrsqrt.f32 %v1612_v34  ;;  %vm1651_vm10 = vcmp.eq.f32.partialorder %v1612_v34, inf  ;;  %v1654_v15 = vand.u32 2147483648, %v1612_v34  ;;  %vm1653_vm11 = vcmp.eq.f32.partialorder %v1612_v34, 0.0 }
 0x213   : > { %5999 = vmatprep.subr.bf16.mxu0 %v6945_v33  ;;  %7053 = vrsqrt.f32 %v7997_v45  ;;  %v1787_v32 = vand.u32 2147483648, %v7997_v45  ;;  %v6965_v33 = vld [vmem:[%s7657_s13 + $0x2f0] sm:$0xff]  }
 0x216   : > { %5982 = vmatpush3.bf16.xpose.msra.mxu1 %v6944_v35 }
 0x217   : > { %5983 = vmatprep.subr.bf16.mxu1 %v6947_v36  ;;  %v6964_v36 = vld [vmem:[%s7657_s13 + $0x230] sm:$0xff]  }
 0x21a   : > { %6000 = vmatpush3.bf16.xpose.msra.mxu0 %v6946_v37  ;;  %v6967_v37 = vld [vmem:[%s7657_s13 + $0x268] sm:$0xff]  }
 0x21b   : > { %v7050_v41 = vpop.eup %7049  ;;  %6001 = vmatprep.subr.bf16.mxu0 %v6949_v38 }
 0x21c   : > { %v1643_v44 = vmul.f32 %v7050_v41, %v1609_v31  ;;  %v6966_v41 = vld [vmem:[%s7657_s13 + $0x2b0] sm:$0xff]  }
 0x21e   : > { %v1645_v48 = vsel %vm1644_vm8, %v1609_v31, %v1643_v44  ;;  %5984 = vmatpush3.bf16.xpose.msra.mxu1 %v6948_v40  ;;  %1864 = vperm.xlu0 %6821, %v7993_v42  }
 0x21f   : > { %v7052_v50 = vpop.eup %7051  ;;  %v1648_v53 = vsel %vm1646_vm9, %v1647_v46, %v1645_v48  ;;  %5985 = vmatprep.subr.bf16.mxu1 %v6951_v43  ;;  %v6969_v43 = vld [vmem:[%s7657_s13 + $0x2e8] sm:$0xff]  }
 0x220   : > { %v1693_v57 = vadd.f32 1e-20, %v1648_v53  ;;  %v1650_v19 = vmul.f32 %v7052_v50, %v1612_v34  ;;  %v7054_v12 = vpop.eup %7053  ;;  %v8064_v50 = vld [vmem:[%s7657_s13 + $0x228] sm:$0xff]  }
 0x221   : > { %v1783_v25 = vmul.f32 %v7054_v12, %v7997_v45 }
 0x222   : > { %7055 = vrcp.f32 %v1693_v57  ;;  %v1652_v58 = vsel %vm1651_vm10, %v1612_v34, %v1650_v19  ;;  %6002 = vmatpush3.bf16.xpose.msra.mxu0 %v6950_v49 }
 0x223   : > { %v1655_v60 = vsel %vm1653_vm11, %v1654_v15, %v1652_v58  ;;  %6003 = vmatprep.subr.bf16.mxu0 %v6953_v56  ;;  %v1785_v31 = vsel %vm1784_vm12, %v7997_v45, %v1783_v25  ;;  %v1766_v45 = vand.u32 2147483648, %v8015_v7  ;;  %v8069_v56 = vld [vmem:[%s7657_s13 + $0x260] sm:$0xff]   ;;  %v6981_v25 = vld [vmem:[%s7657_s13 + $0x2d0] sm:$0xff]  }
 0x224   : > { %v1694_v62 = vadd.f32 1e-20, %v1655_v60  ;;  %v1788_v34 = vsel %vm1786_vm13, %v1787_v32, %v1785_v31  ;;  %v6970_v60 = vld [vmem:[%s7657_s13 + $0x2a8] sm:$0xff]  }
 0x225   : > { %v1829_v38 = vsel %vm1600_vm1, %v1788_v34, -inf }
 0x226   : > { %7057 = vrcp.f32 %v1694_v62  ;;  %5986 = vmatpush3.bf16.xpose.msra.mxu1 %v8004_v59  ;;  %v1773_v62 = vand.u32 2147483648, %v8021_v11 }
 0x227   : > { %5987 = vmatprep.subr.bf16.mxu1 %v8007_v61  ;;  %7059 = vrsqrt.f32 %v8015_v7 }
 0x228   : > { %7061 = vrsqrt.f32 %v8021_v11 }
 0x22a   : > { %6004 = vmatpush3.bf16.xpose.msra.mxu0 %v6954_v4 }
 0x22b   : > { %6005 = vmatprep.subr.bf16.mxu0 %v6957_v6  ;;  %v6973_v6 = vld [vmem:[%s7657_s13 + $0x2e0] sm:$0xff]  }
 0x22e   : > { %5988 = vmatpush3.bf16.xpose.msra.mxu1 %v6956_v9 }
 0x22f   : > { %v7056_v22 = vpop.eup %7055  ;;  %6009 = vmatprep.subr.bf16.mxu1 %v6959_v10  ;;  %v8085_v10 = vld [vmem:[%s7657_s13 + $0x258] sm:$0xff]  }
 0x230   : > { %v8027_v23 = vmul.f32 %v7056_v22, %v7888_v51  ;;  %v6977_v22 = vld [vmem:[%s7657_s13 + $0x2d8] sm:$0xff]  }
 0x232   : > { %6006 = vmatpush3.bf16.xpose.msra.mxu0 %v6958_v14  ;;  %v1999_v0 = vpack.c.bf16 %v8027_v23, %v8027_v23  ;;  %v6974_v14 = vld [vmem:[%s7657_s13 + $0x2a0] sm:$0xff]  }
 0x233   : > { %v7058_v26 = vpop.eup %7057  ;;  %6027 = vmatprep.subr.bf16.mxu0 %v6961_v18  ;;  %v8092_v18 = vld [vmem:[%s7657_s13 + $0x218] sm:$0xff]  }
 0x234   : > { %5989 = vmatprep.mubr.bf16.mxu1 %v1999_v0  ;;  %v8036_v28 = vmul.f32 %v7058_v26, %v7894_v52  ;;  %v7060_v35 = vpop.eup %7059  ;;  %v8102_v26 = vld [vmem:[%s7657_s13 + $0x210] sm:$0xff]  }
 0x235   : > { %5990 = vmatmul.mubr.bf16.vlgmr.msra.gmra.mxu1 %v1999_v0  ;;  %v1762_v39 = vmul.f32 %v7060_v35, %v8015_v7  ;;  %v7062_v40 = vpop.eup %7061  ;;  %v8095_v0 = vld [vmem:[%s7657_s13 + $0x250] sm:$0xff]  }
 0x236   : > { %6010 = vmatpush3.bf16.xpose.msra.mxu1 %v6960_v24  ;;  %v2000_v29 = vpack.c.bf16 %v8036_v28, %v8036_v28  ;;  %v1769_v49 = vmul.f32 %v7062_v40, %v8021_v11  ;;  %v6978_v24 = vld [vmem:[%s7657_s13 + $0x298] sm:$0xff]  }
 0x237   : > { %6011 = vmatprep.subr.bf16.mxu1 %v6963_v27  ;;  %v1764_v48 = vsel %vm1763_vm14, %v8015_v7, %v1762_v39  ;;  %v6985_v39 = vld [vmem:[%s7657_s13 + $0x2c8] sm:$0xff]  }
 0x238   : > { %6007 = vmatprep.mubr.bf16.mxu0 %v2000_v29  ;;  %v1767_v57 = vsel %vm1765_vm15, %v1766_v45, %v1764_v48  ;;  %v1771_v58 = vsel %vm1770_vm0, %v8021_v11, %v1769_v49  ;;  %v8112_v45 = vld [vmem:[%s7657_s13 + $0x208] sm:$0xff]   ;;  %v8115_v48 = vld [vmem:[%s7657_s13 + $0x240] sm:$0xff]  }
 0x239   : > { %6008 = vmatmul.mubr.bf16.vlgmr.msra.gmra.mxu0 %v2000_v29  ;;  %v1820_v4 = vsel %vm1600_vm1, %v1767_v57, -inf  ;;  %v1774_v7 = vsel %vm1772_vm2, %v1773_v62, %v1771_v58  ;;  %v8105_v29 = vld [vmem:[%s7657_s13 + $0x248] sm:$0xff]   ;;  %v8125_v57 = vld [vmem:[%s7657_s13 + $0x378] sm:$0xff]  }
 0x23a   : > { %6028 = vmatpush3.bf16.xpose.msra.mxu0 %v6962_v30  ;;  %v1823_v9 = vsel %vm1600_vm1, %v1774_v7, -inf  ;;  %v6986_v49 = vld [vmem:[%s7657_s13 + $0x288] sm:$0xff]   ;;  %v8140_v7 = vld [vmem:[%s7657_s13 + $0x338] sm:$0xff]  }
 0x23b   : > { %6029 = vmatprep.subr.bf16.mxu0 %v6965_v33 }
 0x23d   : > { %1830 = vmax.xlane.f32.xlu0 %v1829_v38 }
 0x23e   : > { %6012 = vmatpush3.bf16.xpose.msra.mxu1 %v6964_v36  ;;  %v6982_v36 = vld [vmem:[%s7657_s13 + $0x290] sm:$0xff]  }
 0x23f   : > { %6013 = vmatprep.subr.bf16.mxu1 %v6967_v37 }
 0x240   : > { %v8053_v44 = vpop.f32.mrf.mxu0 }
 0x241   : > { %10180 = vst [vmem:[#allocation11_spill] sm:$0xff] %v8053_v44  ;;  %v8058_v46 = vmul.f32 %v8053_v44, %v8053_v44 }
 0x242   : > { %6030 = vmatpush3.bf16.xpose.msra.mxu0 %v6966_v41  ;;  %v6763_v53 = vpop.f32.mrf.mxu0 }
 0x243   : > { %v1625_v15 = vsel %vm1600_vm1, %v8058_v46, 0.0  ;;  %6031 = vmatprep.subr.bf16.mxu0 %v6969_v43  ;;  %v6989_v53 = vld [vmem:[%s7657_s13 + $0x2c0] sm:$0xff]  }
 0x244   : > { %1626 = vadd.xlane.f32.xlu1 %v1625_v15  ;;  %v1588_v19 = vpop.f32.mrf.mxu0  ;;  %v8122_v15 = vld [vmem:[%s7657_s13 + $0x200] sm:$0xff]  }
 0x245   : > { %v6990_v19 = vld [vmem:[%s7657_s13 + $0x280] sm:$0xff]  }
 0x246   : > { %6014 = vmatpush3.bf16.xpose.msra.mxu1 %v8064_v50  ;;  %v6764_v63 = vpop.f32.mrf.mxu0 }
 0x247   : > { %6015 = vmatprep.subr.bf16.mxu1 %v8069_v56 }
 0x248   : > { %1821 = vmax.xlane.f32.xlu1 %v1820_v4 }
 0x24a   : > { %6032 = vmatpush3.bf16.xpose.msra.mxu0 %v6970_v60  ;;  %v6993_v60 = vld [vmem:[%s7657_s13 + $0x3f8] sm:$0xff]  }
 0x24b   : > { %6033 = vmatprep.subr.bf16.mxu0 %v6973_v6 }
 0x24c   : > { %1824 = vmax.xlane.f32.xlu1 %v1823_v9 }
 0x24d   : > { %v1615_v11 = vpop.xlane.xlu0 %1614 }
 0x24e   : > { %v1618_v12 = vpop.xlane.xlu1 %1617  ;;  %7063 = vrsqrt.f32 %v1615_v11  ;;  %6016 = vmatpush3.bf16.xpose.msra.mxu1 %v8081_v8  ;;  %vm1658_vm5 = vcmp.eq.f32.partialorder %v1615_v11, inf  ;;  %v1661_v34 = vand.u32 2147483648, %v1615_v11  ;;  %vm1660_vm6 = vcmp.eq.f32.partialorder %v1615_v11, 0.0 }
 0x24f   : > { %7065 = vrsqrt.f32 %v1618_v12  ;;  %6017 = vmatprep.subr.bf16.mxu1 %v8085_v10  ;;  %vm1665_vm3 = vcmp.eq.f32.partialorder %v1618_v12, inf  ;;  %v1668_v31 = vand.u32 2147483648, %v1618_v12  ;;  %vm1667_vm4 = vcmp.eq.f32.partialorder %v1618_v12, 0.0 }
 0x252   : > { %6034 = vmatpush3.bf16.xpose.msra.mxu0 %v6974_v14  ;;  %v6997_v14 = vld [vmem:[%s7657_s13 + $0x3f0] sm:$0xff]  }
 0x253   : > { %6035 = vmatprep.subr.bf16.mxu0 %v6977_v22  ;;  %v8152_v22 = vld [vmem:[%s7657_s13 + $0x330] sm:$0xff]  }
 0x256   : > { %6018 = vmatpush3.bf16.xpose.msra.mxu1 %v8092_v18 }
 0x257   : > { %6019 = vmatprep.subr.bf16.mxu1 %v8095_v0 }
 0x25a   : > { %6036 = vmatpush3.bf16.xpose.msra.mxu0 %v6978_v24  ;;  %v8155_v24 = vld [vmem:[%s7657_s13 + $0x368] sm:$0xff]  }
 0x25b   : > { %v7064_v27 = vpop.eup %7063  ;;  %6037 = vmatprep.subr.bf16.mxu0 %v6981_v25  ;;  %v6998_v25 = vld [vmem:[%s7657_s13 + $0x3b0] sm:$0xff]  }
 0x25c   : > { %v7066_v30 = vpop.eup %7065  ;;  %v1657_v32 = vmul.f32 %v7064_v27, %v1615_v11  ;;  %v7001_v27 = vld [vmem:[%s7657_s13 + $0x3e8] sm:$0xff]  }
 0x25d   : > { %v1664_v33 = vmul.f32 %v7066_v30, %v1618_v12  ;;  %v8162_v30 = vld [vmem:[%s7657_s13 + $0x328] sm:$0xff]  }
 0x25e   : > { %v1659_v35 = vsel %vm1658_vm5, %v1615_v11, %v1657_v32  ;;  %6020 = vmatpush3.bf16.xpose.msra.mxu1 %v8102_v26  ;;  %v8145_v11 = vld [vmem:[%s7657_s13 + $0x370] sm:$0xff]   ;;  %v7002_v32 = vld [vmem:[%s7657_s13 + $0x3a8] sm:$0xff]  }
 0x25f   : > { %v1666_v37 = vsel %vm1665_vm3, %v1618_v12, %v1664_v33  ;;  %v1662_v38 = vsel %vm1660_vm6, %v1661_v34, %v1659_v35  ;;  %6021 = vmatprep.subr.bf16.mxu1 %v8105_v29  ;;  %v6994_v12 = vld [vmem:[%s7657_s13 + $0x3b8] sm:$0xff]   ;;  %v7005_v33 = vld [vmem:[%s7657_s13 + $0x3e0] sm:$0xff]  }
 0x260   : > { %v1669_v40 = vsel %vm1667_vm4, %v1668_v31, %v1666_v37  ;;  %v1695_v41 = vadd.f32 1e-20, %v1662_v38  ;;  %v8165_v31 = vld [vmem:[%s7657_s13 + $0x360] sm:$0xff]   ;;  %v8175_v35 = vld [vmem:[%s7657_s13 + $0x358] sm:$0xff]  }
 0x261   : > { %v1696_v43 = vadd.f32 1e-20, %v1669_v40  ;;  %v8172_v34 = vld [vmem:[%s7657_s13 + $0x320] sm:$0xff]  }
 0x262   : > { %7067 = vrcp.f32 %v1695_v41  ;;  %6038 = vmatpush3.bf16.xpose.msra.mxu0 %v6982_v36  ;;  %v7006_v38 = vld [vmem:[%s7657_s13 + $0x3a0] sm:$0xff]  }
 0x263   : > { %7069 = vrcp.f32 %v1696_v43  ;;  %6039 = vmatprep.subr.bf16.mxu0 %v6985_v39  ;;  %v7009_v39 = vld [vmem:[%s7657_s13 + $0x3d8] sm:$0xff]  }
 0x264   : > { %v8182_v43 = vld [vmem:[%s7657_s13 + $0x318] sm:$0xff]  }
 0x266   : > { %6022 = vmatpush3.bf16.xpose.msra.mxu1 %v8112_v45 }
 0x267   : > { %6023 = vmatprep.subr.bf16.mxu1 %v8115_v48 }
 0x26a   : > { %6040 = vmatpush3.bf16.xpose.msra.mxu0 %v6986_v49  ;;  %v8185_v49 = vld [vmem:[%s7657_s13 + $0x350] sm:$0xff]  }
 0x26b   : > { %6041 = vmatprep.subr.bf16.mxu0 %v6989_v53 }
 0x26e   : > { %6024 = vmatpush3.bf16.xpose.msra.mxu1 %v8122_v15 }
 0x26f   : > { %v7068_v58 = vpop.eup %7067  ;;  %6045 = vmatprep.subr.bf16.mxu1 %v8125_v57 }
 0x270   : > { %v7070_v62 = vpop.eup %7069  ;;  %v8132_v63 = vmul.f32 %v7068_v58, %v7918_v17  ;;  %v8191_v58 = vld [vmem:[%s7988_s29 + $0x1] sm:$0x1] }
 0x271   : > { %v8135_v4 = vmul.f32 %v7070_v62, %v7924_v20  ;;  %v8197_v62 = vld [vmem:[%s7657_s13 + $0x310] sm:$0xff]  }
 0x272   : > { %6042 = vmatpush3.bf16.xpose.msra.mxu0 %v6990_v19  ;;  %v2001_v6 = vpack.c.bf16 %v8132_v63, %v8132_v63  ;;  %v7010_v19 = vld [vmem:[%s7657_s13 + $0x398] sm:$0xff]  }
 0x273   : > { %10181 = vst [vmem:[#allocation12_spill] sm:$0xff] %v8135_v4  ;;  %v2002_v9 = vpack.c.bf16 %v8135_v4, %v8135_v4  ;;  %6063 = vmatprep.subr.bf16.mxu0 %v6993_v60  ;;  %v7013_v60 = vld [vmem:[%s7657_s13 + $0x3d0] sm:$0xff]   ;;  %v7172_v4 = vld [vmem:[%s7657_s13 + $0x38] sm:$0xff]  }
 0x274   : > { %6025 = vmatprep.mubr.bf16.mxu1 %v2001_v6 }
 0x275   : > { %6043 = vmatprep.mubr.bf16.mxu0 %v2002_v9  ;;  %6026 = vmatmul.mubr.bf16.vlgmr.msra.gmra.mxu1 %v2001_v6 }
 0x276   : > { %6046 = vmatpush3.bf16.xpose.msra.mxu1 %v8140_v7 }
 0x277   : > { %6047 = vmatprep.subr.bf16.mxu1 %v8145_v11 }
 0x279   : > { %6044 = vmatmul.mubr.bf16.vlgmr.msra.gmra.mxu0 %v2002_v9  ;;  %v8200_v9 = vld [vmem:[%s7988_s29 + $0x2] sm:$0x1] }
 0x27a   : > { %6064 = vmatpush3.bf16.xpose.msra.mxu0 %v6994_v12 }
 0x27b   : > { %6065 = vmatprep.subr.bf16.mxu0 %v6997_v14 }
 0x27e   : > { %6048 = vmatpush3.bf16.xpose.msra.mxu1 %v8152_v22 }
 0x27f   : > { %6049 = vmatprep.subr.bf16.mxu1 %v8155_v24 }
 0x282   : > { %6066 = vmatpush3.bf16.xpose.msra.mxu0 %v6998_v25 }
 0x283   : > { %6067 = vmatprep.subr.bf16.mxu0 %v7001_v27 }
 0x286   : > { %6050 = vmatpush3.bf16.xpose.msra.mxu1 %v8162_v30 }
 0x287   : > { %6051 = vmatprep.subr.bf16.mxu1 %v8165_v31 }
 0x28a   : > { %6068 = vmatpush3.bf16.xpose.msra.mxu0 %v7002_v32 }
 0x28b   : > { %6069 = vmatprep.subr.bf16.mxu0 %v7005_v33 }
 0x28d   : > { %v1621_v36 = vpop.xlane.xlu0 %1620 }
 0x28e   : > { %v1624_v37 = vpop.xlane.xlu1 %1623  ;;  %7071 = vrsqrt.f32 %v1621_v36  ;;  %6052 = vmatpush3.bf16.xpose.msra.mxu1 %v8172_v34  ;;  %vm1672_vm9 = vcmp.eq.f32.partialorder %v1621_v36, inf  ;;  %v1675_v32 = vand.u32 2147483648, %v1621_v36  ;;  %vm1674_vm10 = vcmp.eq.f32.partialorder %v1621_v36, 0.0 }
 0x28f   : > { %7073 = vrsqrt.f32 %v1624_v37  ;;  %6053 = vmatprep.subr.bf16.mxu1 %v8175_v35  ;;  %vm1679_vm7 = vcmp.eq.f32.partialorder %v1624_v37, inf  ;;  %v1682_v14 = vand.u32 2147483648, %v1624_v37  ;;  %vm1681_vm8 = vcmp.eq.f32.partialorder %v1624_v37, 0.0 }
 0x291   : > { %v1819_v40 = vpop.xlane.xlu0 %1818 }
 0x292   : > { %6070 = vmatpush3.bf16.xpose.msra.mxu0 %v7006_v38  ;;  %v1844_v41 = vmul.f32 0.5, %v1819_v40  ;;  %v7014_v38 = vld [vmem:[%s7657_s13 + $0x390] sm:$0xff]  }
 0x293   : > { %6071 = vmatprep.subr.bf16.mxu0 %v7009_v39  ;;  %v1730_v39 = vrot.slane %v7898_v54, 1 }
 0x294   : > { %v1853_v53 = vmul.f32 %v1844_v41, %v7993_v42  ;;  %v8203_v42 = vld [vmem:[%s7657_s13 + $0x348] sm:$0xff]  }
 0x296   : > { %6054 = vmatpush3.bf16.xpose.msra.mxu1 %v8182_v43  ;;  %1945 = vperm.xlu1 %6822, %v1853_v53   ;;  %v7017_v53 = vld [vmem:[%s7657_s13 + $0x3c8] sm:$0xff]  }
 0x297   : > { %6055 = vmatprep.subr.bf16.mxu1 %v8185_v49 }
 0x29a   : > { %6072 = vmatpush3.bf16.xpose.msra.mxu0 %v7010_v19  ;;  %1873 = vperm.xlu1 %6822, %v8191_v58  }
 0x29b   : > { %v7072_v6 = vpop.eup %7071  ;;  %6073 = vmatprep.subr.bf16.mxu0 %v7013_v60 }
 0x29c   : > { %v7074_v12 = vpop.eup %7073  ;;  %v1671_v25 = vmul.f32 %v7072_v6, %v1621_v36 }
 0x29d   : > { %v1678_v27 = vmul.f32 %v7074_v12, %v1624_v37  ;;  %v1748_v12 = vadd.f32 %v1730_v39, %v7898_v54  ;;  %v7022_v54 = vld [vmem:[%s7657_s13 + $0x380] sm:$0xff]  }
 0x29e   : > { %v1673_v33 = vsel %vm1672_vm9, %v1621_v36, %v1671_v25  ;;  %6056 = vmatpush3.bf16.xpose.msra.mxu1 %v8197_v62  ;;  %1882 = vperm.xlu1 %6822, %v8200_v9   ;;  %v8212_v36 = vld [vmem:[%s7657_s13 + $0x308] sm:$0xff]  }
 0x29f   : > { %v1680_v40 = vsel %vm1679_vm7, %v1624_v37, %v1678_v27  ;;  %v1676_v41 = vsel %vm1674_vm10, %v1675_v32, %v1673_v33  ;;  %6057 = vmatprep.subr.bf16.mxu1 %v8203_v42  ;;  %v8216_v37 = vld [vmem:[%s7657_s13 + $0x340] sm:$0xff]   ;;  %v7018_v25 = vld [vmem:[%s7657_s13 + $0x388] sm:$0xff]   ;;  %v8226_v32 = vld [vmem:[%s7657_s13 + $0x478] sm:$0xff]   ;;  %vm1777_vm11 = vcmp.eq.f32.partialorder %v1748_v12, inf  ;;  %vm1779_vm12 = vcmp.eq.f32.partialorder %v1748_v12, 0.0 }
 0x2a0   : > { %v1683_v19 = vsel %vm1681_vm8, %v1682_v14, %v1680_v40  ;;  %v1697_v60 = vadd.f32 1e-20, %v1676_v41  ;;  %v7021_v14 = vld [vmem:[%s7657_s13 + $0x3c0] sm:$0xff]   ;;  %10182 = vst [vmem:[#allocation13_spill] sm:$0xff] %v8226_v32 }
 0x2a1   : > { %v1698_v6 = vadd.f32 1e-20, %v1683_v19  ;;  %v8223_v27 = vld [vmem:[%s7657_s13 + $0x300] sm:$0xff]  }
 0x2a2   : > { %7075 = vrcp.f32 %v1697_v60  ;;  %6074 = vmatpush3.bf16.xpose.msra.mxu0 %v7014_v38  ;;  %v7025_v60 = vld [vmem:[%s7657_s13 + $0x470] sm:$0xff]  }
 0x2a3   : > { %7077 = vrcp.f32 %v1698_v6  ;;  %6075 = vmatprep.subr.bf16.mxu0 %v7017_v53  ;;  %v7024_v53 = vld [vmem:[%s7657_s13 + $0x438] sm:$0xff]  }
 0x2a4   : > { %7079 = vrsqrt.f32 %v1748_v12  ;;  %v7171_v6 = vld [vmem:[%s7657_s13 + $0x78] sm:$0xff]  }
 0x2a6   : > { %6058 = vmatpush3.bf16.xpose.msra.mxu1 %v8212_v36 }
 0x2a7   : > { %6059 = vmatprep.subr.bf16.mxu1 %v8216_v37 }
 0x2aa   : > { %6076 = vmatpush3.bf16.xpose.msra.mxu0 %v7018_v25 }
 0x2ab   : > { %6077 = vmatprep.subr.bf16.mxu0 %v7021_v14 }
 0x2ae   : > { %6060 = vmatpush3.bf16.xpose.msra.mxu1 %v8223_v27 }
 0x2af   : > { %v7076_v33 = vpop.eup %7075  ;;  %6081 = vmatprep.subr.bf16.mxu1 %v8226_v32 }
 0x2b0   : > { %v7078_v38 = vpop.eup %7077  ;;  %v8232_v39 = vmul.f32 %v7076_v33, %v7954_v1 }
 0x2b1   : > { %v8235_v40 = vmul.f32 %v7078_v38, %v7960_v3  ;;  %v7080_v25 = vpop.eup %7079  ;;  %v1780_v3 = vand.u32 2147483648, %v1748_v12 }
 0x2b2   : > { %10183 = vst [vmem:[#allocation14_spill] sm:$0xff] %v8232_v39  ;;  %6078 = vmatpush3.bf16.xpose.msra.mxu0 %v7022_v54  ;;  %v2003_v41 = vpack.c.bf16 %v8232_v39, %v8232_v39  ;;  %v1776_v33 = vmul.f32 %v7080_v25, %v1748_v12  ;;  %v7173_v25 = vld [vmem:[%s7657_s13 + $0x70] sm:$0xff]  }
 0x2b3   : > { %10184 = vst [vmem:[#allocation15_spill] sm:$0xff] %v8235_v40  ;;  %v2004_v19 = vpack.c.bf16 %v8235_v40, %v8235_v40  ;;  %6099 = vmatprep.subr.bf16.mxu0 %v7171_v6  ;;  %v7026_v6 = vld [vmem:[%s7657_s13 + $0x430] sm:$0xff]  }
 0x2b4   : > { %6061 = vmatprep.mubr.bf16.mxu1 %v2003_v41 }
 0x2b5   : > { %6079 = vmatprep.mubr.bf16.mxu0 %v2004_v19  ;;  %v8244_v14 = vpop.f32.mrf.mxu1  ;;  %6062 = vmatmul.mubr.bf16.vlgmr.msra.gmra.mxu1 %v2003_v41 }
 0x2b6   : > { %6082 = vmatpush3.bf16.xpose.msra.mxu1 %v7024_v53  ;;  %v1778_v53 = vsel %vm1777_vm11, %v1748_v12, %v1776_v33  ;;  %v7174_v12 = vld [vmem:[%s7657_s13 + $0x30] sm:$0xff]   ;;  %v8265_v33 = vld [vmem:[%s7657_s13 + $0x460] sm:$0xff]  }
 0x2b7   : > { %v8246_v54 = vpop.f32.mrf.mxu1  ;;  %6083 = vmatprep.subr.bf16.mxu1 %v7025_v60  ;;  %v8255_v60 = vld [vmem:[%s7657_s13 + $0x468] sm:$0xff]   ;;  %10187 = vst [vmem:[#allocation18_spill] sm:$0xff] %v8265_v33 }
 0x2b8   : > { %10185 = vst [vmem:[#allocation16_spill] sm:$0xff] %v8255_v60 }
 0x2b9   : > { %6080 = vmatmul.mubr.bf16.vlgmr.msra.gmra.mxu0 %v2004_v19  ;;  %v2140_v38 = vpop.f32.mrf.mxu1  ;;  %v8248_v40 = vpop.f32.mrf.mxu0 }
 0x2ba   : > { %6100 = vmatpush3.bf16.xpose.msra.mxu0 %v7172_v4  ;;  %v1781_v38 = vsel %vm1779_vm12, %v1780_v3, %v1778_v53  ;;  %v8261_v4 = vld [vmem:[%s7657_s13 + $0x428] sm:$0xff]   ;;  %v7030_v3 = vld [vmem:[%s7657_s13 + $0x420] sm:$0xff]   ;;  %vm3456_vm12 = vcmask 1041409  }
 0x2bb   : > { %v2141_v20 = vpop.f32.mrf.mxu1  ;;  %v8252_v41 = vpop.f32.mrf.mxu0  ;;  %6101 = vmatprep.subr.bf16.mxu0 %v7173_v25  ;;  %10186 = vst [vmem:[#allocation17_spill] sm:$0xff] %v8261_v4  ;;  %v7175_v25 = vld [vmem:[%s7657_s13 + $0x68] sm:$0xff]   ;;  %v7177_v53 = vld [vmem:[%s7657_s13 + $0x60] sm:$0xff]  }
 0x2bc   : > { %v1826_v20 = vsel %vm1600_vm1, %v1781_v38, -inf }
 0x2bd   : > { %v2277_v19 = vpop.f32.mrf.mxu0 }
 0x2be   : > { %6084 = vmatpush3.bf16.xpose.msra.mxu1 %v7026_v6  ;;  %v7031_v6 = vld [vmem:[%s7657_s13 + $0x458] sm:$0xff]  }
 0x2bf   : > { %v2278_v39 = vpop.f32.mrf.mxu0  ;;  %6085 = vmatprep.subr.bf16.mxu1 %v8255_v60  ;;  %v1867_v60 = vlaneseq }
 0x2c0   : > { %v7176_v39 = vld [vmem:[%s7657_s13 + $0x28] sm:$0xff]  }
 0x2c2   : > { %1827 = vmax.xlane.f32.xlu1 %v1826_v20  ;;  %6102 = vmatpush3.bf16.xpose.msra.mxu0 %v7174_v12  ;;  %v7032_v12 = vld [vmem:[%s7657_s13 + $0x418] sm:$0xff]  }
 0x2c3   : > { %6103 = vmatprep.subr.bf16.mxu0 %v7175_v25  ;;  %v7178_v25 = vld [vmem:[%s7657_s13 + $0x20] sm:$0xff]  }
 0x2c6   : > { %6086 = vmatpush3.bf16.xpose.msra.mxu1 %v8261_v4  ;;  %v7033_v4 = vld [vmem:[%s7657_s13 + $0x450] sm:$0xff]  }
 0x2c7   : > { %6087 = vmatprep.subr.bf16.mxu1 %v8265_v33  ;;  %v7179_v33 = vld [vmem:[%s7657_s13 + $0x58] sm:$0xff]  }
 0x2ca   : > { %6104 = vmatpush3.bf16.xpose.msra.mxu0 %v7176_v39 }
 0x2cb   : > { %6105 = vmatprep.subr.bf16.mxu0 %v7177_v53  ;;  %v1733_v53 = vrot.slane %v7958_v2, 1 }
 0x2cd   : > { %v1627_v19 = vpop.xlane.xlu1 %1626 }
 0x2ce   : > { %7081 = vrsqrt.f32 %v1627_v19  ;;  %6088 = vmatpush3.bf16.xpose.msra.mxu1 %v7030_v3  ;;  %vm1686_vm13 = vcmp.eq.f32.partialorder %v1627_v19, inf  ;;  %vm1688_vm14 = vcmp.eq.f32.partialorder %v1627_v19, 0.0 }
 0x2cf   : > { %6089 = vmatprep.subr.bf16.mxu1 %v7031_v6  ;;  %v8281_v6 = vld [vmem:[%s7988_s29 + $0x3] sm:$0x1] }
 0x2d1   : > { %v1822_v38 = vpop.xlane.xlu1 %1821 }
 0x2d2   : > { %v1845_v20 = vmul.f32 0.5, %v1822_v38  ;;  %6106 = vmatpush3.bf16.xpose.msra.mxu0 %v7178_v25  ;;  %v1868_v38 = vshrl.u32 %v1867_v60, 7  ;;  %v8295_v60 = vld [vmem:[%s7988_s29 + $0x4] sm:$0x1] }
 0x2d3   : > { %6107 = vmatprep.subr.bf16.mxu0 %v7179_v33  ;;  %v8285_v33 = vadd.f32 %v1733_v53, %v7958_v2  ;;  %v1865_v2 = vpop.permute.xlu0 %1864 }
 0x2d4   : > { %v1854_v39 = vmul.f32 %v1845_v20, %v8191_v58  ;;  %v7034_v58 = vld [vmem:[%s7657_s13 + $0x410] sm:$0xff]   ;;  %v8291_v32 = vsub.s32 0, %v1868_v38 }
 0x2d5   : > { %v1825_v1 = vpop.xlane.xlu1 %1824  ;;  %7083 = vrsqrt.f32 %v8285_v33  ;;  %vm1798_vm15 = vcmp.eq.f32.partialorder %v8285_v33, inf  ;;  %vm1800_vm0 = vcmp.eq.f32.partialorder %v8285_v33, 0.0 }
 0x2d6   : > { %v1846_v3 = vmul.f32 0.5, %v1825_v1  ;;  %6090 = vmatpush3.bf16.xpose.msra.mxu1 %v7032_v12  ;;  %1950 = vperm.xlu1 %6822, %v1854_v39   ;;  %v1689_v1 = vand.u32 2147483648, %v1627_v19  ;;  %v7035_v12 = vld [vmem:[%s7657_s13 + $0x448] sm:$0xff]   ;;  %v7180_v39 = vld [vmem:[%s7657_s13 + $0x18] sm:$0xff]  }
 0x2d7   : > { %6091 = vmatprep.subr.bf16.mxu1 %v7033_v4 }
 0x2d8   : > { %v1855_v25 = vmul.f32 %v1846_v3, %v8200_v9  ;;  %v7181_v9 = vld [vmem:[%s7657_s13 + $0x50] sm:$0xff]   ;;  %v1732_v3 = vrot.slane %v7928_v21, 1 }
 0x2da   : > { %1891 = vperm.xlu1 %6822, %v8281_v6   ;;  %1955 = vperm.xlu0 %6821, %v1855_v25   ;;  %v8301_v25 = vrot.slane %v1865_v2, %v8291_v32 }
 0x2db   : > { %v7082_v20 = vpop.eup %7081  ;;  %6108 = vmatpush3.bf16.xpose.msra.mxu0 %v7180_v39 }
 0x2dc   : > { %v1685_v4 = vmul.f32 %v7082_v20, %v1627_v19  ;;  %6109 = vmatprep.subr.bf16.mxu0 %v7181_v9  ;;  %10188 = vst [vmem:[#allocation19_spill] sm:$0xff] %v8301_v25  ;;  %v3266_v39 = vmul.f32 %v8246_v54, %v8301_v25  ;;  %v7182_v9 = vld [vmem:[%s7657_s13 + $0x10] sm:$0xff]   ;;  %v8315_v54 = vmul.f32 %v8301_v25, %v7837_v13 }
 0x2de   : > { %v1687_v53 = vsel %vm1686_vm13, %v1627_v19, %v1685_v4  ;;  %6092 = vmatpush3.bf16.xpose.msra.mxu1 %v7034_v58  ;;  %1900 = vperm.xlu1 %6822, %v8295_v60   ;;  %v7036_v19 = vld [vmem:[%s7657_s13 + $0x408] sm:$0xff]   ;;  %v8307_v58 = vadd.f32 %v1732_v3, %v7928_v21  ;;  %v7037_v4 = vld [vmem:[%s7657_s13 + $0x440] sm:$0xff]   ;;  %10189 = vst [vmem:[#allocation20_spill] sm:$0xff] %v8315_v54  ;;  %vm3459_vm13 = vcmask 1042434  }
 0x2df   : > { %v1690_v38 = vsel %vm1688_vm14, %v1689_v1, %v1687_v53  ;;  %6093 = vmatprep.subr.bf16.mxu1 %v7035_v12  ;;  %v7183_v1 = vld [vmem:[%s7657_s13 + $0x48] sm:$0xff]   ;;  %v3284_v12 = vrot.slane %v3266_v39, 7  ;;  %v7038_v21 = vld [vmem:[%s7657_s13 + $0x400] sm:$0xff]   ;;  %v3239_v39 = vadd.f32 %v8315_v54, %v7937_v47 }
 0x2e0   : > { %v1699_v20 = vadd.f32 1e-20, %v1690_v38  ;;  %v7184_v3 = vld [vmem:[%s7657_s13 + $0x8] sm:$0xff]   ;;  %v3248_v38 = vmul.f32 %v8244_v14, %v8301_v25  ;;  %vm1791_vm2 = vcmp.eq.f32.partialorder %v8307_v58, inf  ;;  %vm1793_vm3 = vcmp.eq.f32.partialorder %v8307_v58, 0.0 }
 0x2e1   : > { %v3302_v2 = vsub.f32 %v8315_v54, %v3284_v12 }
 0x2e2   : > { %7085 = vrcp.f32 %v1699_v20  ;;  %v7084_v53 = vpop.eup %7083  ;;  %v7185_v20 = vld [vmem:[%s7657_s13 + $0x40] sm:$0xff]  }
 0x2e3   : > { %6110 = vmatpush3.bf16.xpose.msra.mxu0 %v7182_v9  ;;  %7087 = vrsqrt.f32 %v8307_v58  ;;  %v1797_v13 = vmul.f32 %v7084_v53, %v8285_v33  ;;  %v7186_v9 = vld [vmem:[%s7657_s13 + $0xf8] sm:$0xff]  }
 0x2e4   : > { %6111 = vmatprep.subr.bf16.mxu0 %v7183_v1  ;;  %v3257_v1 = vsub.f32 %v3239_v39, %v3248_v38  ;;  %v7188_v38 = vld [vmem:[%s7657_s13 + $0x178] sm:$0xff]  }
 0x2e5   : > { %v1799_v47 = vsel %vm1798_vm15, %v8285_v33, %v1797_v13 }
 0x2e6   : > { %6094 = vmatpush3.bf16.xpose.msra.mxu1 %v7036_v19  ;;  %v3320_v19 = vmul.f32 %v3302_v2, %v3302_v2  ;;  %v1801_v2 = vand.u32 2147483648, %v8285_v33 }
 0x2e7   : > { %6095 = vmatprep.subr.bf16.mxu1 %v7037_v4 }
 0x2e8   : > { %v3338_v14 = vrot.slane %v3320_v19, 1  ;;  %v1802_v19 = vsel %vm1800_vm0, %v1801_v2, %v1799_v47 }
 0x2eb   : > { %6112 = vmatpush3.bf16.xpose.msra.mxu0 %v7184_v3 }
 0x2ec   : > { %6113 = vmatprep.subr.bf16.mxu0 %v7185_v20  ;;  %v3311_v20 = vmul.f32 %v3257_v1, %v3257_v1  ;;  %v1835_v1 = vsel %vm1600_vm1, %v1802_v19, -inf  ;;  %v7191_v19 = vld [vmem:[%s7657_s13 + $0xb0] sm:$0xff]  }
 0x2ee   : > { %6096 = vmatpush3.bf16.xpose.msra.mxu1 %v7038_v21  ;;  %v7187_v21 = vld [vmem:[%s7657_s13] sm:$0xff]  }
 0x2ef   : > { %v7086_v4 = vpop.eup %7085  ;;  %6117 = vmatprep.subr.bf16.mxu1 %v7186_v9  ;;  %v7189_v9 = vld [vmem:[%s7657_s13 + $0xb8] sm:$0xff]  }
 0x2f0   : > { %v8328_v12 = vmul.f32 %v7086_v4, %v8053_v44  ;;  %v7088_v53 = vpop.eup %7087  ;;  %v3356_v4 = vadd.f32 %v3338_v14, %v3311_v20  ;;  %v1794_v14 = vand.u32 2147483648, %v8307_v58  ;;  %v7194_v44 = vld [vmem:[%s7657_s13 + $0xe0] sm:$0xff]  }
 0x2f2   : > { %10190 = vst [vmem:[#allocation21_spill] sm:$0xff] %v8328_v12  ;;  %v2005_v3 = vpack.c.bf16 %v8328_v12, %v8328_v12  ;;  %v1790_v12 = vmul.f32 %v7088_v53, %v8307_v58  ;;  %7089 = vrsqrt.f32 %v3356_v4  ;;  %vm3367_vm4 = vcmp.eq.f32.partialorder %v3356_v4, inf }
 0x2f3   : > { %6114 = vmatpush3.bf16.xpose.msra.mxu0 %v7187_v21  ;;  %v7190_v21 = vld [vmem:[%s7657_s13 + $0xf0] sm:$0xff]   ;;  %vm3369_vm5 = vcmp.eq.f32.partialorder %v3356_v4, 0.0 }
 0x2f4   : > { %6097 = vmatprep.mubr.bf16.mxu1 %v2005_v3  ;;  %6135 = vmatprep.subr.bf16.mxu0 %v7188_v38  ;;  %v1792_v2 = vsel %vm1791_vm2, %v8307_v58, %v1790_v12  ;;  %v1831_v12 = vpop.xlane.xlu0 %1830 }
 0x2f5   : > { %v8338_v39 = vpop.f32.mrf.mxu1  ;;  %6098 = vmatmul.mubr.bf16.vlgmr.msra.gmra.mxu1 %v2005_v3  ;;  %v1795_v20 = vsel %vm1793_vm3, %v1794_v14, %v1792_v2  ;;  %v1848_v58 = vmul.f32 0.5, %v1831_v12  ;;  %v7195_v2 = vld [vmem:[%s7657_s13 + $0xa0] sm:$0xff]   ;;  %v7197_v12 = vld [vmem:[%s7657_s13 + $0x98] sm:$0xff]  }
 0x2f6   : > { %6118 = vmatpush3.bf16.xpose.msra.mxu1 %v7189_v9 }
 0x2f7   : > { %v8341_v13 = vpop.f32.mrf.mxu1  ;;  %6119 = vmatprep.subr.bf16.mxu1 %v7190_v21  ;;  %v7192_v21 = vld [vmem:[%s7657_s13 + $0xe8] sm:$0xff]  }
 0x2f9   : > { %v2414_v33 = vpop.f32.mrf.mxu1  ;;  %1836 = vmax.xlane.f32.xlu0 %v1835_v1  ;;  %v8347_v38 = vpop.f32.mrf.mxu0  ;;  %v1832_v1 = vsel %vm1600_vm1, %v1795_v20, -inf  ;;  %v1857_v20 = vmul.f32 %v1848_v58, %v8295_v60  ;;  %v7198_v60 = vld [vmem:[%s7657_s13 + $0xd0] sm:$0xff]  }
 0x2fa   : > { %v7193_v33 = vld [vmem:[%s7657_s13 + $0xa8] sm:$0xff]  }
 0x2fb   : > { %v2415_v3 = vpop.f32.mrf.mxu1  ;;  %v8350_v47 = vpop.f32.mrf.mxu0 }
 0x2fd   : > { %v2551_v53 = vpop.f32.mrf.mxu0 }
 0x2fe   : > { %6120 = vmatpush3.bf16.xpose.msra.mxu1 %v7191_v19  ;;  %v3370_v53 = vand.u32 2147483648, %v3356_v4  ;;  %v7196_v19 = vld [vmem:[%s7657_s13 + $0xd8] sm:$0xff]  }
 0x2ff   : > { %v2552_v9 = vpop.f32.mrf.mxu0  ;;  %6121 = vmatprep.subr.bf16.mxu1 %v7192_v21  ;;  %v7090_v3 = vpop.eup %7089 }
 0x300   : > { %v3366_v54 = vmul.f32 %v7090_v3, %v3356_v4 }
 0x302   : > { %1833 = vmax.xlane.f32.xlu1 %v1832_v1  ;;  %v3368_v14 = vsel %vm3367_vm4, %v3356_v4, %v3366_v54  ;;  %v8368_v54 = vld [vmem:[%s7988_s29 + $0x5] sm:$0x1]  ;;  %v1734_v4 = vrot.slane %v7964_v5, 1 }
 0x303   : > { %v3371_v9 = vsel %vm3369_vm5, %v3370_v53, %v3368_v14  ;;  %v7200_v53 = vld [vmem:[%s7657_s13 + $0x170] sm:$0xff]   ;;  %vm3462_vm5 = vcmask 1043459  }
 0x306   : > { %6122 = vmatpush3.bf16.xpose.msra.mxu1 %v7193_v33 }
 0x307   : > { %6123 = vmatprep.subr.bf16.mxu1 %v7194_v44 }
 0x30e   : > { %6124 = vmatpush3.bf16.xpose.msra.mxu1 %v7195_v2  ;;  %v7199_v2 = vld [vmem:[%s7657_s13 + $0x138] sm:$0xff]  }
 0x30f   : > { %6125 = vmatprep.subr.bf16.mxu1 %v7196_v19  ;;  %v1752_v19 = vadd.f32 %v1734_v4, %v7964_v5 }
 0x311   : > { %v8362_v21 = vpop.permute.xlu1 %1945  ;;  %7091 = vrsqrt.f32 %v1752_v19  ;;  %vm1805_vm6 = vcmp.eq.f32.partialorder %v1752_v19, inf  ;;  %vm1807_vm7 = vcmp.eq.f32.partialorder %v1752_v19, 0.0 }
 0x312   : > { %10191 = vst [vmem:[#allocation22_spill] sm:$0xff] %v8362_v21  ;;  %v3428_v44 = vsub.f32 %v3371_v9, %v8362_v21  ;;  %v8520_v21 = vld [vmem:[%s7657_s13 + $0x1a0] sm:$0xff]  }
 0x313   : > { %1965 = vperm.xlu1 %6822, %v1857_v20  }
 0x314   : > { %v8365_v1 = vmax.f32 %v3428_v44, 0.0 }
 0x315   : > { %v1874_v33 = vpop.permute.xlu1 %1873 }
 0x316   : > { %v3480_v3 = vpack.c.bf16 %v8365_v1, %v8365_v1  ;;  %6126 = vmatpush3.bf16.xpose.msra.mxu1 %v7197_v12  ;;  %v8389_v44 = vrot.slane %v1874_v33, %v8291_v32  ;;  %v7203_v33 = vld [vmem:[%s7657_s13 + $0x130] sm:$0xff]  }
 0x317   : > { %1909 = vperm.xlu1 %6822, %v8368_v54   ;;  %6127 = vmatprep.subr.bf16.mxu1 %v7198_v60  ;;  %v7202_v60 = vld [vmem:[%s7657_s13 + $0xc8] sm:$0xff]  }
 0x318   : > { %6115 = vmatprep.mubr.bf16.mxu0 %v3480_v3  ;;  %10194 = vst [vmem:[#allocation25_spill] sm:$0xff] %v8389_v44 }
 0x319   : > { %6116 = vmatmul.mubr.bf16.vlgmr.msra.gmra.mxu0 %v3480_v3  ;;  %v1883_v58 = vpop.permute.xlu1 %1882  ;;  %v7201_v3 = vld [vmem:[%s7657_s13 + $0x90] sm:$0xff]  }
 0x31a   : > { %v8377_v14 = vrot.slane %v1883_v58, %v8291_v32  ;;  %6136 = vmatpush3.bf16.xpose.msra.mxu0 %v7199_v2  ;;  %v3267_v58 = vmul.f32 %v8252_v41, %v8389_v44  ;;  %v7207_v41 = vld [vmem:[%s7657_s13 + $0x128] sm:$0xff]  }
 0x31b   : > { %6137 = vmatprep.subr.bf16.mxu0 %v7200_v53 }
 0x31c   : > { %10192 = vst [vmem:[#allocation23_spill] sm:$0xff] %v8377_v14  ;;  %v8384_v20 = vmul.f32 %v8377_v14, %v7888_v51  ;;  %v3268_v9 = vmul.f32 %v8341_v13, %v8377_v14  ;;  %v3250_v5 = vmul.f32 %v8338_v39, %v8377_v14  ;;  %v3285_v39 = vrot.slane %v3267_v58, 7 }
 0x31d   : > { %v3249_v58 = vmul.f32 %v8248_v40, %v8389_v44 }
 0x31e   : > { %10193 = vst [vmem:[#allocation24_spill] sm:$0xff] %v8384_v20  ;;  %6128 = vmatpush3.bf16.xpose.msra.mxu1 %v7201_v3  ;;  %v3241_v12 = vadd.f32 %v8384_v20, %v8027_v23  ;;  %v3286_v51 = vrot.slane %v3268_v9, 7  ;;  %v7204_v23 = vld [vmem:[%s7657_s13 + $0x168] sm:$0xff]   ;;  %v7206_v9 = vld [vmem:[%s7657_s13 + $0xc0] sm:$0xff]  }
 0x31f   : > { %6129 = vmatprep.subr.bf16.mxu1 %v7202_v60  ;;  %v7205_v60 = vld [vmem:[%s7657_s13 + $0x88] sm:$0xff]  }
 0x320   : > { %v3259_v4 = vsub.f32 %v3241_v12, %v3250_v5  ;;  %v3304_v13 = vsub.f32 %v8384_v20, %v3286_v51  ;;  %v8408_v5 = vmul.f32 %v8389_v44, %v7844_v16  ;;  %v7210_v16 = vld [vmem:[%s7657_s13 + $0x1f8] sm:$0xff]  }
 0x322   : > { %6138 = vmatpush3.bf16.xpose.msra.mxu0 %v7203_v33  ;;  %v3322_v2 = vmul.f32 %v3304_v13, %v3304_v13  ;;  %v3313_v53 = vmul.f32 %v3259_v4, %v3259_v4  ;;  %10195 = vst [vmem:[#allocation26_spill] sm:$0xff] %v8408_v5  ;;  %v3303_v51 = vsub.f32 %v8408_v5, %v3285_v39  ;;  %v7208_v4 = vld [vmem:[%s7657_s13 + $0x160] sm:$0xff]   ;;  %v7092_v33 = vpop.eup %7091 }
 0x323   : > { %6139 = vmatprep.subr.bf16.mxu0 %v7204_v23  ;;  %v3240_v13 = vadd.f32 %v8408_v5, %v7944_v55 }
 0x324   : > { %v3340_v3 = vrot.slane %v3322_v2, 1  ;;  %v3321_v23 = vmul.f32 %v3303_v51, %v3303_v51  ;;  %v7209_v2 = vld [vmem:[%s7657_s13 + $0x80] sm:$0xff]  }
 0x326   : > { %6130 = vmatpush3.bf16.xpose.msra.mxu1 %v7205_v60  ;;  %v8404_v12 = vadd.f32 %v3340_v3, %v3313_v53  ;;  %v1804_v53 = vmul.f32 %v7092_v33, %v1752_v19  ;;  %v3258_v3 = vsub.f32 %v3240_v13, %v3249_v58  ;;  %v7211_v60 = vld [vmem:[%s7657_s13 + $0x120] sm:$0xff]   ;;  %v3339_v39 = vrot.slane %v3321_v23, 1 }
 0x327   : > { %6131 = vmatprep.subr.bf16.mxu1 %v7206_v9  ;;  %v1808_v9 = vand.u32 2147483648, %v1752_v19 }
 0x328   : > { %v1806_v55 = vsel %vm1805_vm6, %v1752_v19, %v1804_v53  ;;  %vm3381_vm10 = vcmp.eq.f32.partialorder %v8404_v12, inf  ;;  %vm3383_vm11 = vcmp.eq.f32.partialorder %v8404_v12, 0.0  ;;  %vm3465_vm6 = vcmask 1044484  }
 0x329   : > { %v1809_v33 = vsel %vm1807_vm7, %v1808_v9, %v1806_v55  ;;  %v7215_v9 = vld [vmem:[%s7657_s13 + $0x110] sm:$0xff]  }
 0x32a   : > { %6140 = vmatpush3.bf16.xpose.msra.mxu0 %v7207_v41  ;;  %v7212_v41 = vld [vmem:[%s7657_s13 + $0x158] sm:$0xff]   ;;  %v1838_v23 = vsel %vm1600_vm1, %v1809_v33, -inf }
 0x32b   : > { %6141 = vmatprep.subr.bf16.mxu0 %v7208_v4  ;;  %v3312_v4 = vmul.f32 %v3258_v3, %v3258_v3  ;;  %v7214_v3 = vld [vmem:[%s7657_s13 + $0x150] sm:$0xff]  }
 0x32d   : > { %v3357_v51 = vadd.f32 %v3339_v39, %v3312_v4 }
 0x32e   : > { %6132 = vmatpush3.bf16.xpose.msra.mxu1 %v7209_v2 }
 0x32f   : > { %6153 = vmatprep.subr.bf16.mxu1 %v7210_v16  ;;  %v7213_v16 = vld [vmem:[%s7657_s13 + $0x118] sm:$0xff]   ;;  %7093 = vrsqrt.f32 %v3357_v51  ;;  %vm3374_vm8 = vcmp.eq.f32.partialorder %v3357_v51, inf  ;;  %vm3376_vm9 = vcmp.eq.f32.partialorder %v3357_v51, 0.0 }
 0x330   : > { %7095 = vrsqrt.f32 %v8404_v12 }
 0x332   : > { %6142 = vmatpush3.bf16.xpose.msra.mxu0 %v7211_v60 }
 0x333   : > { %6143 = vmatprep.subr.bf16.mxu0 %v7212_v41  ;;  %v7216_v41 = vld [vmem:[%s7657_s13 + $0x148] sm:$0xff]  }
 0x335   : > { %v8421_v40 = vpop.f32.mrf.mxu1 }
 0x337   : > { %v8423_v2 = vpop.f32.mrf.mxu1 }
 0x339   : > { %v8425_v13 = vpop.f32.mrf.mxu0  ;;  %v2688_v58 = vpop.f32.mrf.mxu1 }
 0x33a   : > { %6144 = vmatpush3.bf16.xpose.msra.mxu0 %v7213_v16 }
 0x33b   : > { %v8429_v53 = vpop.f32.mrf.mxu0  ;;  %v2689_v19 = vpop.f32.mrf.mxu1  ;;  %1839 = vmax.xlane.f32.xlu1 %v1838_v23  ;;  %6145 = vmatprep.subr.bf16.mxu0 %v7214_v3 }
 0x33c   : > { %v7094_v55 = vpop.eup %7093 }
 0x33d   : > { %v2825_v60 = vpop.f32.mrf.mxu0  ;;  %v3373_v4 = vmul.f32 %v7094_v55, %v3357_v51  ;;  %v7096_v33 = vpop.eup %7095  ;;  %v7217_v55 = vld [vmem:[%s7657_s13 + $0x100] sm:$0xff]  }
 0x33e   : > { %v3380_v3 = vmul.f32 %v7096_v33, %v8404_v12  ;;  %v3377_v60 = vand.u32 2147483648, %v3357_v51  ;;  %v7218_v33 = vld [vmem:[%s7657_s13 + $0x278] sm:$0xff]  }
 0x33f   : > { %v2826_v39 = vpop.f32.mrf.mxu0  ;;  %v3375_v19 = vsel %vm3374_vm8, %v3357_v51, %v3373_v4  ;;  %v3384_v4 = vand.u32 2147483648, %v8404_v12 }
 0x340   : > { %v1735_v39 = vrot.slane %v8058_v46, 1 }
 0x342   : > { %6146 = vmatpush3.bf16.xpose.msra.mxu0 %v7215_v9  ;;  %v3378_v9 = vsel %vm3376_vm9, %v3377_v60, %v3375_v19 }
 0x343   : > { %6147 = vmatprep.subr.bf16.mxu0 %v7216_v41  ;;  %v8443_v41 = vld [vmem:[%s7988_s29 + $0x6] sm:$0x1] }
 0x34a   : > { %6148 = vmatpush3.bf16.xpose.msra.mxu0 %v8004_v59 }
 0x34b   : > { %v1828_v58 = vpop.xlane.xlu1 %1827  ;;  %6149 = vmatprep.subr.bf16.mxu0 %v8007_v61 }
 0x34c   : > { %v1847_v23 = vmul.f32 0.5, %v1828_v58  ;;  %v1753_v58 = vadd.f32 %v1735_v39, %v8058_v46 }
 0x34e   : > { %v1856_v16 = vmul.f32 %v1847_v23, %v8281_v6  ;;  %v3382_v6 = vsel %vm3381_vm10, %v8404_v12, %v3380_v3  ;;  %7097 = vrsqrt.f32 %v1753_v58  ;;  %vm1812_vm14 = vcmp.eq.f32.partialorder %v1753_v58, inf }
 0x34f   : > { %vm1814_vm15 = vcmp.eq.f32.partialorder %v1753_v58, 0.0 }
 0x350   : > { %1960 = vperm.xlu0 %6821, %v1856_v16   ;;  %v3385_v16 = vsel %vm3383_vm11, %v3384_v4, %v3382_v6  ;;  %v8470_v6 = vld [vmem:[%s7657_s13 + $0x1b8] sm:$0xff]   ;;  %v8476_v4 = vld [vmem:[%s7657_s13 + $0x1f0] sm:$0xff]   ;;  %vm3468_vm11 = vcmask 1045509  }
 0x351   : > { %v8440_v59 = vpop.permute.xlu1 %1950  ;;  %10198 = vst [vmem:[#allocation29_spill] sm:$0xff] %v8470_v6  ;;  %10199 = vst [vmem:[#allocation30_spill] sm:$0xff] %v8476_v4 }
 0x352   : > { %10196 = vst [vmem:[#allocation27_spill] sm:$0xff] %v8440_v59  ;;  %v3429_v61 = vsub.f32 %v3378_v9, %v8440_v59  ;;  %6150 = vmatpush3.bf16.xpose.msra.mxu0 %v7217_v55 }
 0x353   : > { %6171 = vmatprep.subr.bf16.mxu0 %v7218_v33 }
 0x354   : > { %v8452_v51 = vmax.f32 %v3429_v61, 0.0  ;;  %1918 = vperm.xlu0 %6821, %v8443_v41  }
 0x355   : > { %v8456_v23 = vpop.permute.xlu0 %1955  ;;  %v8458_v19 = vpop.permute.xlu1 %1891 }
 0x356   : > { %10197 = vst [vmem:[#allocation28_spill] sm:$0xff] %v8456_v23  ;;  %v3430_v3 = vsub.f32 %v3385_v16, %v8456_v23  ;;  %v3481_v60 = vpack.c.bf16 %v8452_v51, %v8452_v51  ;;  %v3455_v46 = vrot.slane %v8452_v51, 7  ;;  %v8507_v23 = vld [vmem:[%s7657_s13 + $0x1a8] sm:$0xff]  }
 0x357   : > { %10204 = vst [vmem:[#allocation35_spill] sm:$0xff] %v8507_v23 }
 0x358   : > { %v8464_v39 = vmax.f32 %v3430_v3, 0.0  ;;  %6133 = vmatprep.mubr.bf16.mxu1 %v3481_v60  ;;  %v3457_v55 = vsel %vm3456_vm12, %v3455_v46, %v8365_v1  ;;  %v7221_v3 = vld [vmem:[%s7657_s13 + $0x238] sm:$0xff]  }
 0x359   : > { %v1901_v12 = vpop.permute.xlu1 %1900  ;;  %6134 = vmatmul.mubr.bf16.vlgmr.msra.gmra.mxu1 %v3481_v60  ;;  %v7222_v60 = vld [vmem:[%s7657_s13 + $0x270] sm:$0xff]  }
 0x35a   : > { %v3458_v9 = vrot.slane %v8464_v39, 6  ;;  %v3482_v61 = vpack.c.bf16 %v8464_v39, %v8464_v39  ;;  %6154 = vmatpush3.bf16.xpose.msra.mxu1 %v8470_v6  ;;  %v8483_v16 = vrot.slane %v1901_v12, %v8291_v32  ;;  %v8490_v6 = vld [vmem:[%s7657_s13 + $0x1b0] sm:$0xff]  }
 0x35b   : > { %6155 = vmatprep.subr.bf16.mxu1 %v8476_v4  ;;  %10201 = vst [vmem:[#allocation32_spill] sm:$0xff] %v8490_v6 }
 0x35c   : > { %v8480_v33 = vsel %vm3459_vm13, %v3458_v9, %v3457_v55  ;;  %10200 = vst [vmem:[#allocation31_spill] sm:$0xff] %v8483_v16  ;;  %6151 = vmatprep.mubr.bf16.mxu0 %v3482_v61  ;;  %v3270_v46 = vmul.f32 %v8423_v2, %v8483_v16  ;;  %v8494_v9 = vld [vmem:[%s7657_s13 + $0x1e8] sm:$0xff]   ;;  %v7098_v55 = vpop.eup %7097 }
 0x35d   : > { %6152 = vmatmul.mubr.bf16.vlgmr.msra.gmra.mxu0 %v3482_v61  ;;  %10202 = vst [vmem:[#allocation33_spill] sm:$0xff] %v8494_v9  ;;  %v8499_v61 = vmul.f32 %v8483_v16, %v7918_v17  ;;  %v1811_v2 = vmul.f32 %v7098_v55, %v1753_v58 }
 0x35e   : > { %6172 = vmatpush3.bf16.xpose.msra.mxu0 %v7221_v3  ;;  %v3288_v12 = vrot.slane %v3270_v46, 7  ;;  %v7225_v3 = vld [vmem:[%s7657_s13 + $0x230] sm:$0xff]   ;;  %v1815_v46 = vand.u32 2147483648, %v1753_v58 }
 0x35f   : > { %6173 = vmatprep.subr.bf16.mxu0 %v7222_v60  ;;  %10203 = vst [vmem:[#allocation34_spill] sm:$0xff] %v8499_v61  ;;  %v7226_v60 = vld [vmem:[%s7657_s13 + $0x268] sm:$0xff]   ;;  %v1813_v17 = vsel %vm1812_vm14, %v1753_v58, %v1811_v2  ;;  %v8524_v58 = vld [vmem:[%s7657_s13 + $0x1d8] sm:$0xff]   ;;  %vm3471_vm14 = vcmask 1046534  }
 0x360   : > { %v3306_v4 = vsub.f32 %v8499_v61, %v3288_v12  ;;  %v3252_v12 = vmul.f32 %v8421_v40, %v8483_v16 }
 0x362   : > { %6156 = vmatpush3.bf16.xpose.msra.mxu1 %v8490_v6  ;;  %v3243_v6 = vadd.f32 %v8499_v61, %v8132_v63  ;;  %v3324_v55 = vmul.f32 %v3306_v4, %v3306_v4 }
 0x363   : > { %6157 = vmatprep.subr.bf16.mxu1 %v8494_v9  ;;  %v8511_v9 = vld [vmem:[%s7657_s13 + $0x1e0] sm:$0xff]  }
 0x364   : > { %v3261_v63 = vsub.f32 %v3243_v6, %v3252_v12  ;;  %v8548_v12 = vld [vmem:[%s7657_s13 + $0x190] sm:$0xff]  }
 0x366   : > { %6174 = vmatpush3.bf16.xpose.msra.mxu0 %v7225_v3  ;;  %v1816_v3 = vsel %vm1814_vm15, %v1815_v46, %v1813_v17  ;;  %v3315_v61 = vmul.f32 %v3261_v63, %v3261_v63  ;;  %v8542_v46 = vld [vmem:[%s7657_s13 + $0x1d0] sm:$0xff]   ;;  %v8552_v63 = vld [vmem:[%s7657_s13 + $0x1c8] sm:$0xff]  }
 0x367   : > { %6175 = vmatprep.subr.bf16.mxu0 %v7226_v60  ;;  %v3342_v60 = vrot.slane %v3324_v55, 1 }
 0x36a   : > { %6158 = vmatpush3.bf16.xpose.msra.mxu1 %v8507_v23  ;;  %v1841_v23 = vsel %vm1600_vm1, %v1816_v3, -inf }
 0x36b   : > { %6159 = vmatprep.subr.bf16.mxu1 %v8511_v9 }
 0x36e   : > { %6176 = vmatpush3.bf16.xpose.msra.mxu0 %v8064_v50  ;;  %v3360_v50 = vadd.f32 %v3342_v60, %v3315_v61 }
 0x36f   : > { %6177 = vmatprep.subr.bf16.mxu0 %v8069_v56 }
 0x370   : > { %7099 = vrsqrt.f32 %v3360_v50  ;;  %vm3395_vm0 = vcmp.eq.f32.partialorder %v3360_v50, inf  ;;  %vm3397_vm2 = vcmp.eq.f32.partialorder %v3360_v50, 0.0 }
 0x372   : > { %6160 = vmatpush3.bf16.xpose.msra.mxu1 %v8520_v21 }
 0x373   : > { %1842 = vmax.xlane.f32.xlu0 %v1841_v23  ;;  %6161 = vmatprep.subr.bf16.mxu1 %v8524_v58  ;;  %v8536_v23 = vld [vmem:[%s7657_s13 + $0x198] sm:$0xff]  }
 0x375   : > { %v8527_v40 = vpop.f32.mrf.mxu1 }
 0x376   : > { %6178 = vmatpush3.bf16.xpose.msra.mxu0 %v8081_v8 }
 0x377   : > { %v8530_v56 = vpop.f32.mrf.mxu1  ;;  %6179 = vmatprep.subr.bf16.mxu0 %v8085_v10 }
 0x379   : > { %v8533_v6 = vpop.f32.mrf.mxu0  ;;  %v2962_v4 = vpop.f32.mrf.mxu1 }
 0x37a   : > { %6162 = vmatpush3.bf16.xpose.msra.mxu1 %v8536_v23  ;;  %v8562_v4 = vld [vmem:[%s7657_s13 + $0x188] sm:$0xff]  }
 0x37b   : > { %v8539_v2 = vpop.f32.mrf.mxu0  ;;  %v2963_v61 = vpop.f32.mrf.mxu1  ;;  %6163 = vmatprep.subr.bf16.mxu1 %v8542_v46 }
 0x37d   : > { %v3099_v8 = vpop.f32.mrf.mxu0  ;;  %v7100_v3 = vpop.eup %7099 }
 0x37e   : > { %6180 = vmatpush3.bf16.xpose.msra.mxu0 %v8092_v18  ;;  %v8559_v18 = vld [vmem:[%s7988_s29 + $0x7] sm:$0x1] }
 0x37f   : > { %v3100_v10 = vpop.f32.mrf.mxu0  ;;  %6181 = vmatprep.subr.bf16.mxu0 %v8095_v0  ;;  %v3394_v0 = vmul.f32 %v7100_v3, %v3360_v50  ;;  %v8567_v8 = vld [vmem:[%s7657_s13 + $0x1c0] sm:$0xff]  }
 0x380   : > { %10205 = vst [vmem:[#allocation36_spill] sm:$0xff] %v8567_v8 }
 0x382   : > { %v1837_v17 = vpop.xlane.xlu0 %1836  ;;  %6164 = vmatpush3.bf16.xpose.msra.mxu1 %v8548_v12 }
 0x383   : > { %v1850_v55 = vmul.f32 0.5, %v1837_v17  ;;  %6165 = vmatprep.subr.bf16.mxu1 %v8552_v63 }
 0x385   : > { %v1859_v60 = vmul.f32 %v1850_v55, %v8443_v41  ;;  %v3398_v41 = vand.u32 2147483648, %v3360_v50 }
 0x386   : > { %6182 = vmatpush3.bf16.xpose.msra.mxu0 %v8102_v26 }
 0x387   : > { %1975 = vperm.xlu1 %6822, %v1859_v60   ;;  %6183 = vmatprep.subr.bf16.mxu0 %v8105_v29  ;;  %v3396_v29 = vsel %vm3395_vm0, %v3360_v50, %v3394_v0  ;;  %v8577_v60 = vld [vmem:[%s7988_s29 + $0x8] sm:$0x1] }
 0x388   : > { %v3399_v17 = vsel %vm3397_vm2, %v3398_v41, %v3396_v29 }
 0x38a   : > { %6166 = vmatpush3.bf16.xpose.msra.mxu1 %v8562_v4 }
 0x38b   : > { %1927 = vperm.xlu1 %6822, %v8559_v18   ;;  %v1834_v61 = vpop.xlane.xlu1 %1833  ;;  %6167 = vmatprep.subr.bf16.mxu1 %v8567_v8 }
 0x38c   : > { %v1849_v26 = vmul.f32 0.5, %v1834_v61  ;;  %v8582_v61 = vld [vmem:[%s7657_s13 + $0x180] sm:$0xff]  }
 0x38e   : > { %v1858_v10 = vmul.f32 %v1849_v26, %v8368_v54  ;;  %6184 = vmatpush3.bf16.xpose.msra.mxu0 %v8112_v45  ;;  %v8586_v54 = vld [vmem:[%s7657_s13 + $0x2f8] sm:$0xff]  }
 0x38f   : > { %v8572_v55 = vpop.permute.xlu1 %1965  ;;  %6185 = vmatprep.subr.bf16.mxu0 %v8115_v48  ;;  %v8596_v48 = vrot.slane %v8458_v19, %v8291_v32 }
 0x390   : > { %10206 = vst [vmem:[#allocation37_spill] sm:$0xff] %v8572_v55  ;;  %v3432_v3 = vsub.f32 %v3399_v17, %v8572_v55  ;;  %1970 = vperm.xlu0 %6821, %v1858_v10  }
 0x391   : > { %10207 = vst [vmem:[#allocation38_spill] sm:$0xff] %v8596_v48  ;;  %v3269_v50 = vmul.f32 %v8350_v47, %v8596_v48  ;;  %v8604_v26 = vmul.f32 %v8596_v48, %v7894_v52  ;;  %v3251_v47 = vmul.f32 %v8347_v38, %v8596_v48 }
 0x392   : > { %v8579_v8 = vmax.f32 %v3432_v3, 0.0  ;;  %6168 = vmatpush3.bf16.xpose.msra.mxu1 %v8582_v61 }
 0x393   : > { %6189 = vmatprep.subr.bf16.mxu1 %v8586_v54  ;;  %v3287_v0 = vrot.slane %v3269_v50, 7  ;;  %10208 = vst [vmem:[#allocation39_spill] sm:$0xff] %v8604_v26  ;;  %v1910_v38 = vpop.permute.xlu1 %1909 }
 0x394   : > { %1936 = vperm.xlu0 %6821, %v8577_v60   ;;  %v3484_v45 = vpack.c.bf16 %v8579_v8, %v8579_v8 }
 0x396   : > { %6186 = vmatpush3.bf16.xpose.msra.mxu0 %v8122_v15  ;;  %6187 = vmatprep.mubr.bf16.mxu0 %v3484_v45  ;;  %v3305_v15 = vsub.f32 %v8604_v26, %v3287_v0 }
 0x397   : > { %6207 = vmatprep.subr.bf16.mxu0 %v8125_v57  ;;  %v3242_v57 = vadd.f32 %v8604_v26, %v8036_v28 }
 0x399   : > { %v3260_v19 = vsub.f32 %v3242_v57, %v3251_v47  ;;  %v8648_v47 = vld [vmem:[%s7657_s13 + $0x2b8] sm:$0xff]  }
 0x39b   : > { %v3314_v29 = vmul.f32 %v3260_v19, %v3260_v19  ;;  %v10211_v19 = vld [vmem:[#allocation13_spill] sm:$0xff] }
 0x39d   : > { %6188 = vmatmul.mubr.bf16.vlgmr.msra.gmra.mxu0 %v3484_v45 }
 0x39e   : > { %6208 = vmatpush3.bf16.xpose.msra.mxu0 %v8140_v7  ;;  %v3323_v7 = vmul.f32 %v3305_v15, %v3305_v15  ;;  %v3464_v15 = vrot.slane %v8579_v8, 4 }
 0x39f   : > { %6209 = vmatprep.subr.bf16.mxu0 %v8145_v11 }
 0x3a0   : > { %v3341_v11 = vrot.slane %v3323_v7, 1  ;;  %v8652_v7 = vld [vmem:[%s7657_s13 + $0x2f0] sm:$0xff]  }
 0x3a2   : > { %v3359_v52 = vadd.f32 %v3341_v11, %v3314_v29  ;;  %v10212_v11 = vld [vmem:[#allocation9_spill] sm:$0xff] }
 0x3a4   : > { %7101 = vrsqrt.f32 %v3359_v52  ;;  %vm3388_vm3 = vcmp.eq.f32.partialorder %v3359_v52, inf  ;;  %vm3390_vm4 = vcmp.eq.f32.partialorder %v3359_v52, 0.0 }
 0x3a6   : > { %6210 = vmatpush3.bf16.xpose.msra.mxu0 %v8152_v22 }
 0x3a7   : > { %6211 = vmatprep.subr.bf16.mxu0 %v8155_v24 }
 0x3ae   : > { %6212 = vmatpush3.bf16.xpose.msra.mxu0 %v8162_v30 }
 0x3af   : > { %6213 = vmatprep.subr.bf16.mxu0 %v8165_v31 }
 0x3b1   : > { %v7102_v30 = vpop.eup %7101 }
 0x3b2   : > { %v3387_v31 = vmul.f32 %v7102_v30, %v3359_v52 }
 0x3b5   : > { %v8615_v41 = vpop.f32.mrf.mxu1 }
 0x3b6   : > { %6214 = vmatpush3.bf16.xpose.msra.mxu0 %v8172_v34  ;;  %v3389_v34 = vsel %vm3388_vm3, %v3359_v52, %v3387_v31  ;;  %v8668_v31 = vld [vmem:[%s7657_s13 + $0x2b0] sm:$0xff]  }
 0x3b7   : > { %v8618_v28 = vpop.f32.mrf.mxu1  ;;  %6215 = vmatprep.subr.bf16.mxu0 %v8175_v35  ;;  %v3391_v35 = vand.u32 2147483648, %v3359_v52 }
 0x3b9   : > { %v3236_v22 = vpop.f32.mrf.mxu1 }
 0x3bb   : > { %v3237_v24 = vpop.f32.mrf.mxu1 }
 0x3be   : > { %6216 = vmatpush3.bf16.xpose.msra.mxu0 %v8182_v43  ;;  %v3392_v43 = vsel %vm3390_vm4, %v3391_v35, %v3389_v34  ;;  %v10215_v35 = vld [vmem:[#allocation20_spill] sm:$0xff] }
 0x3bf   : > { %6217 = vmatprep.subr.bf16.mxu0 %v8185_v49 }
 0x3c4   : > { %v1840_v10 = vpop.xlane.xlu1 %1839 }
 0x3c5   : > { %v1851_v17 = vmul.f32 0.5, %v1840_v10 }
 0x3c6   : > { %6218 = vmatpush3.bf16.xpose.msra.mxu0 %v8197_v62 }
 0x3c7   : > { %v1860_v3 = vmul.f32 %v1851_v17, %v8559_v18  ;;  %6219 = vmatprep.subr.bf16.mxu0 %v8203_v42  ;;  %v8674_v17 = vld [vmem:[%s7657_s13 + $0x2e8] sm:$0xff]  }
 0x3c9   : > { %1980 = vperm.xlu1 %6822, %v1860_v3   ;;  %v10214_v3 = vld [vmem:[#allocation14_spill] sm:$0xff] }
 0x3cb   : > { %v8626_v45 = vpop.permute.xlu0 %1960 }
 0x3cc   : > { %10209 = vst [vmem:[#allocation40_spill] sm:$0xff] %v8626_v45  ;;  %v3431_v49 = vsub.f32 %v3392_v43, %v8626_v45  ;;  %v3858_v43 = vadd.f32 %v8365_v1, %v10215_v35 }
 0x3ce   : > { %v8629_v50 = vmax.f32 %v3431_v49, 0.0  ;;  %6220 = vmatpush3.bf16.xpose.msra.mxu0 %v8212_v36 }
 0x3cf   : > { %v1919_v62 = vpop.permute.xlu0 %1918  ;;  %6221 = vmatprep.subr.bf16.mxu0 %v8216_v37 }
 0x3d0   : > { %v3461_v42 = vrot.slane %v8629_v50, 5  ;;  %v8635_v18 = vrot.slane %v1919_v62, %v8291_v32  ;;  %v3483_v0 = vpack.c.bf16 %v8629_v50, %v8629_v50 }
 0x3d2   : > { %10210 = vst [vmem:[#allocation41_spill] sm:$0xff] %v8635_v18  ;;  %v3463_v57 = vsel %vm3462_vm5, %v3461_v42, %v8480_v33  ;;  %6169 = vmatprep.mubr.bf16.mxu1 %v3483_v0  ;;  %v3272_v36 = vmul.f32 %v8530_v56, %v8635_v18  ;;  %v8658_v56 = vrot.slane %v1910_v38, %v8291_v32 }
 0x3d3   : > { %6170 = vmatmul.mubr.bf16.vlgmr.msra.gmra.mxu1 %v3483_v0  ;;  %v8645_v37 = vsel %vm3465_vm6, %v3464_v15, %v3463_v57  ;;  %v8662_v29 = vmul.f32 %v8635_v18, %v10212_v11  ;;  %v3254_v42 = vmul.f32 %v8527_v40, %v8635_v18 }
 0x3d4   : > { %6190 = vmatpush3.bf16.xpose.msra.mxu1 %v8648_v47  ;;  %v3290_v33 = vrot.slane %v3272_v36, 7 }
 0x3d5   : > { %6191 = vmatprep.subr.bf16.mxu1 %v8652_v7  ;;  %10213 = vst [vmem:[#allocation13_spill] sm:$0xff] %v8662_v29  ;;  %v3245_v34 = vadd.f32 %v8662_v29, %v10214_v3 }
 0x3d6   : > { %6222 = vmatpush3.bf16.xpose.msra.mxu0 %v8223_v27  ;;  %v3308_v24 = vsub.f32 %v8662_v29, %v3290_v33  ;;  %v3271_v27 = vmul.f32 %v8429_v53, %v8658_v56  ;;  %v10216_v33 = vld [vmem:[#allocation8_spill] sm:$0xff] }
 0x3d7   : > { %6243 = vmatprep.subr.bf16.mxu0 %v10211_v19  ;;  %v3263_v36 = vsub.f32 %v3245_v34, %v3254_v42  ;;  %v8686_v19 = vmul.f32 %v8658_v56, %v10216_v33  ;;  %v8704_v42 = vld [vmem:[%s7657_s13 + $0x2a0] sm:$0xff]  }
 0x3d8   : > { %v3326_v0 = vmul.f32 %v3308_v24, %v3308_v24  ;;  %v3289_v57 = vrot.slane %v3271_v27, 7  ;;  %v8694_v24 = vld [vmem:[%s7657_s13 + $0x2e0] sm:$0xff]  }
 0x3d9   : > { %v3523_v52 = vpop.f32.mrf.mxu0 }
 0x3da   : > { %v3867_v30 = vmul.f32 %v3523_v52, %v8301_v25  ;;  %v3344_v52 = vrot.slane %v3326_v0, 1  ;;  %v3307_v40 = vsub.f32 %v8686_v19, %v3289_v57 }
 0x3db   : > { %v3525_v22 = vpop.f32.mrf.mxu0 }
 0x3dc   : > { %v3885_v10 = vmul.f32 %v3525_v22, %v8301_v25  ;;  %6192 = vmatpush3.bf16.xpose.msra.mxu1 %v8668_v31  ;;  %v3876_v53 = vsub.f32 %v3858_v43, %v3867_v30  ;;  %v3317_v30 = vmul.f32 %v3263_v36, %v3263_v36  ;;  %v3253_v43 = vmul.f32 %v8425_v13, %v8658_v56  ;;  %v8712_v36 = vld [vmem:[%s7657_s13 + $0x298] sm:$0xff]   ;;  %v8716_v13 = vld [vmem:[%s7657_s13 + $0x2d0] sm:$0xff]  }
 0x3dd   : > { %v3527_v38 = vpop.f32.mrf.mxu0  ;;  %6193 = vmatprep.subr.bf16.mxu1 %v8674_v17  ;;  %10218 = vst [vmem:[#allocation9_spill] sm:$0xff] %v8716_v13 }
 0x3de   : > { %v3903_v49 = vrot.slane %v3885_v10, 7  ;;  %v3930_v1 = vmul.f32 %v3876_v53, %v3876_v53  ;;  %v8689_v10 = vld [vmem:[%s7657_s13 + $0x2a8] sm:$0xff]   ;;  %v3362_v34 = vadd.f32 %v3344_v52, %v3317_v30  ;;  %v8708_v53 = vld [vmem:[%s7657_s13 + $0x2d8] sm:$0xff]   ;;  %v8720_v52 = vld [vmem:[%s7657_s13 + $0x290] sm:$0xff]  }
 0x3df   : > { %v3528_v62 = vpop.f32.mrf.mxu0  ;;  %v10217_v38 = vld [vmem:[#allocation12_spill] sm:$0xff]  ;;  %10219 = vst [vmem:[#allocation14_spill] sm:$0xff] %v8720_v52 }
 0x3e0   : > { %v3921_v15 = vsub.f32 %v10215_v35, %v3903_v49  ;;  %v3244_v3 = vadd.f32 %v8686_v19, %v10217_v38  ;;  %v3325_v49 = vmul.f32 %v3307_v40, %v3307_v40  ;;  %7103 = vrsqrt.f32 %v3362_v34  ;;  %v8724_v40 = vld [vmem:[%s7657_s13 + $0x2c8] sm:$0xff]  }
 0x3e1   : > { %10220 = vst [vmem:[#allocation8_spill] sm:$0xff] %v8724_v40  ;;  %vm3409_vm7 = vcmp.eq.f32.partialorder %v3362_v34, inf  ;;  %vm3411_vm8 = vcmp.eq.f32.partialorder %v3362_v34, 0.0 }
 0x3e2   : > { %v3939_v11 = vmul.f32 %v3921_v15, %v3921_v15  ;;  %v3262_v62 = vsub.f32 %v3244_v3, %v3253_v43  ;;  %v3343_v0 = vrot.slane %v3325_v49, 1  ;;  %v3412_v3 = vand.u32 2147483648, %v3362_v34 }
 0x3e4   : > { %v3957_v22 = vrot.slane %v3939_v11, 1  ;;  %6194 = vmatpush3.bf16.xpose.msra.mxu1 %v8689_v10  ;;  %v3316_v15 = vmul.f32 %v3262_v62, %v3262_v62 }
 0x3e5   : > { %6195 = vmatprep.subr.bf16.mxu1 %v8694_v24 }
 0x3e6   : > { %v8697_v27 = vadd.f32 %v3957_v22, %v3930_v1  ;;  %v3361_v57 = vadd.f32 %v3343_v0, %v3316_v15  ;;  %v8732_v15 = vld [vmem:[%s7657_s13 + $0x288] sm:$0xff]  }
 0x3e7   : > { %10221 = vst [vmem:[#allocation12_spill] sm:$0xff] %v8732_v15 }
 0x3e8   : > { %7105 = vrsqrt.f32 %v3361_v57  ;;  %vm3402_vm9 = vcmp.eq.f32.partialorder %v3361_v57, inf  ;;  %vm3404_vm10 = vcmp.eq.f32.partialorder %v3361_v57, 0.0  ;;  %vm3986_vm15 = vcmp.eq.f32.partialorder %v8697_v27, inf }
 0x3e9   : > { %7107 = vrsqrt.f32 %v8697_v27  ;;  %vm3988_vm3 = vcmp.eq.f32.partialorder %v8697_v27, 0.0 }
 0x3ec   : > { %6196 = vmatpush3.bf16.xpose.msra.mxu1 %v8704_v42 }
 0x3ed   : > { %6197 = vmatprep.subr.bf16.mxu1 %v8708_v53  ;;  %v7104_v33 = vpop.eup %7103 }
 0x3ee   : > { %v3408_v11 = vmul.f32 %v7104_v33, %v3362_v34 }
 0x3f0   : > { %v3410_v38 = vsel %vm3409_vm7, %v3362_v34, %v3408_v11 }
 0x3f1   : > { %v3413_v49 = vsel %vm3411_vm8, %v3412_v3, %v3410_v38  ;;  %v8746_v3 = vld [vmem:[%s7657_s13 + $0x438] sm:$0xff]  }
 0x3f2   : > { %10223 = vst [vmem:[#allocation43_spill] sm:$0xff] %v8746_v3 }
 0x3f4   : > { %6198 = vmatpush3.bf16.xpose.msra.mxu1 %v8712_v36 }
 0x3f5   : > { %6199 = vmatprep.subr.bf16.mxu1 %v8716_v13  ;;  %v7106_v43 = vpop.eup %7105 }
 0x3f6   : > { %v3401_v33 = vmul.f32 %v7106_v43, %v3361_v57 }
 0x3f8   : > { %v3403_v11 = vsel %vm3402_vm9, %v3361_v57, %v3401_v33  ;;  %v8759_v33 = vld [vmem:[%s7657_s13 + $0x3f8] sm:$0xff]  }
 0x3f9   : > { %10226 = vst [vmem:[#allocation46_spill] sm:$0xff] %v8759_v33 }
 0x3fc   : > { %6200 = vmatpush3.bf16.xpose.msra.mxu1 %v8720_v52  ;;  %v1843_v1 = vpop.xlane.xlu0 %1842 }
 0x3fd   : > { %v1852_v22 = vmul.f32 0.5, %v1843_v1  ;;  %6201 = vmatprep.subr.bf16.mxu1 %v8724_v40  ;;  %v8806_v40 = vld [vmem:[%s7657_s13 + $0x3e8] sm:$0xff]  }
 0x3ff   : > { %v1861_v30 = vmul.f32 %v1852_v22, %v8577_v60  ;;  %v8738_v60 = vld [vmem:[%s7657_s13 + $0x2c0] sm:$0xff]   ;;  %v3405_v22 = vand.u32 2147483648, %v3361_v57 }
 0x400   : > { %10222 = vst [vmem:[#allocation42_spill] sm:$0xff] %v8738_v60 }
 0x401   : > { %1985 = vperm.xlu0 %6821, %v1861_v30   ;;  %v3406_v38 = vsel %vm3404_vm10, %v3405_v22, %v3403_v11  ;;  %vm3474_vm10 = vcmask 1047559  }
 0x402   : > { %v8728_v62 = vpop.permute.xlu1 %1975 }
 0x403   : > { %v3434_v0 = vsub.f32 %v3413_v49, %v8728_v62  ;;  %v8751_v49 = vld [vmem:[%s7657_s13 + $0x280] sm:$0xff]  }
 0x404   : > { %6202 = vmatpush3.bf16.xpose.msra.mxu1 %v8732_v15  ;;  %10224 = vst [vmem:[#allocation44_spill] sm:$0xff] %v8751_v49  ;;  %v8801_v15 = vld [vmem:[%s7657_s13 + $0x3b0] sm:$0xff]  }
 0x405   : > { %v8735_v1 = vmax.f32 %v3434_v0, 0.0  ;;  %6203 = vmatprep.subr.bf16.mxu1 %v8738_v60  ;;  %v8755_v0 = vld [vmem:[%s7657_s13 + $0x470] sm:$0xff]  }
 0x406   : > { %10225 = vst [vmem:[#allocation45_spill] sm:$0xff] %v8755_v0  ;;  %v1928_v57 = vpop.permute.xlu1 %1927 }
 0x407   : > { %v3486_v34 = vpack.c.bf16 %v8735_v1, %v8735_v1  ;;  %v8769_v35 = vrot.slane %v1928_v57, %v8291_v32  ;;  %v8786_v57 = vld [vmem:[%s7657_s13 + $0x3f0] sm:$0xff]  }
 0x409   : > { %6223 = vmatprep.mubr.bf16.mxu0 %v3486_v34 }
 0x40a   : > { %6224 = vmatmul.mubr.bf16.vlgmr.msra.gmra.mxu0 %v3486_v34 }
 0x40b   : > { %v8743_v30 = vpop.permute.xlu0 %1970  ;;  %6244 = vmatpush3.bf16.xpose.msra.mxu0 %v8746_v3  ;;  %v8781_v3 = vld [vmem:[%s7657_s13 + $0x3b8] sm:$0xff]  }
 0x40c   : > { %v3433_v43 = vsub.f32 %v3406_v38, %v8743_v30  ;;  %6204 = vmatpush3.bf16.xpose.msra.mxu1 %v8751_v49  ;;  %6245 = vmatprep.subr.bf16.mxu0 %v8755_v0  ;;  %v3470_v38 = vrot.slane %v8735_v1, 2  ;;  %10228 = vst [vmem:[#allocation48_spill] sm:$0xff] %v8781_v3  ;;  %v10232_v49 = vld [vmem:[#allocation17_spill] sm:$0xff] }
 0x40d   : > { %6225 = vmatprep.subr.bf16.mxu1 %v8759_v33  ;;  %v10229_v33 = vld [vmem:[#allocation16_spill] sm:$0xff]  ;;  %10235 = vst [vmem:[#allocation17_spill] sm:$0xff] %v8806_v40 }
 0x40e   : > { %v8762_v34 = vmax.f32 %v3433_v43, 0.0  ;;  %v8774_v43 = vld [vmem:[%s7657_s13 + $0x430] sm:$0xff]   ;;  %10230 = vst [vmem:[#allocation16_spill] sm:$0xff] %v8786_v57 }
 0x40f   : > { %10227 = vst [vmem:[#allocation47_spill] sm:$0xff] %v8774_v43 }
 0x410   : > { %v3467_v11 = vrot.slane %v8762_v34, 3  ;;  %v3485_v22 = vpack.c.bf16 %v8762_v34, %v8762_v34 }
 0x412   : > { %6205 = vmatprep.mubr.bf16.mxu1 %v3485_v22  ;;  %v3469_v25 = vsel %vm3468_vm11, %v3467_v11, %v8645_v37  ;;  %v3273_v37 = vmul.f32 %v8539_v2, %v8769_v35  ;;  %v10234_v2 = vld [vmem:[#allocation18_spill] sm:$0xff] }
 0x413   : > { %6206 = vmatmul.mubr.bf16.vlgmr.msra.gmra.mxu1 %v3485_v22  ;;  %6246 = vmatpush3.bf16.xpose.msra.mxu0 %v8774_v43  ;;  %v8778_v0 = vsel %vm3471_vm14, %v3470_v38, %v3469_v25  ;;  %v3859_v25 = vadd.f32 %v8452_v51, %v8408_v5  ;;  %v10231_v43 = vld [vmem:[#allocation10_spill] sm:$0xff] }
 0x414   : > { %6226 = vmatpush3.bf16.xpose.msra.mxu1 %v8781_v3  ;;  %6247 = vmatprep.subr.bf16.mxu0 %v10229_v33  ;;  %v3291_v22 = vrot.slane %v3273_v37, 7  ;;  %v8796_v3 = vmul.f32 %v8769_v35, %v10231_v43  ;;  %10233 = vst [vmem:[#allocation10_spill] sm:$0xff] %v8801_v15 }
 0x415   : > { %6227 = vmatprep.subr.bf16.mxu1 %v8786_v57 }
 0x416   : > { %v3309_v43 = vsub.f32 %v8796_v3, %v3291_v22 }
 0x419   : > { %v3564_v11 = vpop.f32.mrf.mxu1 }
 0x41a   : > { %v3868_v38 = vmul.f32 %v3564_v11, %v8389_v44 }
 0x41b   : > { %v3566_v33 = vpop.f32.mrf.mxu1  ;;  %6248 = vmatpush3.bf16.xpose.msra.mxu0 %v10232_v49  ;;  %v3860_v49 = vadd.f32 %v8464_v39, %v8384_v20  ;;  %v3327_v39 = vmul.f32 %v3309_v43, %v3309_v43 }
 0x41c   : > { %v3877_v60 = vsub.f32 %v3859_v25, %v3868_v38  ;;  %v3886_v57 = vmul.f32 %v3566_v33, %v8389_v44  ;;  %6228 = vmatpush3.bf16.xpose.msra.mxu1 %v8801_v15  ;;  %6249 = vmatprep.subr.bf16.mxu0 %v10234_v2  ;;  %v10236_v44 = vld [vmem:[#allocation15_spill] sm:$0xff] }
 0x41d   : > { %v3568_v37 = vpop.f32.mrf.mxu1  ;;  %v3605_v51 = vpop.f32.mrf.mxu0  ;;  %6229 = vmatprep.subr.bf16.mxu1 %v8806_v40  ;;  %v3246_v2 = vadd.f32 %v8796_v3, %v10236_v44  ;;  %v8821_v44 = vld [vmem:[%s7657_s13 + $0x420] sm:$0xff]   ;;  %v3345_v43 = vrot.slane %v3327_v39, 1 }
 0x41e   : > { %v3904_v11 = vrot.slane %v3886_v57, 7  ;;  %v3869_v25 = vmul.f32 %v3605_v51, %v8377_v14  ;;  %v3255_v57 = vmul.f32 %v8533_v6, %v8769_v35  ;;  %10237 = vst [vmem:[#allocation18_spill] sm:$0xff] %v8821_v44  ;;  %v8830_v6 = vld [vmem:[%s7657_s13 + $0x458] sm:$0xff]   ;;  %v7108_v39 = vpop.eup %7107 }
 0x41f   : > { %v3569_v38 = vpop.f32.mrf.mxu1  ;;  %v3607_v33 = vpop.f32.mrf.mxu0  ;;  %10238 = vst [vmem:[#allocation15_spill] sm:$0xff] %v8830_v6 }
 0x420   : > { %v3922_v37 = vsub.f32 %v8408_v5, %v3904_v11  ;;  %v3878_v15 = vsub.f32 %v3860_v49, %v3869_v25  ;;  %v3887_v40 = vmul.f32 %v3607_v33, %v8377_v14  ;;  %v3264_v13 = vsub.f32 %v3246_v2, %v3255_v57  ;;  %v8826_v33 = vld [vmem:[%s7657_s13 + $0x3a8] sm:$0xff]  }
 0x421   : > { %v3609_v22 = vpop.f32.mrf.mxu0  ;;  %v3931_v11 = vmul.f32 %v3877_v60, %v3877_v60  ;;  %v3989_v14 = vand.u32 2147483648, %v8697_v27 }
 0x422   : > { %v3940_v52 = vmul.f32 %v3922_v37, %v3922_v37  ;;  %v3905_v51 = vrot.slane %v3887_v40, 7  ;;  %v8834_v40 = vld [vmem:[%s7657_s13 + $0x3e0] sm:$0xff]   ;;  %v3318_v2 = vmul.f32 %v3264_v13, %v3264_v13  ;;  %v3932_v37 = vmul.f32 %v3878_v15, %v3878_v15  ;;  %v8848_v13 = vld [vmem:[%s7657_s13 + $0x450] sm:$0xff]   ;;  %v8852_v15 = vld [vmem:[%s7657_s13 + $0x3d8] sm:$0xff]  }
 0x423   : > { %v3610_v38 = vpop.f32.mrf.mxu0  ;;  %6250 = vmatpush3.bf16.xpose.msra.mxu0 %v8821_v44  ;;  %10240 = vst [vmem:[#allocation50_spill] sm:$0xff] %v8848_v13  ;;  %10241 = vst [vmem:[#allocation51_spill] sm:$0xff] %v8852_v15  ;;  %v8879_v44 = vld [vmem:[%s7657_s13 + $0x408] sm:$0xff]  }
 0x424   : > { %v3958_v49 = vrot.slane %v3940_v52, 1  ;;  %v3923_v25 = vsub.f32 %v8384_v20, %v3905_v51  ;;  %6230 = vmatpush3.bf16.xpose.msra.mxu1 %v8826_v33  ;;  %6251 = vmatprep.subr.bf16.mxu0 %v8830_v6  ;;  %v8837_v57 = vadd.f32 %v3345_v43, %v3318_v2  ;;  %v8840_v38 = vld [vmem:[%s7657_s13 + $0x418] sm:$0xff]   ;;  %v8844_v20 = vld [vmem:[%s7657_s13 + $0x3a0] sm:$0xff]   ;;  %v8866_v43 = vld [vmem:[%s7657_s13 + $0x448] sm:$0xff]   ;;  %10246 = vst [vmem:[#allocation56_spill] sm:$0xff] %v8879_v44 }
 0x425   : > { %6231 = vmatprep.subr.bf16.mxu1 %v8834_v40  ;;  %10239 = vst [vmem:[#allocation49_spill] sm:$0xff] %v8840_v38  ;;  %10244 = vst [vmem:[#allocation54_spill] sm:$0xff] %v8866_v43  ;;  %v8870_v2 = vld [vmem:[%s7657_s13 + $0x3d0] sm:$0xff]  }
 0x426   : > { %v3976_v52 = vadd.f32 %v3958_v49, %v3931_v11  ;;  %v3941_v60 = vmul.f32 %v3923_v25, %v3923_v25  ;;  %v3985_v11 = vmul.f32 %v7108_v39, %v8697_v27  ;;  %v8858_v49 = vld [vmem:[%s7657_s13 + $0x410] sm:$0xff]   ;;  %v8862_v25 = vld [vmem:[%s7657_s13 + $0x398] sm:$0xff]   ;;  %10245 = vst [vmem:[#allocation55_spill] sm:$0xff] %v8870_v2  ;;  %vm3416_vm8 = vcmp.eq.f32.partialorder %v8837_v57, inf }
 0x427   : > { %10242 = vst [vmem:[#allocation52_spill] sm:$0xff] %v8858_v49  ;;  %10243 = vst [vmem:[#allocation53_spill] sm:$0xff] %v8862_v25  ;;  %vm3418_vm9 = vcmp.eq.f32.partialorder %v8837_v57, 0.0 }
 0x428   : > { %7109 = vrsqrt.f32 %v3976_v52  ;;  %v3959_v22 = vrot.slane %v3941_v60, 1  ;;  %vm3993_vm0 = vcmp.eq.f32.partialorder %v3976_v52, inf  ;;  %v3996_v39 = vand.u32 2147483648, %v3976_v52 }
 0x429   : > { %vm3995_vm2 = vcmp.eq.f32.partialorder %v3976_v52, 0.0 }
 0x42a   : > { %v3977_v51 = vadd.f32 %v3959_v22, %v3932_v37  ;;  %v3987_v22 = vsel %vm3986_vm15, %v8697_v27, %v3985_v11  ;;  %v8893_v27 = vld [vmem:[%s7657_s13 + $0x3c8] sm:$0xff]  }
 0x42b   : > { %6252 = vmatpush3.bf16.xpose.msra.mxu0 %v8840_v38  ;;  %v3990_v38 = vsel %vm3988_vm3, %v3989_v14, %v3987_v22  ;;  %10249 = vst [vmem:[#allocation59_spill] sm:$0xff] %v8893_v27 }
 0x42c   : > { %7111 = vrsqrt.f32 %v3977_v51  ;;  %6232 = vmatpush3.bf16.xpose.msra.mxu1 %v8844_v20  ;;  %6253 = vmatprep.subr.bf16.mxu0 %v8848_v13  ;;  %vm4000_vm4 = vcmp.eq.f32.partialorder %v3977_v51, inf  ;;  %v4003_v11 = vand.u32 2147483648, %v3977_v51  ;;  %vm4002_vm7 = vcmp.eq.f32.partialorder %v3977_v51, 0.0 }
 0x42d   : > { %6233 = vmatprep.subr.bf16.mxu1 %v8852_v15  ;;  %7113 = vrsqrt.f32 %v8837_v57 }
 0x433   : > { %6254 = vmatpush3.bf16.xpose.msra.mxu0 %v8858_v49 }
 0x434   : > { %6234 = vmatpush3.bf16.xpose.msra.mxu1 %v8862_v25  ;;  %6255 = vmatprep.subr.bf16.mxu0 %v8866_v43 }
 0x435   : > { %v7110_v60 = vpop.eup %7109  ;;  %6235 = vmatprep.subr.bf16.mxu1 %v8870_v2  ;;  %v8883_v2 = vld [vmem:[%s7657_s13 + $0x390] sm:$0xff]  }
 0x436   : > { %v3992_v37 = vmul.f32 %v7110_v60, %v3976_v52  ;;  %10247 = vst [vmem:[#allocation57_spill] sm:$0xff] %v8883_v2 }
 0x438   : > { %v3994_v5 = vsel %vm3993_vm0, %v3976_v52, %v3992_v37  ;;  %v8887_v52 = vld [vmem:[%s7657_s13 + $0x440] sm:$0xff]  }
 0x439   : > { %v7112_v43 = vpop.eup %7111  ;;  %v3997_v49 = vsel %vm3995_vm2, %v3996_v39, %v3994_v5  ;;  %10248 = vst [vmem:[#allocation58_spill] sm:$0xff] %v8887_v52  ;;  %v10251_v39 = vld [vmem:[#allocation28_spill] sm:$0xff] }
 0x43a   : > { %v7114_v13 = vpop.eup %7113  ;;  %v4048_v6 = vsub.f32 %v3997_v49, %v8440_v59  ;;  %v3999_v60 = vmul.f32 %v7112_v43, %v3977_v51  ;;  %v10250_v43 = vld [vmem:[#allocation22_spill] sm:$0xff] }
 0x43b   : > { %6256 = vmatpush3.bf16.xpose.msra.mxu0 %v8879_v44  ;;  %v3415_v49 = vmul.f32 %v7114_v13, %v8837_v57  ;;  %v4047_v37 = vsub.f32 %v3990_v38, %v10250_v43  ;;  %v3419_v44 = vand.u32 2147483648, %v8837_v57  ;;  %v8910_v38 = vld [vmem:[%s7657_s13 + $0x400] sm:$0xff]  }
 0x43c   : > { %6236 = vmatpush3.bf16.xpose.msra.mxu1 %v8883_v2  ;;  %6257 = vmatprep.subr.bf16.mxu0 %v8887_v52  ;;  %v8890_v5 = vmax.f32 %v4048_v6, 0.0  ;;  %v4001_v14 = vsel %vm4000_vm4, %v3977_v51, %v3999_v60  ;;  %10253 = vst [vmem:[#allocation61_spill] sm:$0xff] %v8910_v38  ;;  %v10260_v43 = vld [vmem:[#allocation11_spill] sm:$0xff] }
 0x43d   : > { %6237 = vmatprep.subr.bf16.mxu1 %v8893_v27  ;;  %v4004_v22 = vsel %vm4002_vm7, %v4003_v11, %v4001_v14  ;;  %v3417_v51 = vsel %vm3416_vm8, %v8837_v57, %v3415_v49  ;;  %v8904_v60 = vmax.f32 %v4047_v37, 0.0  ;;  %v8916_v11 = vld [vmem:[%s7657_s13 + $0x388] sm:$0xff]   ;;  %v8922_v37 = vld [vmem:[%s7657_s13 + $0xf8] sm:$0xff]  }
 0x43e   : > { %v4049_v59 = vsub.f32 %v4004_v22, %v10251_v39  ;;  %v4074_v52 = vrot.slane %v8890_v5, 7  ;;  %10254 = vst [vmem:[#allocation62_spill] sm:$0xff] %v8916_v11  ;;  %v3420_v49 = vsel %vm3418_vm9, %v3419_v44, %v3417_v51  ;;  %10256 = vst [vmem:[#allocation64_spill] sm:$0xff] %v8922_v37  ;;  %v8930_v39 = vld [vmem:[%s7657_s13 + $0x3c0] sm:$0xff]  }
 0x43f   : > { %10257 = vst [vmem:[#allocation65_spill] sm:$0xff] %v8930_v39 }
 0x440   : > { %v8901_v6 = vmax.f32 %v4049_v59, 0.0  ;;  %v4075_v59 = vsel %vm3456_vm12, %v4074_v52, %v8904_v60  ;;  %v1937_v52 = vpop.permute.xlu0 %1936 }
 0x441   : > { %v8937_v44 = vrot.slane %v1937_v52, %v8291_v32  ;;  %v8955_v32 = vld [vmem:[%s7657_s13 + $0x78] sm:$0xff]  }
 0x442   : > { %10252 = vst [vmem:[#allocation60_spill] sm:$0xff] %v8901_v6  ;;  %v4076_v13 = vrot.slane %v8901_v6, 6  ;;  %10259 = vst [vmem:[#allocation67_spill] sm:$0xff] %v8955_v32 }
 0x443   : > { %6258 = vmatpush3.bf16.xpose.msra.mxu0 %v8910_v38 }
 0x444   : > { %6238 = vmatpush3.bf16.xpose.msra.mxu1 %v8916_v11  ;;  %v8919_v14 = vpop.permute.xlu1 %1980  ;;  %6279 = vmatprep.subr.bf16.mxu0 %v8922_v37  ;;  %v8926_v57 = vsel %vm3459_vm13, %v4076_v13, %v4075_v59  ;;  %v8962_v37 = vpack.c.bf16 %v8904_v60, %v8904_v60  ;;  %v8987_v11 = vld [vmem:[%s7657_s13 + $0x68] sm:$0xff]  }
 0x445   : > { %10255 = vst [vmem:[#allocation63_spill] sm:$0xff] %v8919_v14  ;;  %v3435_v22 = vsub.f32 %v3420_v49, %v8919_v14  ;;  %6239 = vmatprep.subr.bf16.mxu1 %v8930_v39  ;;  %v8950_v49 = vld [vmem:[%s7657_s13 + $0x380] sm:$0xff]   ;;  %v8983_v39 = vld [vmem:[%s7657_s13 + $0x30] sm:$0xff]   ;;  %10265 = vst [vmem:[#allocation69_spill] sm:$0xff] %v8987_v11 }
 0x446   : > { %10258 = vst [vmem:[#allocation66_spill] sm:$0xff] %v8950_v49 }
 0x447   : > { %v8934_v38 = vmax.f32 %v3435_v22, 0.0  ;;  %v3274_v22 = vmul.f32 %v8618_v28, %v8937_v44 }
 0x449   : > { %v3473_v51 = vrot.slane %v8934_v38, 1  ;;  %v3487_v13 = vpack.c.bf16 %v8934_v38, %v8934_v38  ;;  %v3292_v52 = vrot.slane %v3274_v22, 7  ;;  %v10263_v22 = vld [vmem:[#allocation21_spill] sm:$0xff] }
 0x44a   : > { %10264 = vst [vmem:[#allocation21_spill] sm:$0xff] %v8983_v39 }
 0x44b   : > { %6241 = vmatprep.mubr.bf16.mxu1 %v3487_v13  ;;  %v3475_v59 = vsel %vm3474_vm10, %v3473_v51, %v8778_v0  ;;  %v8966_v0 = vmul.f32 %v8937_v44, %v10260_v43  ;;  %v8969_v51 = vld [vmem:[%s7657_s13 + $0x38] sm:$0xff]   ;;  %v3256_v43 = vmul.f32 %v8615_v41, %v8937_v44 }
 0x44c   : > { %6240 = vmatpush3.bf16.xpose.msra.mxu1 %v8950_v49  ;;  %3478 = vst [vmem:[%s8945_s18] sm:$0xff] %v3475_v59  ;;  %10261 = vst [vmem:[#allocation11_spill] sm:$0xff] %v8969_v51  ;;  %v8974_v59 = vld [vmem:[%s7657_s13 + $0x70] sm:$0xff]  }
 0x44d   : > { %6261 = vmatprep.subr.bf16.mxu1 %v8955_v32  ;;  %10262 = vst [vmem:[#allocation68_spill] sm:$0xff] %v8974_v59  ;;  %v3310_v28 = vsub.f32 %v8966_v0, %v3292_v52  ;;  %v3247_v32 = vadd.f32 %v8966_v0, %v10263_v22 }
 0x44f   : > { %v3328_v49 = vmul.f32 %v3310_v28, %v3310_v28 }
 0x451   : > { %v3346_v52 = vrot.slane %v3328_v49, 1  ;;  %v8996_v49 = vld [vmem:[%s7657_s13 + $0x28] sm:$0xff]  }
 0x453   : > { %6242 = vmatmul.mubr.bf16.vlgmr.msra.gmra.mxu1 %v3487_v13  ;;  %v3265_v13 = vsub.f32 %v3247_v32, %v3256_v43 }
 0x454   : > { %6262 = vmatpush3.bf16.xpose.msra.mxu1 %v8969_v51  ;;  %6277 = vmatprep.mubr.bf16.mxu1 %v8962_v37 }
 0x455   : > { %6263 = vmatprep.subr.bf16.mxu1 %v8974_v59  ;;  %v10266_v59 = vld [vmem:[#allocation34_spill] sm:$0xff]  ;;  %v3319_v28 = vmul.f32 %v3265_v13, %v3265_v13 }
 0x456   : > { %v3862_v22 = vadd.f32 %v8579_v8, %v10266_v59  ;;  %v9000_v8 = vld [vmem:[%s7657_s13 + $0x60] sm:$0xff]  }
 0x457   : > { %v3364_v2 = vadd.f32 %v3346_v52, %v3319_v28 }
 0x459   : > { %7115 = vrsqrt.f32 %v3364_v2  ;;  %vm3423_vm15 = vcmp.eq.f32.partialorder %v3364_v2, inf  ;;  %vm3425_vm0 = vcmp.eq.f32.partialorder %v3364_v2, 0.0 }
 0x45c   : > { %6264 = vmatpush3.bf16.xpose.msra.mxu1 %v8983_v39 }
 0x45d   : > { %v3687_v51 = vpop.f32.mrf.mxu0  ;;  %6265 = vmatprep.subr.bf16.mxu1 %v8987_v11 }
 0x45e   : > { %v3871_v27 = vmul.f32 %v3687_v51, %v8483_v16 }
 0x45f   : > { %v3689_v41 = vpop.f32.mrf.mxu0 }
 0x460   : > { %v3880_v32 = vsub.f32 %v3862_v22, %v3871_v27  ;;  %v3889_v43 = vmul.f32 %v3689_v41, %v8483_v16  ;;  %v9014_v22 = vld [vmem:[%s7657_s13 + $0x18] sm:$0xff]   ;;  %v9060_v16 = vld [vmem:[%s7657_s13] sm:$0xff]  }
 0x461   : > { %v3691_v39 = vpop.f32.mrf.mxu0  ;;  %10269 = vst [vmem:[#allocation72_spill] sm:$0xff] %v9014_v22  ;;  %10275 = vst [vmem:[#allocation78_spill] sm:$0xff] %v9060_v16 }
 0x462   : > { %v3907_v25 = vrot.slane %v3889_v43, 7  ;;  %v3934_v51 = vmul.f32 %v3880_v32, %v3880_v32  ;;  %v3426_v32 = vand.u32 2147483648, %v3364_v2  ;;  %v9022_v43 = vld [vmem:[%s7657_s13 + $0x10] sm:$0xff]  }
 0x463   : > { %v3692_v15 = vpop.f32.mrf.mxu0  ;;  %10271 = vst [vmem:[#allocation74_spill] sm:$0xff] %v9022_v43 }
 0x464   : > { %v3925_v11 = vsub.f32 %v10266_v59, %v3907_v25  ;;  %6266 = vmatpush3.bf16.xpose.msra.mxu1 %v8996_v49  ;;  %v9006_v15 = vld [vmem:[%s7657_s13 + $0x20] sm:$0xff]   ;;  %v9010_v25 = vld [vmem:[%s7657_s13 + $0x58] sm:$0xff]   ;;  %v9029_v59 = vld [vmem:[%s7657_s13 + $0x48] sm:$0xff]  }
 0x465   : > { %6267 = vmatprep.subr.bf16.mxu1 %v9000_v8  ;;  %10267 = vst [vmem:[#allocation70_spill] sm:$0xff] %v9006_v15  ;;  %10268 = vst [vmem:[#allocation71_spill] sm:$0xff] %v9010_v25 }
 0x466   : > { %v3943_v27 = vmul.f32 %v3925_v11, %v3925_v11  ;;  %v7116_v52 = vpop.eup %7115  ;;  %v9018_v11 = vld [vmem:[%s7657_s13 + $0x50] sm:$0xff]   ;;  %10272 = vst [vmem:[#allocation75_spill] sm:$0xff] %v9029_v59 }
 0x467   : > { %10270 = vst [vmem:[#allocation73_spill] sm:$0xff] %v9018_v11  ;;  %v3422_v41 = vmul.f32 %v7116_v52, %v3364_v2 }
 0x468   : > { %v3961_v39 = vrot.slane %v3943_v27, 1 }
 0x469   : > { %v3424_v28 = vsel %vm3423_vm15, %v3364_v2, %v3422_v41  ;;  %v9040_v41 = vpack.c.bf16 %v8890_v5, %v8890_v5 }
 0x46a   : > { %v9003_v13 = vadd.f32 %v3961_v39, %v3934_v51  ;;  %v3427_v27 = vsel %vm3425_vm0, %v3426_v32, %v3424_v28  ;;  %v9043_v28 = vld [vmem:[%s7657_s13 + $0x8] sm:$0xff]   ;;  %v9047_v32 = vld [vmem:[%s7657_s13 + $0xb8] sm:$0xff]  }
 0x46b   : > { %10273 = vst [vmem:[#allocation76_spill] sm:$0xff] %v9043_v28 }
 0x46c   : > { %6268 = vmatpush3.bf16.xpose.msra.mxu1 %v9006_v15  ;;  %7117 = vrsqrt.f32 %v9003_v13  ;;  %vm4014_vm2 = vcmp.eq.f32.partialorder %v9003_v13, inf  ;;  %vm4016_vm3 = vcmp.eq.f32.partialorder %v9003_v13, 0.0 }
 0x46d   : > { %6269 = vmatprep.subr.bf16.mxu1 %v9010_v25 }
 0x474   : > { %6270 = vmatpush3.bf16.xpose.msra.mxu1 %v9014_v22  ;;  %v9090_v22 = vld [vmem:[%s7657_s13 + $0x170] sm:$0xff]  }
 0x475   : > { %6271 = vmatprep.subr.bf16.mxu1 %v9018_v11  ;;  %v9086_v11 = vld [vmem:[%s7657_s13 + $0xa8] sm:$0xff]   ;;  %10281 = vst [vmem:[#allocation84_spill] sm:$0xff] %v9090_v22 }
 0x476   : > { %10280 = vst [vmem:[#allocation83_spill] sm:$0xff] %v9086_v11 }
 0x47c   : > { %6272 = vmatpush3.bf16.xpose.msra.mxu1 %v9022_v43  ;;  %v9025_v51 = vpop.permute.xlu0 %1985  ;;  %v9081_v43 = vld [vmem:[%s7657_s13 + $0x138] sm:$0xff]  }
 0x47d   : > { %v3436_v39 = vsub.f32 %v3427_v27, %v9025_v51  ;;  %6273 = vmatprep.subr.bf16.mxu1 %v9029_v59  ;;  %v9052_v27 = vld [vmem:[%s7657_s13 + $0x40] sm:$0xff]   ;;  %v9077_v59 = vpack.c.bf16 %v8901_v6, %v8901_v6  ;;  %10279 = vst [vmem:[#allocation82_spill] sm:$0xff] %v9081_v43 }
 0x47e   : > { %10274 = vst [vmem:[#allocation77_spill] sm:$0xff] %v9052_v27 }
 0x47f   : > { %v9032_v52 = vmax.f32 %v3436_v39, 0.0  ;;  %v9056_v39 = vld [vmem:[%s7657_s13 + $0xf0] sm:$0xff]  }
 0x481   : > { %3479 = vst [vmem:[%s8945_s18 + $0x8] sm:$0x1] %v9032_v52  ;;  %v3488_v2 = vpack.c.bf16 %v9032_v52, %v9032_v52 }
 0x483   : > { %6259 = vmatprep.mubr.bf16.mxu0 %v3488_v2 }
 0x484   : > { %6274 = vmatpush3.bf16.xpose.msra.mxu1 %v9043_v28  ;;  %6260 = vmatmul.mubr.bf16.vlgmr.msra.gmra.mxu0 %v3488_v2  ;;  %v9064_v2 = vld [vmem:[%s7657_s13 + $0xb0] sm:$0xff]   ;;  %v9068_v28 = vld [vmem:[%s7657_s13 + $0x178] sm:$0xff]  }
 0x485   : > { %6280 = vmatpush3.bf16.xpose.msra.mxu0 %v9047_v32  ;;  %6295 = vmatprep.mubr.bf16.mxu0 %v9040_v41  ;;  %10276 = vst [vmem:[#allocation79_spill] sm:$0xff] %v9064_v2  ;;  %10277 = vst [vmem:[#allocation80_spill] sm:$0xff] %v9068_v28 }
 0x486   : > { %6275 = vmatprep.subr.bf16.mxu1 %v9052_v27  ;;  %6281 = vmatprep.subr.bf16.mxu0 %v9056_v39  ;;  %v9072_v27 = vld [vmem:[%s7657_s13 + $0xe8] sm:$0xff]  }
 0x487   : > { %10278 = vst [vmem:[#allocation81_spill] sm:$0xff] %v9072_v27 }
 0x48c   : > { %6276 = vmatpush3.bf16.xpose.msra.mxu1 %v9060_v16 }
 0x48d   : > { %6282 = vmatpush3.bf16.xpose.msra.mxu0 %v9064_v2  ;;  %6297 = vmatprep.subr.bf16.mxu1 %v9068_v28 }
 0x48e   : > { %6283 = vmatprep.subr.bf16.mxu0 %v9072_v27  ;;  %v9096_v27 = vld [vmem:[%s7657_s13 + $0xe0] sm:$0xff]  }
 0x493   : > { %6278 = vmatmul.mubr.bf16.vlgmr.msra.gmra.mxu1 %v8962_v37  ;;  %v3646_v16 = vpop.f32.mrf.mxu1 }
 0x494   : > { %6298 = vmatpush3.bf16.xpose.msra.mxu1 %v9081_v43  ;;  %6313 = vmatprep.mubr.bf16.mxu1 %v9077_v59  ;;  %v3870_v37 = vmul.f32 %v3646_v16, %v8596_v48 }
 0x495   : > { %6284 = vmatpush3.bf16.xpose.msra.mxu0 %v9086_v11  ;;  %v3648_v28 = vpop.f32.mrf.mxu1  ;;  %6299 = vmatprep.subr.bf16.mxu1 %v9090_v22  ;;  %v3861_v11 = vadd.f32 %v8629_v50, %v8604_v26 }
 0x496   : > { %v3888_v25 = vmul.f32 %v3648_v28, %v8596_v48  ;;  %6285 = vmatprep.subr.bf16.mxu0 %v9096_v27  ;;  %v9104_v28 = vld [vmem:[%s7657_s13 + $0x130] sm:$0xff]   ;;  %v9108_v48 = vld [vmem:[%s7657_s13 + $0xa0] sm:$0xff]  }
 0x497   : > { %v3650_v43 = vpop.f32.mrf.mxu1  ;;  %v3879_v6 = vsub.f32 %v3861_v11, %v3870_v37  ;;  %10282 = vst [vmem:[#allocation85_spill] sm:$0xff] %v9104_v28  ;;  %v9116_v11 = vld [vmem:[%s7657_s13 + $0xd8] sm:$0xff]   ;;  %v9120_v37 = vld [vmem:[%s7657_s13 + $0x128] sm:$0xff]  }
 0x498   : > { %v3906_v15 = vrot.slane %v3888_v25, 7  ;;  %v9112_v43 = vld [vmem:[%s7657_s13 + $0x168] sm:$0xff]   ;;  %10284 = vst [vmem:[#allocation87_spill] sm:$0xff] %v9116_v11  ;;  %10285 = vst [vmem:[#allocation88_spill] sm:$0xff] %v9120_v37 }
 0x499   : > { %v3651_v2 = vpop.f32.mrf.mxu1  ;;  %10283 = vst [vmem:[#allocation86_spill] sm:$0xff] %v9112_v43  ;;  %v3933_v50 = vmul.f32 %v3879_v6, %v3879_v6  ;;  %v9128_v6 = vld [vmem:[%s7657_s13 + $0x160] sm:$0xff]  }
 0x49a   : > { %v3924_v16 = vsub.f32 %v8604_v26, %v3906_v15  ;;  %v7118_v2 = vpop.eup %7117  ;;  %10287 = vst [vmem:[#allocation90_spill] sm:$0xff] %v9128_v6 }
 0x49c   : > { %v3942_v22 = vmul.f32 %v3924_v16, %v3924_v16  ;;  %6300 = vmatpush3.bf16.xpose.msra.mxu1 %v9104_v28  ;;  %v9124_v16 = vld [vmem:[%s7657_s13 + $0x98] sm:$0xff]   ;;  %v9144_v28 = vld [vmem:[%s7657_s13 + $0x90] sm:$0xff]  }
 0x49d   : > { %6286 = vmatpush3.bf16.xpose.msra.mxu0 %v9108_v48  ;;  %6301 = vmatprep.subr.bf16.mxu1 %v9112_v43  ;;  %10286 = vst [vmem:[#allocation89_spill] sm:$0xff] %v9124_v16  ;;  %v4017_v43 = vand.u32 2147483648, %v9003_v13  ;;  %10290 = vst [vmem:[#allocation93_spill] sm:$0xff] %v9144_v28 }
 0x49e   : > { %v3960_v25 = vrot.slane %v3942_v22, 1  ;;  %6287 = vmatprep.subr.bf16.mxu0 %v9116_v11  ;;  %v9132_v22 = vld [vmem:[%s7657_s13 + $0xd0] sm:$0xff]  }
 0x49f   : > { %10288 = vst [vmem:[#allocation91_spill] sm:$0xff] %v9132_v22 }
 0x4a0   : > { %v3978_v15 = vadd.f32 %v3960_v25, %v3933_v50  ;;  %v4013_v50 = vmul.f32 %v7118_v2, %v9003_v13  ;;  %v9153_v2 = vld [vmem:[%s7657_s13 + $0xc8] sm:$0xff]  }
 0x4a1   : > { %10292 = vst [vmem:[#allocation95_spill] sm:$0xff] %v9153_v2 }
 0x4a2   : > { %7119 = vrsqrt.f32 %v3978_v15  ;;  %v4015_v25 = vsel %vm4014_vm2, %v9003_v13, %v4013_v50  ;;  %vm4007_vm4 = vcmp.eq.f32.partialorder %v3978_v15, inf  ;;  %vm4009_vm7 = vcmp.eq.f32.partialorder %v3978_v15, 0.0 }
 0x4a3   : > { %v4018_v50 = vsel %vm4016_vm3, %v4017_v43, %v4015_v25  ;;  %v9167_v43 = vld [vmem:[%s7657_s13 + $0x150] sm:$0xff]  }
 0x4a4   : > { %6302 = vmatpush3.bf16.xpose.msra.mxu1 %v9120_v37  ;;  %v9139_v37 = vld [vmem:[%s7657_s13 + $0x120] sm:$0xff]   ;;  %10294 = vst [vmem:[#allocation97_spill] sm:$0xff] %v9167_v43 }
 0x4a5   : > { %6288 = vmatpush3.bf16.xpose.msra.mxu0 %v9124_v16  ;;  %6303 = vmatprep.subr.bf16.mxu1 %v9128_v6  ;;  %10289 = vst [vmem:[#allocation92_spill] sm:$0xff] %v9139_v37  ;;  %v9148_v6 = vld [vmem:[%s7657_s13 + $0x158] sm:$0xff]  }
 0x4a6   : > { %6289 = vmatprep.subr.bf16.mxu0 %v9132_v22  ;;  %10291 = vst [vmem:[#allocation94_spill] sm:$0xff] %v9148_v6  ;;  %v4010_v22 = vand.u32 2147483648, %v3978_v15 }
 0x4ac   : > { %6304 = vmatpush3.bf16.xpose.msra.mxu1 %v9139_v37 }
 0x4ad   : > { %6290 = vmatpush3.bf16.xpose.msra.mxu0 %v9144_v28  ;;  %6305 = vmatprep.subr.bf16.mxu1 %v9148_v6  ;;  %v4051_v28 = vsub.f32 %v4018_v50, %v8572_v55  ;;  %v9158_v6 = vld [vmem:[%s7657_s13 + $0x118] sm:$0xff]   ;;  %v9190_v50 = vld [vmem:[%s7657_s13 + $0x80] sm:$0xff]  }
 0x4ae   : > { %6291 = vmatprep.subr.bf16.mxu0 %v9153_v2  ;;  %10293 = vst [vmem:[#allocation96_spill] sm:$0xff] %v9158_v6  ;;  %v9163_v2 = vld [vmem:[%s7657_s13 + $0x88] sm:$0xff]   ;;  %10297 = vst [vmem:[#allocation100_spill] sm:$0xff] %v9190_v50  ;;  %v9198_v55 = vld [vmem:[%s7657_s13 + $0x1f8] sm:$0xff]  }
 0x4af   : > { %v7120_v37 = vpop.eup %7119  ;;  %10299 = vst [vmem:[#allocation102_spill] sm:$0xff] %v9198_v55 }
 0x4b0   : > { %v4006_v26 = vmul.f32 %v7120_v37, %v3978_v15 }
 0x4b2   : > { %v4008_v16 = vsel %vm4007_vm4, %v3978_v15, %v4006_v26  ;;  %v9170_v26 = vmax.f32 %v4051_v28, 0.0  ;;  %v9173_v15 = vld [vmem:[%s7657_s13 + $0xc0] sm:$0xff]   ;;  %v9186_v28 = vld [vmem:[%s7657_s13 + $0x110] sm:$0xff]  }
 0x4b3   : > { %v4011_v11 = vsel %vm4009_vm7, %v4010_v22, %v4008_v16  ;;  %10296 = vst [vmem:[#allocation99_spill] sm:$0xff] %v9186_v28 }
 0x4b4   : > { %6306 = vmatpush3.bf16.xpose.msra.mxu1 %v9158_v6  ;;  %v4050_v13 = vsub.f32 %v4011_v11, %v8626_v45  ;;  %v4080_v16 = vrot.slane %v9170_v26, 4  ;;  %v9225_v6 = vld [vmem:[%s7657_s13 + $0x278] sm:$0xff]  }
 0x4b5   : > { %6292 = vmatpush3.bf16.xpose.msra.mxu0 %v9163_v2  ;;  %6307 = vmatprep.subr.bf16.mxu1 %v9167_v43  ;;  %v9218_v43 = vld [vmem:[%s7657_s13 + $0x100] sm:$0xff]  }
 0x4b6   : > { %6293 = vmatprep.subr.bf16.mxu0 %v9173_v15  ;;  %v9176_v37 = vmax.f32 %v4050_v13, 0.0  ;;  %v9194_v13 = vld [vmem:[%s7657_s13 + $0x148] sm:$0xff]  }
 0x4b7   : > { %10298 = vst [vmem:[#allocation101_spill] sm:$0xff] %v9194_v13 }
 0x4b8   : > { %10295 = vst [vmem:[#allocation98_spill] sm:$0xff] %v9176_v37  ;;  %v4078_v11 = vrot.slane %v9176_v37, 5 }
 0x4ba   : > { %v4079_v22 = vsel %vm3462_vm5, %v4078_v11, %v8926_v57  ;;  %v9203_v57 = vpack.c.bf16 %v9176_v37, %v9176_v37  ;;  %v9207_v11 = vld [vmem:[%s7657_s13 + $0x108] sm:$0xff]  }
 0x4bb   : > { %v9183_v25 = vsel %vm3465_vm6, %v4080_v16, %v4079_v22  ;;  %10300 = vst [vmem:[#allocation103_spill] sm:$0xff] %v9207_v11  ;;  %v10301_v16 = vld [vmem:[#allocation29_spill] sm:$0xff]  ;;  %v9213_v22 = vld [vmem:[%s7657_s13 + $0x140] sm:$0xff]  }
 0x4bc   : > { %6308 = vmatpush3.bf16.xpose.msra.mxu1 %v9186_v28  ;;  %10302 = vst [vmem:[#allocation29_spill] sm:$0xff] %v9213_v22 }
 0x4bd   : > { %6294 = vmatpush3.bf16.xpose.msra.mxu0 %v9190_v50  ;;  %6309 = vmatprep.subr.bf16.mxu1 %v9194_v13  ;;  %v10303_v13 = vld [vmem:[#allocation30_spill] sm:$0xff] }
 0x4be   : > { %6315 = vmatprep.subr.bf16.mxu0 %v9198_v55  ;;  %10304 = vst [vmem:[#allocation30_spill] sm:$0xff] %v9218_v43  ;;  %v10307_v55 = vld [vmem:[#allocation33_spill] sm:$0xff] }
 0x4c4   : > { %6296 = vmatmul.mubr.bf16.vlgmr.msra.gmra.mxu0 %v9040_v41  ;;  %6310 = vmatpush3.bf16.xpose.msra.mxu1 %v9207_v11 }
 0x4c5   : > { %6316 = vmatpush3.bf16.xpose.msra.mxu0 %v10301_v16  ;;  %6331 = vmatprep.mubr.bf16.mxu0 %v9203_v57  ;;  %v10305_v16 = vld [vmem:[#allocation32_spill] sm:$0xff] }
 0x4c6   : > { %6311 = vmatprep.subr.bf16.mxu1 %v9213_v22  ;;  %6317 = vmatprep.subr.bf16.mxu0 %v10303_v13  ;;  %10306 = vst [vmem:[#allocation32_spill] sm:$0xff] %v9225_v6  ;;  %v3864_v13 = vadd.f32 %v8735_v1, %v8662_v29 }
 0x4ca   : > { %v3769_v28 = vpop.f32.mrf.mxu0 }
 0x4cb   : > { %v3873_v45 = vmul.f32 %v3769_v28, %v8635_v18 }
 0x4cc   : > { %6312 = vmatpush3.bf16.xpose.msra.mxu1 %v9218_v43  ;;  %v3771_v41 = vpop.f32.mrf.mxu0 }
 0x4cd   : > { %v3891_v11 = vmul.f32 %v3771_v41, %v8635_v18  ;;  %6318 = vmatpush3.bf16.xpose.msra.mxu0 %v10305_v16  ;;  %6333 = vmatprep.subr.bf16.mxu1 %v9225_v6  ;;  %v3882_v37 = vsub.f32 %v3864_v13, %v3873_v45  ;;  %v9234_v41 = vpack.c.bf16 %v9170_v26, %v9170_v26  ;;  %v9254_v6 = vld [vmem:[%s7657_s13 + $0x230] sm:$0xff]  }
 0x4ce   : > { %v3773_v22 = vpop.f32.mrf.mxu0  ;;  %6319 = vmatprep.subr.bf16.mxu0 %v10307_v55 }
 0x4cf   : > { %v3909_v43 = vrot.slane %v3891_v11, 7  ;;  %v9238_v22 = vld [vmem:[%s7657_s13 + $0x238] sm:$0xff]   ;;  %v3936_v55 = vmul.f32 %v3882_v37, %v3882_v37  ;;  %v3863_v37 = vadd.f32 %v8762_v34, %v8686_v19 }
 0x4d0   : > { %v3774_v50 = vpop.f32.mrf.mxu0  ;;  %10308 = vst [vmem:[#allocation33_spill] sm:$0xff] %v9238_v22 }
 0x4d1   : > { %v3927_v28 = vsub.f32 %v8662_v29, %v3909_v43  ;;  %v10309_v50 = vld [vmem:[#allocation35_spill] sm:$0xff]  ;;  %v9244_v43 = vld [vmem:[%s7657_s13 + $0x270] sm:$0xff]  }
 0x4d2   : > { %10310 = vst [vmem:[#allocation35_spill] sm:$0xff] %v9244_v43 }
 0x4d3   : > { %v3945_v16 = vmul.f32 %v3927_v28, %v3927_v28  ;;  %6314 = vmatmul.mubr.bf16.vlgmr.msra.gmra.mxu1 %v9077_v59  ;;  %v3728_v18 = vpop.f32.mrf.mxu1 }
 0x4d4   : > { %6334 = vmatpush3.bf16.xpose.msra.mxu1 %v9238_v22  ;;  %6349 = vmatprep.mubr.bf16.mxu1 %v9234_v41  ;;  %v3872_v59 = vmul.f32 %v3728_v18, %v8658_v56 }
 0x4d5   : > { %v3963_v1 = vrot.slane %v3945_v16, 1  ;;  %6320 = vmatpush3.bf16.xpose.msra.mxu0 %v10309_v50  ;;  %v3730_v45 = vpop.f32.mrf.mxu1  ;;  %6335 = vmatprep.subr.bf16.mxu1 %v9244_v43 }
 0x4d6   : > { %v3890_v11 = vmul.f32 %v3730_v45, %v8658_v56  ;;  %6321 = vmatprep.subr.bf16.mxu0 %v8511_v9  ;;  %v3881_v29 = vsub.f32 %v3863_v37, %v3872_v59  ;;  %v9259_v9 = vld [vmem:[%s7657_s13 + $0x268] sm:$0xff]   ;;  %v9269_v45 = vld [vmem:[%s7657_s13 + $0x260] sm:$0xff]   ;;  %v9279_v59 = vld [vmem:[%s7657_s13 + $0x258] sm:$0xff]  }
 0x4d7   : > { %v3981_v13 = vadd.f32 %v3963_v1, %v3936_v55  ;;  %v3732_v28 = vpop.f32.mrf.mxu1  ;;  %v9264_v1 = vld [vmem:[%s7657_s13 + $0x228] sm:$0xff]  }
 0x4d8   : > { %v3908_v16 = vrot.slane %v3890_v11, 7  ;;  %v3935_v18 = vmul.f32 %v3881_v29, %v3881_v29 }
 0x4d9   : > { %7121 = vrsqrt.f32 %v3981_v13  ;;  %v3733_v50 = vpop.f32.mrf.mxu1  ;;  %vm4028_vm8 = vcmp.eq.f32.partialorder %v3981_v13, inf  ;;  %vm4030_vm9 = vcmp.eq.f32.partialorder %v3981_v13, 0.0 }
 0x4da   : > { %v3926_v43 = vsub.f32 %v8686_v19, %v3908_v16 }
 0x4dc   : > { %v3944_v22 = vmul.f32 %v3926_v43, %v3926_v43  ;;  %6336 = vmatpush3.bf16.xpose.msra.mxu1 %v9254_v6  ;;  %v4031_v43 = vand.u32 2147483648, %v3981_v13 }
 0x4dd   : > { %6322 = vmatpush3.bf16.xpose.msra.mxu0 %v8520_v21  ;;  %6337 = vmatprep.subr.bf16.mxu1 %v9259_v9 }
 0x4de   : > { %v3962_v34 = vrot.slane %v3944_v22, 1  ;;  %6323 = vmatprep.subr.bf16.mxu0 %v8524_v58  ;;  %v9274_v58 = vld [vmem:[%s7657_s13 + $0x220] sm:$0xff]  }
 0x4e0   : > { %v3980_v55 = vadd.f32 %v3962_v34, %v3935_v18  ;;  %v10311_v34 = vld [vmem:[#allocation36_spill] sm:$0xff] }
 0x4e2   : > { %7123 = vrsqrt.f32 %v3980_v55  ;;  %vm4021_vm15 = vcmp.eq.f32.partialorder %v3980_v55, inf  ;;  %v4024_v28 = vand.u32 2147483648, %v3980_v55  ;;  %vm4023_vm0 = vcmp.eq.f32.partialorder %v3980_v55, 0.0 }
 0x4e4   : > { %6338 = vmatpush3.bf16.xpose.msra.mxu1 %v9264_v1 }
 0x4e5   : > { %6324 = vmatpush3.bf16.xpose.msra.mxu0 %v8536_v23  ;;  %6339 = vmatprep.subr.bf16.mxu1 %v9269_v45 }
 0x4e6   : > { %v7122_v21 = vpop.eup %7121  ;;  %6325 = vmatprep.subr.bf16.mxu0 %v8542_v46 }
 0x4e7   : > { %v4027_v29 = vmul.f32 %v7122_v21, %v3981_v13 }
 0x4e9   : > { %v4029_v22 = vsel %vm4028_vm8, %v3981_v13, %v4027_v29 }
 0x4ea   : > { %v4032_v23 = vsel %vm4030_vm9, %v4031_v43, %v4029_v22  ;;  %v9307_v43 = vld [vmem:[%s7657_s13 + $0x210] sm:$0xff]  }
 0x4eb   : > { %v4053_v37 = vsub.f32 %v4032_v23, %v8728_v62  ;;  %v9312_v23 = vld [vmem:[%s7657_s13 + $0x248] sm:$0xff]  }
 0x4ec   : > { %6340 = vmatpush3.bf16.xpose.msra.mxu1 %v9274_v58 }
 0x4ed   : > { %6326 = vmatpush3.bf16.xpose.msra.mxu0 %v8548_v12  ;;  %6341 = vmatprep.subr.bf16.mxu1 %v9279_v59  ;;  %v9285_v12 = vld [vmem:[%s7657_s13 + $0x218] sm:$0xff]   ;;  %v9294_v18 = vmax.f32 %v4053_v37, 0.0 }
 0x4ee   : > { %6327 = vmatprep.subr.bf16.mxu0 %v8552_v63  ;;  %v9291_v63 = vld [vmem:[%s7657_s13 + $0x250] sm:$0xff]  }
 0x4ef   : > { %v7124_v46 = vpop.eup %7123  ;;  %v4084_v29 = vrot.slane %v9294_v18, 2 }
 0x4f0   : > { %v4020_v11 = vmul.f32 %v7124_v46, %v3980_v55  ;;  %v9322_v46 = vld [vmem:[%s7657_s13 + $0x208] sm:$0xff]  }
 0x4f2   : > { %v4022_v16 = vsel %vm4021_vm15, %v3980_v55, %v4020_v11 }
 0x4f3   : > { %v4025_v50 = vsel %vm4023_vm0, %v4024_v28, %v4022_v16  ;;  %v9354_v28 = vld [vmem:[%s7657_s13 + $0x370] sm:$0xff]   ;;  %v3865_v16 = vadd.f32 %v8934_v38, %v8796_v3 }
 0x4f4   : > { %6342 = vmatpush3.bf16.xpose.msra.mxu1 %v9285_v12  ;;  %v4052_v13 = vsub.f32 %v4025_v50, %v8743_v30 }
 0x4f5   : > { %6328 = vmatpush3.bf16.xpose.msra.mxu0 %v8562_v4  ;;  %6343 = vmatprep.subr.bf16.mxu1 %v9291_v63 }
 0x4f6   : > { %6329 = vmatprep.subr.bf16.mxu0 %v10311_v34  ;;  %v9297_v55 = vmax.f32 %v4052_v13, 0.0 }
 0x4f8   : > { %v4082_v21 = vrot.slane %v9297_v55, 3 }
 0x4fa   : > { %v4083_v22 = vsel %vm3468_vm11, %v4082_v21, %v9183_v25  ;;  %v9318_v25 = vpack.c.bf16 %v9297_v55, %v9297_v55 }
 0x4fb   : > { %v9304_v4 = vsel %vm3471_vm14, %v4084_v29, %v4083_v22  ;;  %v9364_v29 = vld [vmem:[%s7657_s13 + $0x330] sm:$0xff]  }
 0x4fc   : > { %6344 = vmatpush3.bf16.xpose.msra.mxu1 %v9307_v43 }
 0x4fd   : > { %6330 = vmatpush3.bf16.xpose.msra.mxu0 %v8582_v61  ;;  %6345 = vmatprep.subr.bf16.mxu1 %v9312_v23  ;;  %v9328_v61 = vld [vmem:[%s7657_s13 + $0x240] sm:$0xff]  }
 0x4fe   : > { %6351 = vmatprep.subr.bf16.mxu0 %v8586_v54  ;;  %v9333_v54 = vld [vmem:[%s7657_s13 + $0x200] sm:$0xff]  }
 0x504   : > { %6332 = vmatmul.mubr.bf16.vlgmr.msra.gmra.mxu0 %v9203_v57  ;;  %6346 = vmatpush3.bf16.xpose.msra.mxu1 %v9322_v46  ;;  %v9338_v57 = vld [vmem:[%s7657_s13 + $0x378] sm:$0xff]  }
 0x505   : > { %6352 = vmatpush3.bf16.xpose.msra.mxu0 %v8648_v47  ;;  %6367 = vmatprep.mubr.bf16.mxu0 %v9318_v25  ;;  %v9344_v47 = vpack.c.bf16 %v9294_v18, %v9294_v18 }
 0x506   : > { %6347 = vmatprep.subr.bf16.mxu1 %v9328_v61  ;;  %6353 = vmatprep.subr.bf16.mxu0 %v8652_v7  ;;  %v9348_v7 = vld [vmem:[%s7657_s13 + $0x338] sm:$0xff]  }
 0x50c   : > { %6348 = vmatpush3.bf16.xpose.msra.mxu1 %v9333_v54 }
 0x50d   : > { %6354 = vmatpush3.bf16.xpose.msra.mxu0 %v8668_v31  ;;  %6369 = vmatprep.subr.bf16.mxu1 %v9338_v57 }
 0x50e   : > { %6355 = vmatprep.subr.bf16.mxu0 %v8674_v17 }
 0x513   : > { %v3810_v11 = vpop.f32.mrf.mxu1  ;;  %6350 = vmatmul.mubr.bf16.vlgmr.msra.gmra.mxu1 %v9234_v41 }
 0x514   : > { %6370 = vmatpush3.bf16.xpose.msra.mxu1 %v9348_v7  ;;  %6385 = vmatprep.mubr.bf16.mxu1 %v9344_v47  ;;  %v3874_v17 = vmul.f32 %v3810_v11, %v8769_v35 }
 0x515   : > { %v3812_v31 = vpop.f32.mrf.mxu1  ;;  %6356 = vmatpush3.bf16.xpose.msra.mxu0 %v8689_v10  ;;  %6371 = vmatprep.subr.bf16.mxu1 %v9354_v28 }
 0x516   : > { %v3892_v37 = vmul.f32 %v3812_v31, %v8769_v35  ;;  %6357 = vmatprep.subr.bf16.mxu0 %v8694_v24  ;;  %v3883_v34 = vsub.f32 %v3865_v16, %v3874_v17  ;;  %v9369_v24 = vld [vmem:[%s7657_s13 + $0x368] sm:$0xff]   ;;  %v9379_v17 = vld [vmem:[%s7657_s13 + $0x360] sm:$0xff]  }
 0x517   : > { %v3814_v41 = vpop.f32.mrf.mxu1  ;;  %v9374_v31 = vld [vmem:[%s7657_s13 + $0x328] sm:$0xff]  }
 0x518   : > { %v3910_v50 = vrot.slane %v3892_v37, 7  ;;  %v3937_v38 = vmul.f32 %v3883_v34, %v3883_v34  ;;  %v9384_v37 = vld [vmem:[%s7657_s13 + $0x320] sm:$0xff]   ;;  %v9389_v41 = vld [vmem:[%s7657_s13 + $0x358] sm:$0xff]  }
 0x519   : > { %v3815_v13 = vpop.f32.mrf.mxu1  ;;  %10314 = vst [vmem:[#allocation36_spill] sm:$0xff] %v9389_v41  ;;  %v10315_v16 = vld [vmem:[#allocation8_spill] sm:$0xff] }
 0x51a   : > { %v3928_v10 = vsub.f32 %v8796_v3, %v3910_v50 }
 0x51c   : > { %v3946_v21 = vmul.f32 %v3928_v10, %v3928_v10  ;;  %6372 = vmatpush3.bf16.xpose.msra.mxu1 %v9364_v29 }
 0x51d   : > { %6358 = vmatpush3.bf16.xpose.msra.mxu0 %v8704_v42  ;;  %6373 = vmatprep.subr.bf16.mxu1 %v9369_v24  ;;  %v10312_v42 = vld [vmem:[#allocation9_spill] sm:$0xff] }
 0x51e   : > { %v3964_v22 = vrot.slane %v3946_v21, 1  ;;  %6359 = vmatprep.subr.bf16.mxu0 %v8708_v53  ;;  %v10313_v53 = vld [vmem:[#allocation14_spill] sm:$0xff] }
 0x51f   : > { %v9394_v21 = vld [vmem:[%s7657_s13 + $0x318] sm:$0xff]  }
 0x520   : > { %v3982_v11 = vadd.f32 %v3964_v22, %v3937_v38  ;;  %10316 = vst [vmem:[#allocation9_spill] sm:$0xff] %v9394_v21  ;;  %v10317_v22 = vld [vmem:[#allocation12_spill] sm:$0xff] }
 0x522   : > { %7125 = vrsqrt.f32 %v3982_v11  ;;  %vm4035_vm2 = vcmp.eq.f32.partialorder %v3982_v11, inf  ;;  %v4038_v13 = vand.u32 2147483648, %v3982_v11  ;;  %vm4037_vm3 = vcmp.eq.f32.partialorder %v3982_v11, 0.0 }
 0x524   : > { %6374 = vmatpush3.bf16.xpose.msra.mxu1 %v9374_v31 }
 0x525   : > { %6360 = vmatpush3.bf16.xpose.msra.mxu0 %v8712_v36  ;;  %6375 = vmatprep.subr.bf16.mxu1 %v9379_v17 }
 0x526   : > { %6361 = vmatprep.subr.bf16.mxu0 %v10312_v42  ;;  %v9400_v42 = vld [vmem:[%s7657_s13 + $0x350] sm:$0xff]  }
 0x527   : > { %10318 = vst [vmem:[#allocation14_spill] sm:$0xff] %v9400_v42 }
 0x52c   : > { %6376 = vmatpush3.bf16.xpose.msra.mxu1 %v9384_v37 }
 0x52d   : > { %6362 = vmatpush3.bf16.xpose.msra.mxu0 %v10313_v53  ;;  %6377 = vmatprep.subr.bf16.mxu1 %v9389_v41  ;;  %v10319_v53 = vld [vmem:[#allocation42_spill] sm:$0xff] }
 0x52e   : > { %6363 = vmatprep.subr.bf16.mxu0 %v10315_v16  ;;  %v10329_v41 = vld [vmem:[#allocation10_spill] sm:$0xff] }
 0x52f   : > { %v7126_v36 = vpop.eup %7125 }
 0x530   : > { %v4034_v50 = vmul.f32 %v7126_v36, %v3982_v11 }
 0x532   : > { %v4036_v34 = vsel %vm4035_vm2, %v3982_v11, %v4034_v50  ;;  %v9411_v50 = vld [vmem:[%s7657_s13 + $0x310] sm:$0xff]  }
 0x533   : > { %v4039_v10 = vsel %vm4037_vm3, %v4038_v13, %v4036_v34  ;;  %10320 = vst [vmem:[#allocation8_spill] sm:$0xff] %v9411_v50  ;;  %v10321_v13 = vld [vmem:[#allocation44_spill] sm:$0xff] }
 0x534   : > { %6378 = vmatpush3.bf16.xpose.msra.mxu1 %v9394_v21  ;;  %v4054_v38 = vsub.f32 %v4039_v10, %v8919_v14  ;;  %v9416_v34 = vld [vmem:[%s7657_s13 + $0x348] sm:$0xff]   ;;  %v10323_v10 = vld [vmem:[#allocation46_spill] sm:$0xff]  ;;  %v9442_v21 = vld [vmem:[%s7657_s13 + $0x300] sm:$0xff]  }
 0x535   : > { %6364 = vmatpush3.bf16.xpose.msra.mxu0 %v10317_v22  ;;  %6379 = vmatprep.subr.bf16.mxu1 %v9400_v42  ;;  %10322 = vst [vmem:[#allocation12_spill] sm:$0xff] %v9416_v34  ;;  %10328 = vst [vmem:[#allocation46_spill] sm:$0xff] %v9442_v21 }
 0x536   : > { %6365 = vmatprep.subr.bf16.mxu0 %v10319_v53  ;;  %v9404_v16 = vmax.f32 %v4054_v38, 0.0  ;;  %v10325_v53 = vld [vmem:[#allocation48_spill] sm:$0xff] }
 0x538   : > { %v4086_v11 = vrot.slane %v9404_v16, 1  ;;  %v9422_v38 = vpack.c.bf16 %v9404_v16, %v9404_v16 }
 0x53a   : > { %v4087_v36 = vsel %vm3474_vm10, %v4086_v11, %v9304_v4  ;;  %v9426_v4 = vld [vmem:[%s7657_s13 + $0x308] sm:$0xff]  }
 0x53b   : > { %5845 = vst [vmem:[%s8945_s18 + $0x10] sm:$0xff] %v4087_v36  ;;  %10324 = vst [vmem:[#allocation42_spill] sm:$0xff] %v9426_v4  ;;  %v9432_v36 = vld [vmem:[%s7657_s13 + $0x340] sm:$0xff]  }
 0x53c   : > { %6380 = vmatpush3.bf16.xpose.msra.mxu1 %v9411_v50  ;;  %10326 = vst [vmem:[#allocation44_spill] sm:$0xff] %v9432_v36 }
 0x53d   : > { %6366 = vmatpush3.bf16.xpose.msra.mxu0 %v10321_v13  ;;  %6381 = vmatprep.subr.bf16.mxu1 %v9416_v34  ;;  %v10327_v13 = vld [vmem:[#allocation16_spill] sm:$0xff] }
 0x53e   : > { %6387 = vmatprep.subr.bf16.mxu0 %v10323_v10 }
 0x544   : > { %6368 = vmatmul.mubr.bf16.vlgmr.msra.gmra.mxu0 %v9318_v25  ;;  %6382 = vmatpush3.bf16.xpose.msra.mxu1 %v9426_v4  ;;  %v3851_v22 = vpop.f32.mrf.mxu0  ;;  %v3866_v4 = vadd.f32 %v9032_v52, %v8966_v0 }
 0x545   : > { %6388 = vmatpush3.bf16.xpose.msra.mxu0 %v10325_v53  ;;  %6403 = vmatprep.mubr.bf16.mxu0 %v9422_v38  ;;  %v3875_v25 = vmul.f32 %v3851_v22, %v8937_v44 }
 0x546   : > { %v3853_v11 = vpop.f32.mrf.mxu0  ;;  %6383 = vmatprep.subr.bf16.mxu1 %v9432_v36  ;;  %6389 = vmatprep.subr.bf16.mxu0 %v10327_v13  ;;  %v9447_v13 = vld [vmem:[%s7657_s13 + $0x478] sm:$0xff]  }
 0x547   : > { %v3893_v10 = vmul.f32 %v3853_v11, %v8937_v44  ;;  %v3884_v42 = vsub.f32 %v3866_v4, %v3875_v25  ;;  %10330 = vst [vmem:[#allocation48_spill] sm:$0xff] %v9447_v13 }
 0x548   : > { %v3855_v34 = vpop.f32.mrf.mxu0 }
 0x549   : > { %v3911_v50 = vrot.slane %v3893_v10, 7  ;;  %v10331_v34 = vld [vmem:[#allocation17_spill] sm:$0xff]  ;;  %v3938_v22 = vmul.f32 %v3884_v42, %v3884_v42 }
 0x54a   : > { %v3856_v53 = vpop.f32.mrf.mxu0 }
 0x54b   : > { %v3929_v14 = vsub.f32 %v8966_v0, %v3911_v50  ;;  %v10332_v50 = vld [vmem:[#allocation43_spill] sm:$0xff] }
 0x54c   : > { %6384 = vmatpush3.bf16.xpose.msra.mxu1 %v9442_v21  ;;  %v10336_v21 = vld [vmem:[#allocation47_spill] sm:$0xff] }
 0x54d   : > { %v3947_v36 = vmul.f32 %v3929_v14, %v3929_v14  ;;  %6390 = vmatpush3.bf16.xpose.msra.mxu0 %v10329_v41  ;;  %6405 = vmatprep.subr.bf16.mxu1 %v9447_v13  ;;  %v10333_v14 = vld [vmem:[#allocation45_spill] sm:$0xff]  ;;  %v10334_v41 = vld [vmem:[#allocation19_spill] sm:$0xff] }
 0x54e   : > { %6391 = vmatprep.subr.bf16.mxu0 %v10331_v34 }
 0x54f   : > { %v3965_v52 = vrot.slane %v3947_v36, 1  ;;  %v10335_v36 = vld [vmem:[#allocation20_spill] sm:$0xff] }
 0x550   : > { %v4471_v34 = vadd.f32 %v8904_v60, %v10335_v36 }
 0x551   : > { %v3983_v11 = vadd.f32 %v3965_v52, %v3938_v22 }
 0x553   : > { %7127 = vrsqrt.f32 %v3983_v11  ;;  %v4136_v4 = vpop.f32.mrf.mxu1  ;;  %6386 = vmatmul.mubr.bf16.vlgmr.msra.gmra.mxu1 %v9344_v47  ;;  %vm4042_vm4 = vcmp.eq.f32.partialorder %v3983_v11, inf  ;;  %vm4044_vm7 = vcmp.eq.f32.partialorder %v3983_v11, 0.0 }
 0x554   : > { %6406 = vmatpush3.bf16.xpose.msra.mxu1 %v10332_v50  ;;  %v4480_v10 = vmul.f32 %v4136_v4, %v10334_v41 }
 0x555   : > { %v4138_v25 = vpop.f32.mrf.mxu1  ;;  %6392 = vmatpush3.bf16.xpose.msra.mxu0 %v8826_v33  ;;  %6407 = vmatprep.subr.bf16.mxu1 %v10333_v14  ;;  %v9464_v33 = vld [vmem:[%s7657_s13 + $0x468] sm:$0xff]  }
 0x556   : > { %v4498_v53 = vmul.f32 %v4138_v25, %v10334_v41  ;;  %6393 = vmatprep.subr.bf16.mxu0 %v8834_v40  ;;  %v4489_v52 = vsub.f32 %v4471_v34, %v4480_v10  ;;  %10337 = vst [vmem:[#allocation16_spill] sm:$0xff] %v9464_v33  ;;  %v10338_v25 = vld [vmem:[#allocation51_spill] sm:$0xff]  ;;  %v10340_v34 = vld [vmem:[#allocation53_spill] sm:$0xff] }
 0x557   : > { %v4140_v42 = vpop.f32.mrf.mxu1 }
 0x558   : > { %v4516_v22 = vrot.slane %v4498_v53, 7  ;;  %v4543_v40 = vmul.f32 %v4489_v52, %v4489_v52  ;;  %v4045_v53 = vand.u32 2147483648, %v3983_v11 }
 0x559   : > { %v4141_v47 = vpop.f32.mrf.mxu1 }
 0x55a   : > { %v4534_v50 = vsub.f32 %v10335_v36, %v4516_v22  ;;  %v9474_v22 = vld [vmem:[%s7657_s13 + $0x460] sm:$0xff]   ;;  %v10363_v36 = vld [vmem:[#allocation21_spill] sm:$0xff] }
 0x55b   : > { %10341 = vst [vmem:[#allocation17_spill] sm:$0xff] %v9474_v22  ;;  %v10342_v47 = vld [vmem:[#allocation55_spill] sm:$0xff] }
 0x55c   : > { %v4552_v13 = vmul.f32 %v4534_v50, %v4534_v50  ;;  %6408 = vmatpush3.bf16.xpose.msra.mxu1 %v10336_v21  ;;  %v9469_v21 = vld [vmem:[%s7657_s13 + $0x428] sm:$0xff]   ;;  %v10343_v50 = vld [vmem:[#allocation18_spill] sm:$0xff] }
 0x55d   : > { %6394 = vmatpush3.bf16.xpose.msra.mxu0 %v8844_v20  ;;  %6409 = vmatprep.subr.bf16.mxu1 %v9464_v33  ;;  %10339 = vst [vmem:[#allocation10_spill] sm:$0xff] %v9469_v21  ;;  %v10362_v33 = vld [vmem:[#allocation61_spill] sm:$0xff] }
 0x55e   : > { %v4570_v4 = vrot.slane %v4552_v13, 1  ;;  %6395 = vmatprep.subr.bf16.mxu0 %v10338_v25  ;;  %v10346_v25 = vld [vmem:[#allocation59_spill] sm:$0xff] }
 0x560   : > { %v7128_v60 = vpop.eup %7127  ;;  %v4588_v14 = vadd.f32 %v4570_v4, %v4543_v40  ;;  %v10344_v40 = vld [vmem:[#allocation57_spill] sm:$0xff]  ;;  %v10345_v4 = vld [vmem:[#allocation15_spill] sm:$0xff] }
 0x561   : > { %v4041_v10 = vmul.f32 %v7128_v60, %v3983_v11 }
 0x562   : > { %7129 = vrsqrt.f32 %v4588_v14  ;;  %vm4599_vm8 = vcmp.eq.f32.partialorder %v4588_v14, inf  ;;  %vm4601_vm9 = vcmp.eq.f32.partialorder %v4588_v14, 0.0 }
 0x563   : > { %v4043_v42 = vsel %vm4042_vm4, %v3983_v11, %v4041_v10 }
 0x564   : > { %6410 = vmatpush3.bf16.xpose.msra.mxu1 %v9469_v21  ;;  %v4046_v20 = vsel %vm4044_vm7, %v4045_v53, %v4043_v42  ;;  %v10347_v53 = vld [vmem:[#allocation49_spill] sm:$0xff]  ;;  %v10348_v42 = vld [vmem:[#allocation62_spill] sm:$0xff] }
 0x565   : > { %6396 = vmatpush3.bf16.xpose.msra.mxu0 %v10340_v34  ;;  %6411 = vmatprep.subr.bf16.mxu1 %v9474_v22  ;;  %v4055_v13 = vsub.f32 %v4046_v20, %v9025_v51  ;;  %v10349_v20 = vld [vmem:[#allocation50_spill] sm:$0xff] }
 0x566   : > { %6397 = vmatprep.subr.bf16.mxu0 %v10342_v47  ;;  %v4602_v47 = vand.u32 2147483648, %v4588_v14 }
 0x567   : > { %v9479_v52 = vmax.f32 %v4055_v13, 0.0  ;;  %v10350_v13 = vld [vmem:[#allocation65_spill] sm:$0xff] }
 0x569   : > { %5846 = vst [vmem:[%s8945_s18 + $0x18] sm:$0x1] %v9479_v52  ;;  %v4101_v11 = vpack.c.bf16 %v9479_v52, %v9479_v52 }
 0x56b   : > { %6421 = vmatprep.mubr.bf16.mxu1 %v4101_v11 }
 0x56c   : > { %6412 = vmatpush3.bf16.xpose.msra.mxu1 %v10343_v50 }
 0x56d   : > { %6398 = vmatpush3.bf16.xpose.msra.mxu0 %v10344_v40  ;;  %6413 = vmatprep.subr.bf16.mxu1 %v10345_v4  ;;  %v10351_v40 = vld [vmem:[#allocation22_spill] sm:$0xff]  ;;  %v10352_v4 = vld [vmem:[#allocation52_spill] sm:$0xff] }
 0x56e   : > { %6399 = vmatprep.subr.bf16.mxu0 %v10346_v25  ;;  %v10353_v25 = vld [vmem:[#allocation66_spill] sm:$0xff] }
 0x56f   : > { %v7130_v60 = vpop.eup %7129 }
 0x570   : > { %v4598_v10 = vmul.f32 %v7130_v60, %v4588_v14  ;;  %v10354_v60 = vld [vmem:[#allocation54_spill] sm:$0xff] }
 0x572   : > { %v4600_v34 = vsel %vm4599_vm8, %v4588_v14, %v4598_v10  ;;  %v10356_v14 = vld [vmem:[#allocation56_spill] sm:$0xff] }
 0x573   : > { %v4603_v50 = vsel %vm4601_vm9, %v4602_v47, %v4600_v34  ;;  %v10359_v47 = vld [vmem:[#allocation68_spill] sm:$0xff] }
 0x574   : > { %6414 = vmatpush3.bf16.xpose.msra.mxu1 %v10347_v53  ;;  %v4660_v22 = vsub.f32 %v4603_v50, %v10351_v40  ;;  %v10355_v53 = vld [vmem:[#allocation67_spill] sm:$0xff] }
 0x575   : > { %6400 = vmatpush3.bf16.xpose.msra.mxu0 %v10348_v42  ;;  %6415 = vmatprep.subr.bf16.mxu1 %v10349_v20  ;;  %v10357_v20 = vld [vmem:[#allocation11_spill] sm:$0xff] }
 0x576   : > { %6401 = vmatprep.subr.bf16.mxu0 %v10350_v13  ;;  %v9498_v21 = vmax.f32 %v4660_v22, 0.0  ;;  %v10358_v13 = vld [vmem:[#allocation58_spill] sm:$0xff]  ;;  %v10360_v22 = vld [vmem:[#allocation25_spill] sm:$0xff] }
 0x578   : > { %v9502_v10 = vpack.c.bf16 %v9498_v21, %v9498_v21 }
 0x57c   : > { %6416 = vmatpush3.bf16.xpose.msra.mxu1 %v10352_v4 }
 0x57d   : > { %6402 = vmatpush3.bf16.xpose.msra.mxu0 %v10353_v25  ;;  %6417 = vmatprep.subr.bf16.mxu1 %v10354_v60  ;;  %v10361_v60 = vld [vmem:[#allocation26_spill] sm:$0xff] }
 0x57e   : > { %6423 = vmatprep.subr.bf16.mxu0 %v10355_v53  ;;  %v4472_v53 = vadd.f32 %v8890_v5, %v10361_v60 }
 0x584   : > { %v4177_v42 = vpop.f32.mrf.mxu0  ;;  %6404 = vmatmul.mubr.bf16.vlgmr.msra.gmra.mxu0 %v9422_v38  ;;  %6418 = vmatpush3.bf16.xpose.msra.mxu1 %v10356_v14 }
 0x585   : > { %6424 = vmatpush3.bf16.xpose.msra.mxu0 %v10357_v20  ;;  %6439 = vmatprep.mubr.bf16.mxu0 %v9502_v10  ;;  %v4481_v50 = vmul.f32 %v4177_v42, %v10360_v22 }
 0x586   : > { %v4179_v34 = vpop.f32.mrf.mxu0  ;;  %6419 = vmatprep.subr.bf16.mxu1 %v10358_v13  ;;  %6425 = vmatprep.subr.bf16.mxu0 %v10359_v47  ;;  %v10364_v13 = vld [vmem:[#allocation64_spill] sm:$0xff]  ;;  %v10365_v47 = vld [vmem:[#allocation69_spill] sm:$0xff] }
 0x587   : > { %v4499_v4 = vmul.f32 %v4179_v34, %v10360_v22  ;;  %v4490_v14 = vsub.f32 %v4472_v53, %v4481_v50 }
 0x588   : > { %v4181_v25 = vpop.f32.mrf.mxu0 }
 0x589   : > { %v4517_v38 = vrot.slane %v4499_v4, 7  ;;  %v4544_v42 = vmul.f32 %v4490_v14, %v4490_v14  ;;  %v10367_v4 = vld [vmem:[#allocation24_spill] sm:$0xff] }
 0x58a   : > { %v4182_v40 = vpop.f32.mrf.mxu0 }
 0x58b   : > { %v4535_v20 = vsub.f32 %v10361_v60, %v4517_v38 }
 0x58c   : > { %6420 = vmatpush3.bf16.xpose.msra.mxu1 %v10362_v33  ;;  %v10366_v33 = vld [vmem:[#allocation23_spill] sm:$0xff] }
 0x58d   : > { %v4553_v41 = vmul.f32 %v4535_v20, %v4535_v20  ;;  %6426 = vmatpush3.bf16.xpose.msra.mxu0 %v10363_v36  ;;  %6441 = vmatprep.subr.bf16.mxu1 %v10364_v13  ;;  %v10369_v13 = vld [vmem:[#allocation79_spill] sm:$0xff] }
 0x58e   : > { %6427 = vmatprep.subr.bf16.mxu0 %v10365_v47 }
 0x58f   : > { %v4571_v34 = vrot.slane %v4553_v41, 1  ;;  %v10368_v41 = vld [vmem:[#allocation60_spill] sm:$0xff] }
 0x590   : > { %v4473_v53 = vadd.f32 %v10368_v41, %v10367_v4 }
 0x591   : > { %v4589_v25 = vadd.f32 %v4571_v34, %v4544_v42  ;;  %v10372_v42 = vld [vmem:[#allocation71_spill] sm:$0xff] }
 0x593   : > { %7131 = vrsqrt.f32 %v4589_v25  ;;  %v4218_v22 = vpop.f32.mrf.mxu1  ;;  %6422 = vmatmul.mubr.bf16.vlgmr.msra.gmra.mxu1 %v4101_v11  ;;  %vm4606_vm15 = vcmp.eq.f32.partialorder %v4589_v25, inf  ;;  %vm4608_vm0 = vcmp.eq.f32.partialorder %v4589_v25, 0.0 }
 0x594   : > { %6442 = vmatpush3.bf16.xpose.msra.mxu1 %v9047_v32  ;;  %v4482_v40 = vmul.f32 %v4218_v22, %v10366_v33 }
 0x595   : > { %v4220_v5 = vpop.f32.mrf.mxu1  ;;  %6428 = vmatpush3.bf16.xpose.msra.mxu0 %v8996_v49  ;;  %6443 = vmatprep.subr.bf16.mxu1 %v9056_v39  ;;  %v10370_v49 = vld [vmem:[#allocation70_spill] sm:$0xff]  ;;  %v10371_v39 = vld [vmem:[#allocation81_spill] sm:$0xff] }
 0x596   : > { %v4500_v36 = vmul.f32 %v4220_v5, %v10366_v33  ;;  %6429 = vmatprep.subr.bf16.mxu0 %v9000_v8  ;;  %v4491_v11 = vsub.f32 %v4473_v53, %v4482_v40  ;;  %v10374_v53 = vld [vmem:[#allocation72_spill] sm:$0xff] }
 0x597   : > { %v4222_v50 = vpop.f32.mrf.mxu1 }
 0x598   : > { %v4518_v38 = vrot.slane %v4500_v36, 7  ;;  %v4545_v22 = vmul.f32 %v4491_v11, %v4491_v11  ;;  %v4609_v36 = vand.u32 2147483648, %v4589_v25  ;;  %v10373_v50 = vld [vmem:[#allocation83_spill] sm:$0xff]  ;;  %v10376_v11 = vld [vmem:[#allocation73_spill] sm:$0xff] }
 0x599   : > { %v4223_v14 = vpop.f32.mrf.mxu1 }
 0x59a   : > { %v4536_v32 = vsub.f32 %v10367_v4, %v4518_v38  ;;  %v10375_v38 = vld [vmem:[#allocation27_spill] sm:$0xff] }
 0x59c   : > { %v4554_v20 = vmul.f32 %v4536_v32, %v4536_v32  ;;  %6444 = vmatpush3.bf16.xpose.msra.mxu1 %v10369_v13 }
 0x59d   : > { %6430 = vmatpush3.bf16.xpose.msra.mxu0 %v10370_v49  ;;  %6445 = vmatprep.subr.bf16.mxu1 %v10371_v39  ;;  %v10377_v49 = vld [vmem:[#allocation74_spill] sm:$0xff]  ;;  %v10379_v39 = vld [vmem:[#allocation75_spill] sm:$0xff] }
 0x59e   : > { %v4572_v47 = vrot.slane %v4554_v20, 1  ;;  %6431 = vmatprep.subr.bf16.mxu0 %v10372_v42 }
 0x5a0   : > { %v7132_v8 = vpop.eup %7131  ;;  %v4590_v34 = vadd.f32 %v4572_v47, %v4545_v22 }
 0x5a1   : > { %v4605_v5 = vmul.f32 %v7132_v8, %v4589_v25 }
 0x5a2   : > { %7133 = vrsqrt.f32 %v4590_v34  ;;  %vm4613_vm2 = vcmp.eq.f32.partialorder %v4590_v34, inf  ;;  %v4616_v42 = vand.u32 2147483648, %v4590_v34  ;;  %vm4615_vm3 = vcmp.eq.f32.partialorder %v4590_v34, 0.0 }
 0x5a3   : > { %v4607_v40 = vsel %vm4606_vm15, %v4589_v25, %v4605_v5 }
 0x5a4   : > { %6446 = vmatpush3.bf16.xpose.msra.mxu1 %v10373_v50  ;;  %v4610_v41 = vsel %vm4608_vm0, %v4609_v36, %v4607_v40  ;;  %v10380_v36 = vld [vmem:[#allocation89_spill] sm:$0xff]  ;;  %v10381_v40 = vld [vmem:[#allocation28_spill] sm:$0xff] }
 0x5a5   : > { %6432 = vmatpush3.bf16.xpose.msra.mxu0 %v10374_v53  ;;  %6447 = vmatprep.subr.bf16.mxu1 %v9096_v27  ;;  %v4661_v14 = vsub.f32 %v4610_v41, %v10375_v38  ;;  %v10378_v27 = vld [vmem:[#allocation87_spill] sm:$0xff]  ;;  %v10382_v41 = vld [vmem:[#allocation76_spill] sm:$0xff]  ;;  %v10384_v53 = vld [vmem:[#allocation77_spill] sm:$0xff] }
 0x5a6   : > { %6433 = vmatprep.subr.bf16.mxu0 %v10376_v11 }
 0x5a7   : > { %v9537_v32 = vmax.f32 %v4661_v14, 0.0 }
 0x5a9   : > { %v4687_v20 = vrot.slane %v9537_v32, 7  ;;  %v4707_v13 = vpack.c.bf16 %v9537_v32, %v9537_v32 }
 0x5ab   : > { %v4688_v25 = vsel %vm3456_vm12, %v4687_v20, %v9498_v21  ;;  %6457 = vmatprep.mubr.bf16.mxu1 %v4707_v13 }
 0x5ac   : > { %6448 = vmatpush3.bf16.xpose.msra.mxu1 %v9108_v48  ;;  %v10383_v48 = vld [vmem:[#allocation91_spill] sm:$0xff] }
 0x5ad   : > { %6434 = vmatpush3.bf16.xpose.msra.mxu0 %v10377_v49  ;;  %6449 = vmatprep.subr.bf16.mxu1 %v10378_v27  ;;  %v10385_v49 = vld [vmem:[#allocation93_spill] sm:$0xff]  ;;  %v10387_v27 = vld [vmem:[#allocation95_spill] sm:$0xff] }
 0x5ae   : > { %6435 = vmatprep.subr.bf16.mxu0 %v10379_v39  ;;  %v10388_v39 = vld [vmem:[#allocation80_spill] sm:$0xff] }
 0x5af   : > { %v7134_v22 = vpop.eup %7133 }
 0x5b0   : > { %v4612_v47 = vmul.f32 %v7134_v22, %v4590_v34 }
 0x5b2   : > { %v4614_v8 = vsel %vm4613_vm2, %v4590_v34, %v4612_v47  ;;  %v10386_v34 = vld [vmem:[#allocation78_spill] sm:$0xff] }
 0x5b3   : > { %v4617_v5 = vsel %vm4615_vm3, %v4616_v42, %v4614_v8  ;;  %v10389_v42 = vld [vmem:[#allocation82_spill] sm:$0xff]  ;;  %v10390_v8 = vld [vmem:[#allocation84_spill] sm:$0xff] }
 0x5b4   : > { %6450 = vmatpush3.bf16.xpose.msra.mxu1 %v10380_v36  ;;  %v4662_v50 = vsub.f32 %v4617_v5, %v10381_v40  ;;  %v10391_v5 = vld [vmem:[#allocation38_spill] sm:$0xff] }
 0x5b5   : > { %6436 = vmatpush3.bf16.xpose.msra.mxu0 %v10382_v41  ;;  %6451 = vmatprep.subr.bf16.mxu1 %v10383_v48  ;;  %v10392_v48 = vld [vmem:[#allocation39_spill] sm:$0xff] }
 0x5b6   : > { %6437 = vmatprep.subr.bf16.mxu0 %v10384_v53  ;;  %v9553_v14 = vmax.f32 %v4662_v50, 0.0  ;;  %v10393_v53 = vld [vmem:[#allocation98_spill] sm:$0xff] }
 0x5b8   : > { %v4689_v11 = vrot.slane %v9553_v14, 6  ;;  %v9565_v22 = vpack.c.bf16 %v9553_v14, %v9553_v14 }
 0x5ba   : > { %v9557_v20 = vsel %vm3459_vm13, %v4689_v11, %v4688_v25  ;;  %v4474_v11 = vadd.f32 %v10393_v53, %v10392_v48 }
 0x5bc   : > { %6452 = vmatpush3.bf16.xpose.msra.mxu1 %v10385_v49 }
 0x5bd   : > { %6438 = vmatpush3.bf16.xpose.msra.mxu0 %v10386_v34  ;;  %6453 = vmatprep.subr.bf16.mxu1 %v10387_v27  ;;  %v10394_v27 = vld [vmem:[#allocation100_spill] sm:$0xff] }
 0x5be   : > { %6459 = vmatprep.subr.bf16.mxu0 %v10388_v39  ;;  %v10395_v39 = vld [vmem:[#allocation85_spill] sm:$0xff] }
 0x5c4   : > { %v4259_v47 = vpop.f32.mrf.mxu0  ;;  %6440 = vmatmul.mubr.bf16.vlgmr.msra.gmra.mxu0 %v9502_v10  ;;  %6454 = vmatpush3.bf16.xpose.msra.mxu1 %v9163_v2 }
 0x5c5   : > { %6460 = vmatpush3.bf16.xpose.msra.mxu0 %v10389_v42  ;;  %6475 = vmatprep.mubr.bf16.mxu0 %v9565_v22  ;;  %v4483_v36 = vmul.f32 %v4259_v47, %v10391_v5  ;;  %v10396_v42 = vld [vmem:[#allocation102_spill] sm:$0xff] }
 0x5c6   : > { %v4261_v25 = vpop.f32.mrf.mxu0  ;;  %6455 = vmatprep.subr.bf16.mxu1 %v9173_v15  ;;  %6461 = vmatprep.subr.bf16.mxu0 %v10390_v8  ;;  %v10397_v47 = vld [vmem:[#allocation86_spill] sm:$0xff] }
 0x5c7   : > { %v4501_v50 = vmul.f32 %v4261_v25, %v10391_v5  ;;  %v4492_v49 = vsub.f32 %v4474_v11, %v4483_v36  ;;  %v10398_v11 = vld [vmem:[#allocation88_spill] sm:$0xff] }
 0x5c8   : > { %v4263_v41 = vpop.f32.mrf.mxu0 }
 0x5c9   : > { %v4519_v10 = vrot.slane %v4501_v50, 7  ;;  %v4546_v25 = vmul.f32 %v4492_v49, %v4492_v49  ;;  %v7367_v50 = vld [vmem:[%s7657_s13 + $0x1b8] sm:$0xff]  }
 0x5ca   : > { %v4264_v2 = vpop.f32.mrf.mxu0 }
 0x5cb   : > { %v4537_v34 = vsub.f32 %v10392_v48, %v4519_v10  ;;  %v7368_v10 = vld [vmem:[%s7657_s13 + $0x1f0] sm:$0xff]   ;;  %v10399_v2 = vld [vmem:[#allocation31_spill] sm:$0xff] }
 0x5cc   : > { %6456 = vmatpush3.bf16.xpose.msra.mxu1 %v10394_v27 }
 0x5cd   : > { %v4555_v15 = vmul.f32 %v4537_v34, %v4537_v34  ;;  %6462 = vmatpush3.bf16.xpose.msra.mxu0 %v10395_v39  ;;  %6477 = vmatprep.subr.bf16.mxu1 %v10396_v42  ;;  %v10400_v39 = vld [vmem:[#allocation90_spill] sm:$0xff] }
 0x5ce   : > { %6463 = vmatprep.subr.bf16.mxu0 %v10397_v47 }
 0x5cf   : > { %v4573_v8 = vrot.slane %v4555_v15, 1  ;;  %v10401_v15 = vld [vmem:[#allocation34_spill] sm:$0xff] }
 0x5d0   : > { %v4475_v42 = vadd.f32 %v9170_v26, %v10401_v15 }
 0x5d1   : > { %v4591_v41 = vadd.f32 %v4573_v8, %v4546_v25 }
 0x5d3   : > { %7135 = vrsqrt.f32 %v4591_v41  ;;  %v4300_v53 = vpop.f32.mrf.mxu1  ;;  %6458 = vmatmul.mubr.bf16.vlgmr.msra.gmra.mxu1 %v4707_v13  ;;  %vm4620_vm4 = vcmp.eq.f32.partialorder %v4591_v41, inf  ;;  %vm4622_vm7 = vcmp.eq.f32.partialorder %v4591_v41, 0.0 }
 0x5d4   : > { %6478 = vmatpush3.bf16.xpose.msra.mxu1 %v7367_v50  ;;  %v4484_v34 = vmul.f32 %v4300_v53, %v10399_v2  ;;  %v7370_v53 = vld [vmem:[%s7657_s13 + $0x1e8] sm:$0xff]  }
 0x5d5   : > { %v4302_v36 = vpop.f32.mrf.mxu1  ;;  %6464 = vmatpush3.bf16.xpose.msra.mxu0 %v10398_v11  ;;  %6479 = vmatprep.subr.bf16.mxu1 %v7368_v10  ;;  %v7369_v11 = vld [vmem:[%s7657_s13 + $0x1b0] sm:$0xff]   ;;  %v10402_v10 = vld [vmem:[#allocation92_spill] sm:$0xff] }
 0x5d6   : > { %v4502_v27 = vmul.f32 %v4302_v36, %v10399_v2  ;;  %6465 = vmatprep.subr.bf16.mxu0 %v10400_v39  ;;  %v4493_v25 = vsub.f32 %v4475_v42, %v4484_v34  ;;  %v4623_v34 = vand.u32 2147483648, %v4591_v41 }
 0x5d7   : > { %v4304_v49 = vpop.f32.mrf.mxu1 }
 0x5d8   : > { %v4520_v13 = vrot.slane %v4502_v27, 7  ;;  %v4547_v36 = vmul.f32 %v4493_v25, %v4493_v25  ;;  %v10403_v49 = vld [vmem:[#allocation94_spill] sm:$0xff]  ;;  %v10405_v25 = vld [vmem:[#allocation40_spill] sm:$0xff] }
 0x5d9   : > { %v4305_v47 = vpop.f32.mrf.mxu1 }
 0x5da   : > { %v4538_v8 = vsub.f32 %v10401_v15, %v4520_v13  ;;  %v7371_v13 = vld [vmem:[%s7657_s13 + $0x1a8] sm:$0xff]  }
 0x5dc   : > { %v4556_v50 = vmul.f32 %v4538_v8, %v4538_v8  ;;  %6480 = vmatpush3.bf16.xpose.msra.mxu1 %v7369_v11  ;;  %v10404_v8 = vld [vmem:[#allocation96_spill] sm:$0xff] }
 0x5dd   : > { %6466 = vmatpush3.bf16.xpose.msra.mxu0 %v10402_v10  ;;  %6481 = vmatprep.subr.bf16.mxu1 %v7370_v53  ;;  %v7372_v11 = vld [vmem:[%s7657_s13 + $0x1e0] sm:$0xff]   ;;  %v10406_v10 = vld [vmem:[#allocation97_spill] sm:$0xff] }
 0x5de   : > { %v4574_v39 = vrot.slane %v4556_v50, 1  ;;  %6467 = vmatprep.subr.bf16.mxu0 %v10403_v49  ;;  %v10407_v49 = vld [vmem:[#allocation99_spill] sm:$0xff] }
 0x5e0   : > { %v7136_v40 = vpop.eup %7135  ;;  %v4592_v26 = vadd.f32 %v4574_v39, %v4547_v36  ;;  %v7373_v39 = vld [vmem:[%s7657_s13 + $0x1a0] sm:$0xff]  }
 0x5e1   : > { %v4619_v27 = vmul.f32 %v7136_v40, %v4591_v41 }
 0x5e2   : > { %7137 = vrsqrt.f32 %v4592_v26  ;;  %vm4627_vm8 = vcmp.eq.f32.partialorder %v4592_v26, inf  ;;  %vm4629_vm9 = vcmp.eq.f32.partialorder %v4592_v26, 0.0 }
 0x5e3   : > { %v4621_v42 = vsel %vm4620_vm4, %v4591_v41, %v4619_v27  ;;  %v7374_v27 = vld [vmem:[%s7657_s13 + $0x1d8] sm:$0xff]  }
 0x5e4   : > { %6482 = vmatpush3.bf16.xpose.msra.mxu1 %v7371_v13  ;;  %v4624_v47 = vsel %vm4622_vm7, %v4623_v34, %v4621_v42  ;;  %v10408_v34 = vld [vmem:[#allocation101_spill] sm:$0xff] }
 0x5e5   : > { %6468 = vmatpush3.bf16.xpose.msra.mxu0 %v10404_v8  ;;  %6483 = vmatprep.subr.bf16.mxu1 %v7372_v11  ;;  %v4663_v50 = vsub.f32 %v4624_v47, %v10405_v25  ;;  %v4630_v47 = vand.u32 2147483648, %v4592_v26 }
 0x5e6   : > { %6469 = vmatprep.subr.bf16.mxu0 %v10406_v10 }
 0x5e7   : > { %v9600_v53 = vmax.f32 %v4663_v50, 0.0  ;;  %v10409_v50 = vld [vmem:[#allocation37_spill] sm:$0xff] }
 0x5e9   : > { %v4691_v40 = vrot.slane %v9600_v53, 5  ;;  %v4709_v36 = vpack.c.bf16 %v9600_v53, %v9600_v53 }
 0x5eb   : > { %v4692_v41 = vsel %vm3462_vm5, %v4691_v40, %v9557_v20  ;;  %6493 = vmatprep.mubr.bf16.mxu1 %v4709_v36  ;;  %v7375_v20 = vld [vmem:[%s7657_s13 + $0x198] sm:$0xff]  }
 0x5ec   : > { %6484 = vmatpush3.bf16.xpose.msra.mxu1 %v7373_v39  ;;  %v10410_v40 = vld [vmem:[#allocation103_spill] sm:$0xff]  ;;  %v7376_v39 = vld [vmem:[%s7657_s13 + $0x1d0] sm:$0xff]  }
 0x5ed   : > { %6470 = vmatpush3.bf16.xpose.msra.mxu0 %v10407_v49  ;;  %6485 = vmatprep.subr.bf16.mxu1 %v7374_v27  ;;  %v10411_v49 = vld [vmem:[#allocation29_spill] sm:$0xff] }
 0x5ee   : > { %6471 = vmatprep.subr.bf16.mxu0 %v10408_v34 }
 0x5ef   : > { %v7138_v42 = vpop.eup %7137 }
 0x5f0   : > { %v4626_v13 = vmul.f32 %v7138_v42, %v4592_v26 }
 0x5f2   : > { %v4628_v8 = vsel %vm4627_vm8, %v4592_v26, %v4626_v13  ;;  %v7377_v26 = vld [vmem:[%s7657_s13 + $0x190] sm:$0xff]  }
 0x5f3   : > { %v4631_v11 = vsel %vm4629_vm9, %v4630_v47, %v4628_v8  ;;  %v10412_v13 = vld [vmem:[#allocation30_spill] sm:$0xff]  ;;  %v7378_v47 = vld [vmem:[%s7657_s13 + $0x1c8] sm:$0xff]  }
 0x5f4   : > { %6486 = vmatpush3.bf16.xpose.msra.mxu1 %v7375_v20  ;;  %v4664_v10 = vsub.f32 %v4631_v11, %v10409_v50  ;;  %v10413_v8 = vld [vmem:[#allocation32_spill] sm:$0xff] }
 0x5f5   : > { %6472 = vmatpush3.bf16.xpose.msra.mxu0 %v10410_v40  ;;  %6487 = vmatprep.subr.bf16.mxu1 %v7376_v39  ;;  %v7380_v39 = vld [vmem:[%s7657_s13 + $0x1c0] sm:$0xff]  }
 0x5f6   : > { %6473 = vmatprep.subr.bf16.mxu0 %v10411_v49  ;;  %v9616_v27 = vmax.f32 %v4664_v10, 0.0  ;;  %v7379_v10 = vld [vmem:[%s7657_s13 + $0x188] sm:$0xff]   ;;  %v10415_v49 = vld [vmem:[#allocation35_spill] sm:$0xff] }
 0x5f7   : > { %v7381_v50 = vld [vmem:[%s7657_s13 + $0x180] sm:$0xff]  }
 0x5f8   : > { %v4693_v34 = vrot.slane %v9616_v27, 4  ;;  %v9628_v11 = vpack.c.bf16 %v9616_v27, %v9616_v27 }
 0x5fa   : > { %v9620_v42 = vsel %vm3465_vm6, %v4693_v34, %v4692_v41  ;;  %v10414_v41 = vld [vmem:[#allocation33_spill] sm:$0xff] }
 0x5fc   : > { %6488 = vmatpush3.bf16.xpose.msra.mxu1 %v7377_v26 }
 0x5fd   : > { %6474 = vmatpush3.bf16.xpose.msra.mxu0 %v10412_v13  ;;  %6489 = vmatprep.subr.bf16.mxu1 %v7378_v47 }
 0x5fe   : > { %6495 = vmatprep.subr.bf16.mxu0 %v10413_v8 }
 0x604   : > { %v4341_v20 = vpop.f32.mrf.mxu0  ;;  %6476 = vmatmul.mubr.bf16.vlgmr.msra.gmra.mxu0 %v9565_v22  ;;  %6490 = vmatpush3.bf16.xpose.msra.mxu1 %v7379_v10  ;;  %v4476_v22 = vadd.f32 %v9297_v55, %v8686_v19 }
 0x605   : > { %6496 = vmatpush3.bf16.xpose.msra.mxu0 %v10414_v41  ;;  %6511 = vmatprep.mubr.bf16.mxu0 %v9628_v11  ;;  %v4485_v34 = vmul.f32 %v4341_v20, %v8658_v56 }
 0x606   : > { %v4343_v40 = vpop.f32.mrf.mxu0  ;;  %6491 = vmatprep.subr.bf16.mxu1 %v7380_v39  ;;  %6497 = vmatprep.subr.bf16.mxu0 %v10415_v49  ;;  %v7382_v49 = vld [vmem:[%s7657_s13 + $0x2f8] sm:$0xff]  }
 0x607   : > { %v4503_v26 = vmul.f32 %v4343_v40, %v8658_v56  ;;  %v4494_v10 = vsub.f32 %v4476_v22, %v4485_v34 }
 0x608   : > { %v4345_v13 = vpop.f32.mrf.mxu0 }
 0x609   : > { %v4521_v47 = vrot.slane %v4503_v26, 7  ;;  %v4548_v20 = vmul.f32 %v4494_v10, %v4494_v10  ;;  %v7383_v26 = vld [vmem:[%s7657_s13 + $0x2b8] sm:$0xff]  }
 0x60a   : > { %v4346_v8 = vpop.f32.mrf.mxu0 }
 0x60b   : > { %v4539_v41 = vsub.f32 %v8686_v19, %v4521_v47  ;;  %v10417_v8 = vld [vmem:[#allocation13_spill] sm:$0xff] }
 0x60c   : > { %6492 = vmatpush3.bf16.xpose.msra.mxu1 %v7381_v50  ;;  %v7384_v50 = vld [vmem:[%s7657_s13 + $0x2f0] sm:$0xff]   ;;  %v4477_v10 = vadd.f32 %v9294_v18, %v10417_v8 }
 0x60d   : > { %v4557_v39 = vmul.f32 %v4539_v41, %v4539_v41  ;;  %6498 = vmatpush3.bf16.xpose.msra.mxu0 %v9254_v6  ;;  %6513 = vmatprep.subr.bf16.mxu1 %v7382_v49  ;;  %v10416_v6 = vld [vmem:[#allocation41_spill] sm:$0xff] }
 0x60e   : > { %6499 = vmatprep.subr.bf16.mxu0 %v9259_v9 }
 0x60f   : > { %v4575_v40 = vrot.slane %v4557_v39, 1 }
 0x611   : > { %v4593_v13 = vadd.f32 %v4575_v40, %v4548_v20  ;;  %v7386_v40 = vld [vmem:[%s7657_s13 + $0x2e8] sm:$0xff]  }
 0x613   : > { %7139 = vrsqrt.f32 %v4593_v13  ;;  %v4382_v55 = vpop.f32.mrf.mxu1  ;;  %6494 = vmatmul.mubr.bf16.vlgmr.msra.gmra.mxu1 %v4709_v36  ;;  %vm4634_vm15 = vcmp.eq.f32.partialorder %v4593_v13, inf  ;;  %vm4636_vm0 = vcmp.eq.f32.partialorder %v4593_v13, 0.0 }
 0x614   : > { %6514 = vmatpush3.bf16.xpose.msra.mxu1 %v7383_v26  ;;  %v4486_v22 = vmul.f32 %v4382_v55, %v10416_v6 }
 0x615   : > { %v4384_v34 = vpop.f32.mrf.mxu1  ;;  %6500 = vmatpush3.bf16.xpose.msra.mxu0 %v9264_v1  ;;  %6515 = vmatprep.subr.bf16.mxu1 %v7384_v50  ;;  %v7385_v1 = vld [vmem:[%s7657_s13 + $0x2b0] sm:$0xff]   ;;  %v4637_v50 = vand.u32 2147483648, %v4593_v13 }
 0x616   : > { %v4504_v47 = vmul.f32 %v4384_v34, %v10416_v6  ;;  %6501 = vmatprep.subr.bf16.mxu0 %v9269_v45  ;;  %v4495_v39 = vsub.f32 %v4477_v10, %v4486_v22 }
 0x617   : > { %v4386_v9 = vpop.f32.mrf.mxu1 }
 0x618   : > { %v4522_v36 = vrot.slane %v4504_v47, 7  ;;  %v4549_v55 = vmul.f32 %v4495_v39, %v4495_v39  ;;  %v7387_v47 = vld [vmem:[%s7657_s13 + $0x2a8] sm:$0xff]   ;;  %v7388_v9 = vld [vmem:[%s7657_s13 + $0x2e0] sm:$0xff]  }
 0x619   : > { %v4387_v41 = vpop.f32.mrf.mxu1  ;;  %v7389_v39 = vld [vmem:[%s7657_s13 + $0x2a0] sm:$0xff]  }
 0x61a   : > { %v4540_v49 = vsub.f32 %v10417_v8, %v4522_v36 }
 0x61c   : > { %v4558_v20 = vmul.f32 %v4540_v49, %v4540_v49  ;;  %6516 = vmatpush3.bf16.xpose.msra.mxu1 %v7385_v1 }
 0x61d   : > { %6502 = vmatpush3.bf16.xpose.msra.mxu0 %v9274_v58  ;;  %6517 = vmatprep.subr.bf16.mxu1 %v7386_v40 }
 0x61e   : > { %v4576_v45 = vrot.slane %v4558_v20, 1  ;;  %6503 = vmatprep.subr.bf16.mxu0 %v9279_v59 }
 0x620   : > { %v7140_v26 = vpop.eup %7139  ;;  %v4594_v18 = vadd.f32 %v4576_v45, %v4549_v55  ;;  %v7391_v55 = vld [vmem:[%s7657_s13 + $0x298] sm:$0xff]  }
 0x621   : > { %v4633_v34 = vmul.f32 %v7140_v26, %v4593_v13 }
 0x622   : > { %7141 = vrsqrt.f32 %v4594_v18  ;;  %vm4641_vm2 = vcmp.eq.f32.partialorder %v4594_v18, inf  ;;  %v4644_v20 = vand.u32 2147483648, %v4594_v18  ;;  %vm4643_vm3 = vcmp.eq.f32.partialorder %v4594_v18, 0.0 }
 0x623   : > { %v4635_v22 = vsel %vm4634_vm15, %v4593_v13, %v4633_v34  ;;  %v7394_v34 = vld [vmem:[%s7657_s13 + $0x2c8] sm:$0xff]  }
 0x624   : > { %6518 = vmatpush3.bf16.xpose.msra.mxu1 %v7387_v47  ;;  %v4638_v58 = vsel %vm4636_vm0, %v4637_v50, %v4635_v22  ;;  %v7395_v50 = vld [vmem:[%s7657_s13 + $0x288] sm:$0xff]  }
 0x625   : > { %6504 = vmatpush3.bf16.xpose.msra.mxu0 %v9285_v12  ;;  %6519 = vmatprep.subr.bf16.mxu1 %v7388_v9  ;;  %v4665_v10 = vsub.f32 %v4638_v58, %v8743_v30  ;;  %v7390_v12 = vld [vmem:[%s7657_s13 + $0x2d8] sm:$0xff]  }
 0x626   : > { %6505 = vmatprep.subr.bf16.mxu0 %v9291_v63 }
 0x627   : > { %v9663_v59 = vmax.f32 %v4665_v10, 0.0 }
 0x629   : > { %v4695_v36 = vrot.slane %v9663_v59, 3  ;;  %v4711_v41 = vpack.c.bf16 %v9663_v59, %v9663_v59 }
 0x62b   : > { %6529 = vmatprep.mubr.bf16.mxu1 %v4711_v41  ;;  %v4696_v13 = vsel %vm3468_vm11, %v4695_v36, %v9620_v42 }
 0x62c   : > { %6520 = vmatpush3.bf16.xpose.msra.mxu1 %v7389_v39 }
 0x62d   : > { %6506 = vmatpush3.bf16.xpose.msra.mxu0 %v9307_v43  ;;  %6521 = vmatprep.subr.bf16.mxu1 %v7390_v12  ;;  %v7392_v43 = vld [vmem:[%s7657_s13 + $0x2d0] sm:$0xff]  }
 0x62e   : > { %6507 = vmatprep.subr.bf16.mxu0 %v9312_v23 }
 0x62f   : > { %v7142_v63 = vpop.eup %7141 }
 0x630   : > { %v4640_v49 = vmul.f32 %v7142_v63, %v4594_v18 }
 0x632   : > { %v4642_v1 = vsel %vm4641_vm2, %v4594_v18, %v4640_v49  ;;  %v7393_v18 = vld [vmem:[%s7657_s13 + $0x290] sm:$0xff]  }
 0x633   : > { %v4645_v40 = vsel %vm4643_vm3, %v4644_v20, %v4642_v1  ;;  %v7399_v20 = vld [vmem:[%s7657_s13 + $0x3b8] sm:$0xff]  }
 0x634   : > { %6522 = vmatpush3.bf16.xpose.msra.mxu1 %v7391_v55  ;;  %v4666_v42 = vsub.f32 %v4645_v40, %v8728_v62  ;;  %v7400_v40 = vld [vmem:[%s7657_s13 + $0x3f0] sm:$0xff]  }
 0x635   : > { %6508 = vmatpush3.bf16.xpose.msra.mxu0 %v9322_v46  ;;  %6523 = vmatprep.subr.bf16.mxu1 %v7392_v43 }
 0x636   : > { %6509 = vmatprep.subr.bf16.mxu0 %v9328_v61  ;;  %v9679_v23 = vmax.f32 %v4666_v42, 0.0  ;;  %v4479_v42 = vadd.f32 %v9479_v52, %v8966_v0 }
 0x638   : > { %v4697_v45 = vrot.slane %v9679_v23, 2  ;;  %v9691_v46 = vpack.c.bf16 %v9679_v23, %v9679_v23 }
 0x63a   : > { %v9683_v26 = vsel %vm3471_vm14, %v4697_v45, %v4696_v13  ;;  %v7397_v13 = vld [vmem:[%s7657_s13 + $0x280] sm:$0xff]  }
 0x63c   : > { %6524 = vmatpush3.bf16.xpose.msra.mxu1 %v7393_v18 }
 0x63d   : > { %6510 = vmatpush3.bf16.xpose.msra.mxu0 %v9333_v54  ;;  %6525 = vmatprep.subr.bf16.mxu1 %v7394_v34  ;;  %v7396_v54 = vld [vmem:[%s7657_s13 + $0x2c0] sm:$0xff]  }
 0x63e   : > { %6531 = vmatprep.subr.bf16.mxu0 %v9338_v57 }
 0x644   : > { %v4423_v61 = vpop.f32.mrf.mxu0  ;;  %6512 = vmatmul.mubr.bf16.vlgmr.msra.gmra.mxu0 %v9628_v11  ;;  %6526 = vmatpush3.bf16.xpose.msra.mxu1 %v7395_v50  ;;  %v4478_v11 = vadd.f32 %v9404_v16, %v8796_v3 }
 0x645   : > { %6532 = vmatpush3.bf16.xpose.msra.mxu0 %v9348_v7  ;;  %6547 = vmatprep.mubr.bf16.mxu0 %v9691_v46  ;;  %v4487_v57 = vmul.f32 %v4423_v61, %v8769_v35  ;;  %v7402_v61 = vld [vmem:[%s7657_s13 + $0x3e8] sm:$0xff]  }
 0x646   : > { %v4425_v22 = vpop.f32.mrf.mxu0  ;;  %6527 = vmatprep.subr.bf16.mxu1 %v7396_v54  ;;  %6533 = vmatprep.subr.bf16.mxu0 %v9354_v28  ;;  %v7398_v28 = vld [vmem:[%s7657_s13 + $0x3f8] sm:$0xff]  }
 0x647   : > { %v4505_v47 = vmul.f32 %v4425_v22, %v8769_v35  ;;  %v4496_v7 = vsub.f32 %v4478_v11, %v4487_v57  ;;  %v10418_v22 = vld [vmem:[#allocation36_spill] sm:$0xff] }
 0x648   : > { %v4427_v58 = vpop.f32.mrf.mxu0  ;;  %v7403_v11 = vld [vmem:[%s7657_s13 + $0x3a8] sm:$0xff]  }
 0x649   : > { %v4523_v9 = vrot.slane %v4505_v47, 7  ;;  %v4550_v12 = vmul.f32 %v4496_v7, %v4496_v7  ;;  %v10420_v7 = vld [vmem:[#allocation63_spill] sm:$0xff] }
 0x64a   : > { %v4428_v10 = vpop.f32.mrf.mxu0 }
 0x64b   : > { %v4541_v36 = vsub.f32 %v8796_v3, %v4523_v9  ;;  %v10419_v9 = vld [vmem:[#allocation9_spill] sm:$0xff]  ;;  %v7404_v10 = vld [vmem:[%s7657_s13 + $0x3e0] sm:$0xff]  }
 0x64c   : > { %6528 = vmatpush3.bf16.xpose.msra.mxu1 %v7397_v13  ;;  %v10421_v13 = vld [vmem:[#allocation14_spill] sm:$0xff] }
 0x64d   : > { %v4559_v39 = vmul.f32 %v4541_v36, %v4541_v36  ;;  %6534 = vmatpush3.bf16.xpose.msra.mxu0 %v9364_v29  ;;  %6549 = vmatprep.subr.bf16.mxu1 %v7398_v28 }
 0x64e   : > { %6535 = vmatprep.subr.bf16.mxu0 %v9369_v24 }
 0x64f   : > { %v4577_v63 = vrot.slane %v4559_v39, 1 }
 0x651   : > { %v4595_v49 = vadd.f32 %v4577_v63, %v4550_v12 }
 0x653   : > { %7143 = vrsqrt.f32 %v4595_v49  ;;  %v4464_v16 = vpop.f32.mrf.mxu1  ;;  %6530 = vmatmul.mubr.bf16.vlgmr.msra.gmra.mxu1 %v4711_v41  ;;  %vm4648_vm4 = vcmp.eq.f32.partialorder %v4595_v49, inf  ;;  %v4651_v47 = vand.u32 2147483648, %v4595_v49  ;;  %vm4650_vm7 = vcmp.eq.f32.partialorder %v4595_v49, 0.0 }
 0x654   : > { %6550 = vmatpush3.bf16.xpose.msra.mxu1 %v7399_v20  ;;  %v4488_v29 = vmul.f32 %v4464_v16, %v8937_v44  ;;  %v10422_v16 = vld [vmem:[#allocation8_spill] sm:$0xff]  ;;  %v7406_v20 = vld [vmem:[%s7657_s13 + $0x3d8] sm:$0xff]  }
 0x655   : > { %v4466_v1 = vpop.f32.mrf.mxu1  ;;  %6536 = vmatpush3.bf16.xpose.msra.mxu0 %v9374_v31  ;;  %6551 = vmatprep.subr.bf16.mxu1 %v7400_v40  ;;  %v7401_v31 = vld [vmem:[%s7657_s13 + $0x3b0] sm:$0xff]  }
 0x656   : > { %v4506_v55 = vmul.f32 %v4466_v1, %v8937_v44  ;;  %6537 = vmatprep.subr.bf16.mxu0 %v9379_v17  ;;  %v4497_v45 = vsub.f32 %v4479_v42, %v4488_v29  ;;  %v10423_v1 = vld [vmem:[#allocation12_spill] sm:$0xff]  ;;  %v7407_v42 = vld [vmem:[%s7657_s13 + $0x398] sm:$0xff]  }
 0x657   : > { %v4468_v24 = vpop.f32.mrf.mxu1 }
 0x658   : > { %v4524_v41 = vrot.slane %v4506_v55, 7  ;;  %v4551_v50 = vmul.f32 %v4497_v45, %v4497_v45  ;;  %v7408_v45 = vld [vmem:[%s7657_s13 + $0x3d0] sm:$0xff]  }
 0x659   : > { %v4469_v43 = vpop.f32.mrf.mxu1 }
 0x65a   : > { %v4542_v18 = vsub.f32 %v8966_v0, %v4524_v41  ;;  %v10424_v43 = vld [vmem:[#allocation42_spill] sm:$0xff] }
 0x65c   : > { %v4560_v34 = vmul.f32 %v4542_v18, %v4542_v18  ;;  %6552 = vmatpush3.bf16.xpose.msra.mxu1 %v7401_v31  ;;  %v10425_v18 = vld [vmem:[#allocation44_spill] sm:$0xff]  ;;  %v7409_v31 = vld [vmem:[%s7657_s13 + $0x390] sm:$0xff]  }
 0x65d   : > { %6538 = vmatpush3.bf16.xpose.msra.mxu0 %v9384_v37  ;;  %6553 = vmatprep.subr.bf16.mxu1 %v7402_v61  ;;  %v10426_v61 = vld [vmem:[#allocation46_spill] sm:$0xff] }
 0x65e   : > { %v4578_v17 = vrot.slane %v4560_v34, 1  ;;  %6539 = vmatprep.subr.bf16.mxu0 %v10418_v22 }
 0x660   : > { %v7144_v54 = vpop.eup %7143  ;;  %v4596_v52 = vadd.f32 %v4578_v17, %v4551_v50  ;;  %v7410_v50 = vld [vmem:[%s7657_s13 + $0x3c8] sm:$0xff]  }
 0x661   : > { %v4647_v57 = vmul.f32 %v7144_v54, %v4595_v49  ;;  %v10427_v17 = vld [vmem:[#allocation48_spill] sm:$0xff] }
 0x662   : > { %7145 = vrsqrt.f32 %v4596_v52  ;;  %vm4655_vm8 = vcmp.eq.f32.partialorder %v4596_v52, inf  ;;  %v4658_v55 = vand.u32 2147483648, %v4596_v52  ;;  %vm4657_vm9 = vcmp.eq.f32.partialorder %v4596_v52, 0.0 }
 0x663   : > { %v4649_v58 = vsel %vm4648_vm4, %v4595_v49, %v4647_v57  ;;  %v7405_v49 = vld [vmem:[%s7657_s13 + $0x3a0] sm:$0xff]  }
 0x664   : > { %6554 = vmatpush3.bf16.xpose.msra.mxu1 %v7403_v11  ;;  %v4652_v37 = vsel %vm4650_vm7, %v4651_v47, %v4649_v58  ;;  %v10428_v57 = vld [vmem:[#allocation20_spill] sm:$0xff]  ;;  %v10429_v58 = vld [vmem:[#allocation19_spill] sm:$0xff] }
 0x665   : > { %6540 = vmatpush3.bf16.xpose.msra.mxu0 %v10419_v9  ;;  %6555 = vmatprep.subr.bf16.mxu1 %v7404_v10  ;;  %v4667_v36 = vsub.f32 %v4652_v37, %v10420_v7  ;;  %v5084_v47 = vadd.f32 %v9498_v21, %v10428_v57  ;;  %v7412_v37 = vld [vmem:[%s7657_s13 + $0x438] sm:$0xff]   ;;  %v7413_v10 = vld [vmem:[%s7657_s13 + $0x3c0] sm:$0xff]  }
 0x666   : > { %6541 = vmatprep.subr.bf16.mxu0 %v10421_v13 }
 0x667   : > { %v9726_v39 = vmax.f32 %v4667_v36, 0.0  ;;  %v7414_v36 = vld [vmem:[%s7657_s13 + $0x470] sm:$0xff]  }
 0x669   : > { %v4699_v28 = vrot.slane %v9726_v39, 1  ;;  %v4713_v12 = vpack.c.bf16 %v9726_v39, %v9726_v39 }
 0x66b   : > { %6565 = vmatprep.mubr.bf16.mxu1 %v4713_v12  ;;  %v4700_v63 = vsel %vm3474_vm10, %v4699_v28, %v9683_v26 }
 0x66c   : > { %6556 = vmatpush3.bf16.xpose.msra.mxu1 %v7405_v49  ;;  %5847 = vst [vmem:[%s8945_s18 + $0x20] sm:$0xff] %v4700_v63 }
 0x66d   : > { %6542 = vmatpush3.bf16.xpose.msra.mxu0 %v10422_v16  ;;  %6557 = vmatprep.subr.bf16.mxu1 %v7406_v20  ;;  %v7415_v16 = vld [vmem:[%s7657_s13 + $0x380] sm:$0xff]  }
 0x66e   : > { %6543 = vmatprep.subr.bf16.mxu0 %v10423_v1  ;;  %v7416_v1 = vld [vmem:[%s7657_s13 + $0x430] sm:$0xff]  }
 0x66f   : > { %v7146_v40 = vpop.eup %7145 }
 0x670   : > { %v4654_v29 = vmul.f32 %v7146_v40, %v4596_v52  ;;  %v10430_v40 = vld [vmem:[#allocation16_spill] sm:$0xff] }
 0x672   : > { %v4656_v24 = vsel %vm4655_vm8, %v4596_v52, %v4654_v29  ;;  %v7411_v52 = vld [vmem:[%s7657_s13 + $0x388] sm:$0xff]  }
 0x673   : > { %v4659_v26 = vsel %vm4657_vm9, %v4658_v55, %v4656_v24 }
 0x674   : > { %6558 = vmatpush3.bf16.xpose.msra.mxu1 %v7407_v42  ;;  %v4668_v41 = vsub.f32 %v4659_v26, %v9025_v51  ;;  %v5085_v42 = vadd.f32 %v9537_v32, %v10361_v60 }
 0x675   : > { %6544 = vmatpush3.bf16.xpose.msra.mxu0 %v10424_v43  ;;  %6559 = vmatprep.subr.bf16.mxu1 %v7408_v45 }
 0x676   : > { %6545 = vmatprep.subr.bf16.mxu0 %v10425_v18  ;;  %v9743_v34 = vmax.f32 %v4668_v41, 0.0  ;;  %v10431_v41 = vld [vmem:[#allocation25_spill] sm:$0xff]  ;;  %v10432_v18 = vld [vmem:[#allocation10_spill] sm:$0xff] }
 0x678   : > { %5848 = vst [vmem:[%s8945_s18 + $0x28] sm:$0x1] %v9743_v34  ;;  %v9753_v22 = vpack.c.bf16 %v9743_v34, %v9743_v34 }
 0x67c   : > { %6560 = vmatpush3.bf16.xpose.msra.mxu1 %v7409_v31 }
 0x67d   : > { %6546 = vmatpush3.bf16.xpose.msra.mxu0 %v10426_v61  ;;  %6561 = vmatprep.subr.bf16.mxu1 %v7410_v50  ;;  %v10433_v50 = vld [vmem:[#allocation17_spill] sm:$0xff] }
 0x67e   : > { %6567 = vmatprep.subr.bf16.mxu0 %v10427_v17 }
 0x684   : > { %v4749_v54 = vpop.f32.mrf.mxu0  ;;  %6548 = vmatmul.mubr.bf16.vlgmr.msra.gmra.mxu0 %v9691_v46  ;;  %6562 = vmatpush3.bf16.xpose.msra.mxu1 %v7411_v52 }
 0x685   : > { %v5093_v11 = vmul.f32 %v4749_v54, %v10429_v58  ;;  %6568 = vmatpush3.bf16.xpose.msra.mxu0 %v7412_v37  ;;  %6583 = vmatprep.mubr.bf16.mxu0 %v9753_v22 }
 0x686   : > { %v4751_v9 = vpop.f32.mrf.mxu0  ;;  %6563 = vmatprep.subr.bf16.mxu1 %v7413_v10  ;;  %6569 = vmatprep.subr.bf16.mxu0 %v7414_v36  ;;  %v7420_v10 = vld [vmem:[%s7657_s13 + $0x450] sm:$0xff]  }
 0x687   : > { %v5102_v13 = vsub.f32 %v5084_v47, %v5093_v11  ;;  %v5111_v46 = vmul.f32 %v4751_v9, %v10429_v58  ;;  %v7418_v11 = vld [vmem:[%s7657_s13 + $0x458] sm:$0xff]   ;;  %v7421_v36 = vld [vmem:[%s7657_s13 + $0x410] sm:$0xff]  }
 0x688   : > { %v4753_v28 = vpop.f32.mrf.mxu0  ;;  %v7419_v9 = vld [vmem:[%s7657_s13 + $0x418] sm:$0xff]  }
 0x689   : > { %v5129_v63 = vrot.slane %v5111_v46, 7  ;;  %v5156_v29 = vmul.f32 %v5102_v13, %v5102_v13  ;;  %v7422_v13 = vld [vmem:[%s7657_s13 + $0x448] sm:$0xff]   ;;  %v7424_v46 = vld [vmem:[%s7657_s13 + $0x440] sm:$0xff]  }
 0x68a   : > { %v4754_v49 = vpop.f32.mrf.mxu0  ;;  %v7425_v28 = vld [vmem:[%s7657_s13 + $0x400] sm:$0xff]  }
 0x68b   : > { %v5147_v21 = vsub.f32 %v10428_v57, %v5129_v63  ;;  %v7417_v57 = vld [vmem:[%s7657_s13 + $0x420] sm:$0xff]   ;;  %v5086_v49 = vadd.f32 %v9553_v14, %v10367_v4  ;;  %v5087_v14 = vadd.f32 %v9600_v53, %v10392_v48  ;;  %v5088_v53 = vadd.f32 %v9616_v27, %v10401_v15 }
 0x68c   : > { %6564 = vmatpush3.bf16.xpose.msra.mxu1 %v7415_v16  ;;  %v5089_v27 = vadd.f32 %v9663_v59, %v8686_v19  ;;  %v5090_v59 = vadd.f32 %v9679_v23, %v10417_v8 }
 0x68d   : > { %v5165_v20 = vmul.f32 %v5147_v21, %v5147_v21  ;;  %6570 = vmatpush3.bf16.xpose.msra.mxu0 %v7416_v1 }
 0x68e   : > { %6571 = vmatprep.subr.bf16.mxu0 %v10430_v40 }
 0x68f   : > { %v5183_v55 = vrot.slane %v5165_v20, 1 }
 0x691   : > { %v9769_v24 = vadd.f32 %v5183_v55, %v5156_v29 }
 0x693   : > { %v4790_v26 = vpop.f32.mrf.mxu1  ;;  %6566 = vmatmul.mubr.bf16.vlgmr.msra.gmra.mxu1 %v4713_v12  ;;  %vm5212_vm0 = vcmp.eq.f32.partialorder %v9769_v24, inf }
 0x694   : > { %v5094_v43 = vmul.f32 %v4790_v26, %v10431_v41 }
 0x695   : > { %v4792_v45 = vpop.f32.mrf.mxu1  ;;  %6572 = vmatpush3.bf16.xpose.msra.mxu0 %v10432_v18 }
 0x696   : > { %v5103_v31 = vsub.f32 %v5085_v42, %v5094_v43  ;;  %v5112_v61 = vmul.f32 %v4792_v45, %v10431_v41  ;;  %6573 = vmatprep.subr.bf16.mxu0 %v10433_v50 }
 0x697   : > { %v4794_v17 = vpop.f32.mrf.mxu1 }
 0x698   : > { %v5130_v54 = vrot.slane %v5112_v61, 7  ;;  %v5157_v47 = vmul.f32 %v5103_v31, %v5103_v31 }
 0x699   : > { %v4795_v12 = vpop.f32.mrf.mxu1 }
 0x69a   : > { %v5148_v32 = vsub.f32 %v10361_v60, %v5130_v54  ;;  %v7423_v60 = vld [vmem:[%s7657_s13 + $0x408] sm:$0xff]   ;;  %s5854_s13 = sshll.u32 %s7667_s15, 4  ;;  %s5851_s15 = sshll.u32 %s7583_s25, 4 }
 0x69b   : > { %s9958_s12 = scalar_lea.vmem %s10019_s4, %s5854_s13  ;;  %s9970_s29 = scalar_lea.hbm %s10020_s5, %s5851_s15 }
 0x69c   : > { %v5166_v52 = vmul.f32 %v5148_v32, %v5148_v32  ;;  %s5444_s25 = scalar_lea.sflag [#allocation4], %s7653_s28 }
 0x69d   : > { %6574 = vmatpush3.bf16.xpose.msra.mxu0 %v7417_v57 }
 0x69e   : > { %v5184_v58 = vrot.slane %v5166_v52, 1  ;;  %6575 = vmatprep.subr.bf16.mxu0 %v7418_v11 }
 0x6a0   : > { %v9780_v37 = vadd.f32 %v5184_v58, %v5157_v47 }
 0x6a2   : > { %7147 = vrsqrt.f32 %v9780_v37  ;;  %vm5219_vm15 = vcmp.eq.f32.partialorder %v9780_v37, inf  ;;  %vm5221_vm2 = vcmp.eq.f32.partialorder %v9780_v37, 0.0 }
 0x6a3   : > { %7149 = vrsqrt.f32 %v9769_v24 }
 0x6a5   : > { %6576 = vmatpush3.bf16.xpose.msra.mxu0 %v7419_v9 }
 0x6a6   : > { %6577 = vmatprep.subr.bf16.mxu0 %v7420_v10 }
 0x6ad   : > { %6578 = vmatpush3.bf16.xpose.msra.mxu0 %v7421_v36 }
 0x6ae   : > { %6579 = vmatprep.subr.bf16.mxu0 %v7422_v13 }
 0x6b5   : > { %6580 = vmatpush3.bf16.xpose.msra.mxu0 %v7423_v60 }
 0x6b6   : > { %6581 = vmatprep.subr.bf16.mxu0 %v7424_v46 }
 0x6bd   : > { %6582 = vmatpush3.bf16.xpose.msra.mxu0 %v7425_v28 }
 0x6c4   : > { %v4831_v63 = vpop.f32.mrf.mxu0  ;;  %6584 = vmatmul.mubr.bf16.vlgmr.msra.gmra.mxu0 %v9753_v22 }
 0x6c5   : > { %v5095_v21 = vmul.f32 %v4831_v63, %v10366_v33 }
 0x6c6   : > { %v4833_v16 = vpop.f32.mrf.mxu0 }
 0x6c7   : > { %v5104_v20 = vsub.f32 %v5086_v49, %v5095_v21  ;;  %v5113_v1 = vmul.f32 %v4833_v16, %v10366_v33 }
 0x6c8   : > { %v4835_v40 = vpop.f32.mrf.mxu0 }
 0x6c9   : > { %v5131_v29 = vrot.slane %v5113_v1, 7  ;;  %v5158_v41 = vmul.f32 %v5104_v20, %v5104_v20 }
 0x6ca   : > { %v4836_v55 = vpop.f32.mrf.mxu0 }
 0x6cb   : > { %v5149_v26 = vsub.f32 %v10367_v4, %v5131_v29 }
 0x6cd   : > { %v5167_v42 = vmul.f32 %v5149_v26, %v5149_v26 }
 0x6cf   : > { %v5185_v43 = vrot.slane %v5167_v42, 1 }
 0x6d1   : > { %v9795_v45 = vadd.f32 %v5185_v43, %v5158_v41 }
 0x6d3   : > { %v4872_v22 = vpop.f32.mrf.mxu1  ;;  %7151 = vrsqrt.f32 %v9795_v45  ;;  %vm5226_vm3 = vcmp.eq.f32.partialorder %v9795_v45, inf  ;;  %vm5228_vm7 = vcmp.eq.f32.partialorder %v9795_v45, 0.0 }
 0x6d4   : > { %v5096_v18 = vmul.f32 %v4872_v22, %v10391_v5 }
 0x6d5   : > { %v4874_v31 = vpop.f32.mrf.mxu1 }
 0x6d6   : > { %v5105_v61 = vsub.f32 %v5087_v14, %v5096_v18  ;;  %v5114_v33 = vmul.f32 %v4874_v31, %v10391_v5 }
 0x6d7   : > { %v4876_v50 = vpop.f32.mrf.mxu1 }
 0x6d8   : > { %v5132_v17 = vrot.slane %v5114_v33, 7  ;;  %v5159_v32 = vmul.f32 %v5105_v61, %v5105_v61 }
 0x6d9   : > { %v4877_v54 = vpop.f32.mrf.mxu1 }
 0x6da   : > { %v5150_v4 = vsub.f32 %v10392_v48, %v5132_v17 }
 0x6dc   : > { %v5168_v12 = vmul.f32 %v5150_v4, %v5150_v4 }
 0x6de   : > { %v5186_v52 = vrot.slane %v5168_v12, 1 }
 0x6e0   : > { %v9802_v57 = vadd.f32 %v5186_v52, %v5159_v32  ;;  %v5091_v52 = vadd.f32 %v9726_v39, %v8796_v3 }
 0x6e2   : > { %7153 = vrsqrt.f32 %v9802_v57  ;;  %vm5233_vm4 = vcmp.eq.f32.partialorder %v9802_v57, inf  ;;  %vm5235_vm9 = vcmp.eq.f32.partialorder %v9802_v57, 0.0 }
 0x704   : > { %v4913_v47 = vpop.f32.mrf.mxu0 }
 0x705   : > { %v5097_v58 = vmul.f32 %v4913_v47, %v10399_v2 }
 0x706   : > { %v4915_v11 = vpop.f32.mrf.mxu0 }
 0x707   : > { %v5106_v9 = vsub.f32 %v5088_v53, %v5097_v58  ;;  %v5115_v5 = vmul.f32 %v4915_v11, %v10399_v2  ;;  %v7148_v53 = vpop.eup %7147 }
 0x708   : > { %v4917_v10 = vpop.f32.mrf.mxu0 }
 0x709   : > { %v5133_v36 = vrot.slane %v5115_v5, 7  ;;  %v5160_v46 = vmul.f32 %v5106_v9, %v5106_v9  ;;  %v7150_v5 = vpop.eup %7149 }
 0x70a   : > { %v4918_v13 = vpop.f32.mrf.mxu0  ;;  %v7152_v10 = vpop.eup %7151 }
 0x70b   : > { %v5151_v48 = vsub.f32 %v10401_v15, %v5133_v36  ;;  %v5218_v36 = vmul.f32 %v7148_v53, %v9780_v37  ;;  %v5225_v39 = vmul.f32 %v7152_v10, %v9795_v45 }
 0x70d   : > { %v5169_v60 = vmul.f32 %v5151_v48, %v5151_v48  ;;  %v7154_v48 = vpop.eup %7153 }
 0x70f   : > { %v5187_v28 = vrot.slane %v5169_v60, 1 }
 0x711   : > { %v9809_v63 = vadd.f32 %v5187_v28, %v5160_v46  ;;  %v5211_v46 = vmul.f32 %v7150_v5, %v9769_v24 }
 0x713   : > { %v4954_v49 = vpop.f32.mrf.mxu1  ;;  %7155 = vrsqrt.f32 %v9809_v63  ;;  %vm5240_vm8 = vcmp.eq.f32.partialorder %v9809_v63, inf }
 0x714   : > { %v5098_v21 = vmul.f32 %v4954_v49, %v8658_v56 }
 0x715   : > { %v4956_v16 = vpop.f32.mrf.mxu1 }
 0x716   : > { %v5107_v20 = vsub.f32 %v5089_v27, %v5098_v21  ;;  %v5116_v40 = vmul.f32 %v4956_v16, %v8658_v56  ;;  %v5220_v21 = vsel %vm5219_vm15, %v9780_v37, %v5218_v36 }
 0x717   : > { %v4958_v1 = vpop.f32.mrf.mxu1 }
 0x718   : > { %v5134_v29 = vrot.slane %v5116_v40, 7 }
 0x719   : > { %v4959_v2 = vpop.f32.mrf.mxu1 }
 0x71a   : > { %v5152_v15 = vsub.f32 %v8686_v19, %v5134_v29  ;;  %v5161_v19 = vmul.f32 %v5107_v20, %v5107_v20  ;;  %v5222_v20 = vand.u32 2147483648, %v9780_v37  ;;  %v5213_v2 = vsel %vm5212_vm0, %v9769_v24, %v5211_v46 }
 0x71b   : > { %v5227_v29 = vsel %vm5226_vm3, %v9795_v45, %v5225_v39  ;;  %v5229_v37 = vand.u32 2147483648, %v9795_v45 }
 0x71c   : > { %v5170_v26 = vmul.f32 %v5152_v15, %v5152_v15  ;;  %v5223_v15 = vsel %vm5221_vm2, %v5222_v20, %v5220_v21  ;;  %vm5242_vm2 = vcmp.eq.f32.partialorder %v9809_v63, 0.0 }
 0x71e   : > { %v5188_v18 = vrot.slane %v5170_v26, 1 }
 0x720   : > { %v9823_v50 = vadd.f32 %v5188_v18, %v5161_v19  ;;  %v7156_v60 = vpop.eup %7155 }
 0x721   : > { %v5239_v1 = vmul.f32 %v7156_v60, %v9809_v63 }
 0x722   : > { %7157 = vrsqrt.f32 %v9823_v50  ;;  %vm5247_vm15 = vcmp.eq.f32.partialorder %v9823_v50, inf  ;;  %vm5249_vm3 = vcmp.eq.f32.partialorder %v9823_v50, 0.0 }
 0x72f   : > { %v7158_v49 = vpop.eup %7157 }
 0x730   : > { %v5246_v40 = vmul.f32 %v7158_v49, %v9823_v50 }
 0x744   : > { %v4995_v55 = vpop.f32.mrf.mxu0 }
 0x745   : > { %v5099_v41 = vmul.f32 %v4995_v55, %v10416_v6 }
 0x746   : > { %v4997_v42 = vpop.f32.mrf.mxu0 }
 0x747   : > { %v5117_v43 = vmul.f32 %v4997_v42, %v10416_v6  ;;  %v5108_v61 = vsub.f32 %v5090_v59, %v5099_v41  ;;  %v5236_v42 = vand.u32 2147483648, %v9802_v57  ;;  %v5241_v41 = vsel %vm5240_vm8, %v9809_v63, %v5239_v1 }
 0x748   : > { %v4999_v22 = vpop.f32.mrf.mxu0  ;;  %v5248_v59 = vsel %vm5247_vm15, %v9823_v50, %v5246_v40 }
 0x749   : > { %v5135_v14 = vrot.slane %v5117_v43, 7  ;;  %v5162_v6 = vmul.f32 %v5108_v61, %v5108_v61  ;;  %v5230_v43 = vsel %vm5228_vm7, %v5229_v37, %v5227_v29  ;;  %v5243_v22 = vand.u32 2147483648, %v9809_v63 }
 0x74a   : > { %v5000_v31 = vpop.f32.mrf.mxu0  ;;  %v5274_v61 = vsub.f32 %v5223_v15, %v10375_v38  ;;  %vm5214_vm7 = vcmp.eq.f32.partialorder %v9769_v24, 0.0 }
 0x74b   : > { %v5153_v56 = vsub.f32 %v10417_v8, %v5135_v14  ;;  %v5250_v14 = vand.u32 2147483648, %v9823_v50  ;;  %v5244_v31 = vsel %vm5242_vm2, %v5243_v22, %v5241_v41 }
 0x74d   : > { %v5171_v33 = vmul.f32 %v5153_v56, %v5153_v56  ;;  %v5215_v56 = vand.u32 2147483648, %v9769_v24  ;;  %v5251_v19 = vsel %vm5249_vm3, %v5250_v14, %v5248_v59 }
 0x74e   : > { %v5278_v50 = vsub.f32 %v5251_v19, %v8743_v30 }
 0x74f   : > { %v5189_v17 = vrot.slane %v5171_v33, 1  ;;  %v10434_v33 = vld [vmem:[#allocation28_spill] sm:$0xff] }
 0x751   : > { %v9828_v23 = vadd.f32 %v5189_v17, %v5162_v6  ;;  %v5275_v6 = vsub.f32 %v5230_v43, %v10434_v33 }
 0x753   : > { %7159 = vrsqrt.f32 %v9828_v23  ;;  %v5036_v8 = vpop.f32.mrf.mxu1  ;;  %vm5254_vm0 = vcmp.eq.f32.partialorder %v9828_v23, inf }
 0x754   : > { %v5100_v4 = vmul.f32 %v5036_v8, %v8769_v35  ;;  %v5216_v8 = vsel %vm5214_vm7, %v5215_v56, %v5213_v2 }
 0x755   : > { %v5038_v54 = vpop.f32.mrf.mxu1 }
 0x756   : > { %v5118_v12 = vmul.f32 %v5038_v54, %v8769_v35  ;;  %v5109_v11 = vsub.f32 %v5091_v52, %v5100_v4  ;;  %v10435_v54 = vld [vmem:[#allocation37_spill] sm:$0xff]  ;;  %v10436_v52 = vld [vmem:[#allocation22_spill] sm:$0xff] }
 0x757   : > { %v5040_v32 = vpop.f32.mrf.mxu1  ;;  %v5277_v4 = vsub.f32 %v5244_v31, %v10435_v54 }
 0x758   : > { %v5136_v47 = vrot.slane %v5118_v12, 7  ;;  %v5163_v35 = vmul.f32 %v5109_v11, %v5109_v11  ;;  %v9880_v12 = vmax.f32 %v5274_v61, 0.0  ;;  %v9883_v32 = vmax.f32 %v5275_v6, 0.0 }
 0x759   : > { %v5041_v58 = vpop.f32.mrf.mxu1  ;;  %v9888_v24 = vmax.f32 %v5277_v4, 0.0 }
 0x75a   : > { %v5154_v9 = vsub.f32 %v8796_v3, %v5136_v47  ;;  %v5232_v3 = vmul.f32 %v7154_v48, %v9802_v57  ;;  %v9891_v58 = vmax.f32 %v5278_v50, 0.0  ;;  %v5300_v11 = vrot.slane %v9880_v12, 7 }
 0x75b   : > { %v5306_v48 = vrot.slane %v9888_v24, 4 }
 0x75c   : > { %v5172_v13 = vmul.f32 %v5154_v9, %v5154_v9  ;;  %v5234_v26 = vsel %vm5233_vm4, %v9802_v57, %v5232_v3  ;;  %v5257_v57 = vand.u32 2147483648, %v9828_v23  ;;  %vm5256_vm4 = vcmp.eq.f32.partialorder %v9828_v23, 0.0 }
 0x75d   : > { %v5237_v45 = vsel %vm5235_vm9, %v5236_v42, %v5234_v26  ;;  %v5302_v9 = vrot.slane %v9883_v32, 6 }
 0x75e   : > { %v5190_v28 = vrot.slane %v5172_v13, 1  ;;  %v5276_v17 = vsub.f32 %v5237_v45, %v10405_v25 }
 0x760   : > { %v7160_v27 = vpop.eup %7159  ;;  %v9843_v16 = vadd.f32 %v5190_v28, %v5163_v35  ;;  %v9886_v47 = vmax.f32 %v5276_v17, 0.0  ;;  %v5308_v35 = vrot.slane %v9891_v58, 3 }
 0x761   : > { %v5253_v55 = vmul.f32 %v7160_v27, %v9828_v23 }
 0x762   : > { %7161 = vrsqrt.f32 %v9843_v16  ;;  %vm5261_vm8 = vcmp.eq.f32.partialorder %v9843_v16, inf  ;;  %v5264_v30 = vand.u32 2147483648, %v9843_v16  ;;  %vm5263_vm9 = vcmp.eq.f32.partialorder %v9843_v16, 0.0 }
 0x763   : > { %v5255_v18 = vsel %vm5254_vm0, %v9828_v23, %v5253_v55  ;;  %v5273_v23 = vsub.f32 %v5216_v8, %v10436_v52  ;;  %v5304_v36 = vrot.slane %v9886_v47, 5  ;;  %v5092_v55 = vadd.f32 %v9743_v34, %v8966_v0 }
 0x764   : > { %v5258_v63 = vsel %vm5256_vm4, %v5257_v57, %v5255_v18 }
 0x765   : > { %v5279_v38 = vsub.f32 %v5258_v63, %v8728_v62  ;;  %v9901_v10 = vmax.f32 %v5273_v23, 0.0 }
 0x767   : > { %v9896_v62 = vmax.f32 %v5279_v38, 0.0  ;;  %v5301_v46 = vsel %vm3456_vm12, %v5300_v11, %v9901_v10 }
 0x768   : > { %v5303_v28 = vsel %vm3459_vm13, %v5302_v9, %v5301_v46 }
 0x769   : > { %v5310_v49 = vrot.slane %v9896_v62, 2  ;;  %v5305_v27 = vsel %vm3462_vm5, %v5304_v36, %v5303_v28 }
 0x76a   : > { %v5307_v21 = vsel %vm3465_vm6, %v5306_v48, %v5305_v27 }
 0x76b   : > { %v5309_v3 = vsel %vm3468_vm11, %v5308_v35, %v5307_v21 }
 0x76f   : > { %v7162_v53 = vpop.eup %7161 }
 0x770   : > { %v5260_v25 = vmul.f32 %v7162_v53, %v9843_v16 }
 0x772   : > { %v5262_v5 = vsel %vm5261_vm8, %v9843_v16, %v5260_v25 }
 0x773   : > { %v5265_v13 = vsel %vm5263_vm9, %v5264_v30, %v5262_v5 }
 0x774   : > { %v5280_v60 = vsub.f32 %v5265_v13, %v10420_v7  ;;  %v5311_v7 = vsel %vm3471_vm14, %v5310_v49, %v5309_v3 }
 0x776   : > { %v9911_v39 = vmax.f32 %v5280_v60, 0.0 }
 0x778   : > { %v5312_v16 = vrot.slane %v9911_v39, 1 }
 0x77a   : > { %v5313_v20 = vsel %vm3474_vm10, %v5312_v16, %v5311_v7 }
 0x77b   : > { %5324 = vmax.xlane.f32.xlu0 %v5313_v20  ;;  %5849 = vst [vmem:[%s8945_s18 + $0x30] sm:$0xff] %v5313_v20  ;;  %5319 = vmin.xlane.f32.xlu1 %v5313_v20 }
 0x784   : > { %v5077_v1 = vpop.f32.mrf.mxu0 }
 0x785   : > { %v5101_v40 = vmul.f32 %v5077_v1, %v8937_v44 }
 0x786   : > { %v5079_v2 = vpop.f32.mrf.mxu0 }
 0x787   : > { %v5119_v29 = vmul.f32 %v5079_v2, %v8937_v44  ;;  %v5110_v42 = vsub.f32 %v5092_v55, %v5101_v40 }
 0x788   : > { %v5081_v15 = vpop.f32.mrf.mxu0 }
 0x789   : > { %v5137_v37 = vrot.slane %v5119_v29, 7  ;;  %v5164_v22 = vmul.f32 %v5110_v42, %v5110_v42 }
 0x78a   : > { %v5082_v26 = vpop.f32.mrf.mxu0 }
 0x78b   : > { %v5155_v41 = vsub.f32 %v8966_v0, %v5137_v37 }
 0x78d   : > { %v5173_v43 = vmul.f32 %v5155_v41, %v5155_v41 }
 0x78f   : > { %v5191_v59 = vrot.slane %v5173_v43, 1 }
 0x791   : > { %v5209_v45 = vadd.f32 %v5191_v59, %v5164_v22 }
 0x793   : > { %7163 = vrsqrt.f32 %v5209_v45  ;;  %vm5268_vm15 = vcmp.eq.f32.partialorder %v5209_v45, inf  ;;  %v5271_v31 = vand.u32 2147483648, %v5209_v45  ;;  %vm5270_vm0 = vcmp.eq.f32.partialorder %v5209_v45, 0.0 }
 0x7a0   : > { %v7164_v14 = vpop.eup %7163 }
 0x7a1   : > { %v5267_v18 = vmul.f32 %v7164_v14, %v5209_v45 }
 0x7a3   : > { %v5269_v44 = vsel %vm5268_vm15, %v5209_v45, %v5267_v18 }
 0x7a4   : > { %v5272_v57 = vsel %vm5270_vm0, %v5271_v31, %v5269_v44 }
 0x7a5   : > { %v5281_v34 = vsub.f32 %v5272_v57, %v9025_v51 }
 0x7a7   : > { %v9926_v61 = vmax.f32 %v5281_v34, 0.0 }
 0x7a9   : > { %v5416_v0 = vsel %vm1600_vm1, %v9926_v61, 0.0  ;;  %5850 = vst [vmem:[%s8945_s18 + $0x38] sm:$0x1] %v9926_v61  ;;  %v5326_v50 = vsel %vm1600_vm1, %v9926_v61, -inf  ;;  %v5321_v38 = vsel %vm1600_vm1, %v9926_v61, inf  ;;  %s7460_s18 = scalar_lea.vmem %s7459_s16, 32 }
 0x7aa   : > { %v5417_v56 = vadd.f32 %v5416_v0, %v5313_v20  ;;  %p7462_p8 = scmp.lt.s32.totalorder %s7460_s18, %s7454_s11 }
 0x7ac   : > { %v5418_v19 = vrot.slane %v5417_v56, 4  ;;  %p7463_p10 = por %p7462_p8, %p7461_p7 }
 0x7ae   : > { %v5419_v33 = vadd.f32 %v5418_v19, %v5417_v56  ;;  %p7464_p0 = pnand %p7463_p10, %p7457_p5 }
 0x7b0   : > { %v5420_v6 = vrot.slane %v5419_v33, 2 }
 0x7b2   : > { %v5421_v63 = vadd.f32 %v5420_v6, %v5419_v33 }
 0x7b4   : > { %v5422_v17 = vrot.slane %v5421_v63, 1 }
 0x7b6   : > { %v5423_v8 = vadd.f32 %v5422_v17, %v5421_v63 }
 0x7b8   : > { %v9932_v54 = vmul.f32 0.11111111, %v5423_v8 }
 0x7ba   : > { %v5429_v4 = vsel %vm1600_vm1, %v9932_v54, -inf  ;;  %v5426_v51 = vsel %vm1600_vm1, %v9932_v54, inf }
 0x7bb   : > { %5430 = vmax.xlane.f32.xlu1 %v5429_v4  ;;  %5427 = vmin.xlane.f32.xlu0 %v5426_v51 }
 0x7bf   : > { %5327 = vmax.xlane.f32.xlu1 %v5326_v50  ;;  %5322 = vmin.xlane.f32.xlu0 %v5321_v38 }
 0x804   : > { %v5325_v52 = vpop.xlane.xlu0 %5324  ;;  %v5320_v23 = vpop.xlane.xlu1 %5319 }
 0x805   : > { %v5356_v53 = vsub.f32 %v5325_v52, %v5320_v23  ;;  %v5331_v11 = vrot.slane %v5320_v23, 1  ;;  %v5332_v30 = vrot.slane %v5320_v23, 2  ;;  %v5333_v9 = vrot.slane %v5320_v23, 3 }
 0x806   : > { %v5334_v5 = vrot.slane %v5320_v23, 4  ;;  %v5335_v36 = vrot.slane %v5320_v23, 5  ;;  %v5336_v13 = vrot.slane %v5320_v23, 6  ;;  %v5347_v48 = vsub.f32 %v9901_v10, %v5320_v23 }
 0x807   : > { %v5358_v25 = vadd.f32 1e-20, %v5356_v53  ;;  %v5348_v46 = vsub.f32 %v9880_v12, %v5331_v11  ;;  %v5349_v35 = vsub.f32 %v9883_v32, %v5332_v30  ;;  %v5350_v28 = vsub.f32 %v9886_v47, %v5333_v9 }
 0x808   : > { %v5337_v49 = vrot.slane %v5320_v23, 7  ;;  %v5351_v27 = vsub.f32 %v9888_v24, %v5334_v5  ;;  %v5352_v7 = vsub.f32 %v9891_v58, %v5335_v36  ;;  %v5353_v32 = vsub.f32 %v9896_v62, %v5336_v13 }
 0x809   : > { %7165 = vrcp.f32 %v5358_v25 }
 0x80a   : > { %v5354_v47 = vsub.f32 %v9911_v39, %v5337_v49 }
 0x816   : > { %v7166_v60 = vpop.eup %7165 }
 0x817   : > { %v5364_v21 = vrot.slane %v7166_v60, 1  ;;  %v5365_v3 = vrot.slane %v7166_v60, 2  ;;  %v5366_v16 = vrot.slane %v7166_v60, 3  ;;  %v5367_v20 = vrot.slane %v7166_v60, 4 }
 0x818   : > { %v5368_v1 = vrot.slane %v7166_v60, 5  ;;  %v5369_v2 = vrot.slane %v7166_v60, 6  ;;  %v5370_v29 = vrot.slane %v7166_v60, 7  ;;  %v5380_v55 = vmul.f32 %v7166_v60, %v5347_v48 }
 0x819   : > { %v5381_v10 = vmul.f32 %v5364_v21, %v5348_v46  ;;  %v5382_v40 = vmul.f32 %v5365_v3, %v5349_v35  ;;  %v5383_v12 = vmul.f32 %v5366_v16, %v5350_v28  ;;  %v5384_v15 = vmul.f32 %v5367_v20, %v5351_v27 }
 0x81a   : > { %v5385_v26 = vmul.f32 %v5368_v1, %v5352_v7  ;;  %v5386_v42 = vmul.f32 %v5369_v2, %v5353_v32  ;;  %v5387_v41 = vmul.f32 %v5370_v29, %v5354_v47 }
 0x81b   : > { %v5398_v24 = vrot.slane %v5381_v10, 7  ;;  %v5400_v37 = vrot.slane %v5382_v40, 6  ;;  %v5402_v43 = vrot.slane %v5383_v12, 5  ;;  %v5404_v59 = vrot.slane %v5384_v15, 4 }
 0x81c   : > { %v5406_v14 = vrot.slane %v5385_v26, 3  ;;  %v5408_v39 = vrot.slane %v5386_v42, 2  ;;  %v5410_v31 = vrot.slane %v5387_v41, 1 }
 0x81d   : > { %v5399_v58 = vsel %vm3456_vm12, %v5398_v24, %v5380_v55 }
 0x81e   : > { %v5401_v22 = vsel %vm3459_vm13, %v5400_v37, %v5399_v58 }
 0x81f   : > { %v5403_v45 = vsel %vm3462_vm5, %v5402_v43, %v5401_v22 }
 0x820   : > { %v5405_v62 = vsel %vm3465_vm6, %v5404_v59, %v5403_v45 }
 0x821   : > { %v5407_v18 = vsel %vm3468_vm11, %v5406_v14, %v5405_v62 }
 0x822   : > { %v5409_v44 = vsel %vm3471_vm14, %v5408_v39, %v5407_v18 }
 0x823   : > { %v5411_v57 = vsel %vm3474_vm10, %v5410_v31, %v5409_v44 }
 0x824   : > { %5414 = vst [vmem:[%s9958_s12] sm:$0xff] %v5411_v57 }
 0x844   : > { %v5431_v34 = vpop.xlane.xlu1 %5430  ;;  %v5428_v0 = vpop.xlane.xlu0 %5427 }
 0x845   : > { %v5433_v56 = vsub.f32 %v5431_v34, %v5428_v0  ;;  %v5432_v8 = vsub.f32 %v9932_v54, %v5428_v0 }
 0x847   : > { %v5434_v19 = vadd.f32 1e-20, %v5433_v56 }
 0x848   : > { %v5328_v33 = vpop.xlane.xlu1 %5327  ;;  %v5323_v6 = vpop.xlane.xlu0 %5322 }
 0x849   : > { %7167 = vrcp.f32 %v5434_v19  ;;  %v5357_v63 = vsub.f32 %v5328_v33, %v5323_v6  ;;  %v5355_v50 = vsub.f32 %v9926_v61, %v5323_v6 }
 0x84b   : > { %v5359_v17 = vadd.f32 1e-20, %v5357_v63 }
 0x84d   : > { %7169 = vrcp.f32 %v5359_v17 }
 0x856   : > { %v7168_v4 = vpop.eup %7167 }
 0x857   : > { %v5436_v51 = vmul.f32 %v7168_v4, %v5432_v8 }
 0x859   : > { %5437 = vst [vmem:[%s317_s14] sm:$0x1] %v5436_v51 }
 0x85a   : > { %v7170_v38 = vpop.eup %7169 }
 0x85b   : > { %7467 = shalt.err (!%p7464_p0)
}
 0x85c   : > { %s7468_s13 = scalar_lea.hbm %s9970_s29, 16  ;;  %s7472_s10 = scalar_lea.hbm %s10020_s5, 32 }
 0x85d   : > { %p7469_p2 = scmp.ne.s32.totalorder %s9970_s29, %s7468_s13  ;;  %p7473_p3 = scmp.lt.s32.totalorder %s9970_s29, %s10020_s5 }
 0x85e   : > { %p7474_p6 = scmp.lt.s32.totalorder %s7472_s10, %s7468_s13 }
 0x85f   : > { %p7470_p9 = pnand %p7469_p2, %p10437_p13 }
 0x860   : > { %p7475_p11 = por %p7474_p6, %p7473_p3 }
 0x861   : > { %p7471_p1 = pneg %p7470_p9 }
 0x863   : > { %p7476_p12 = pnand %p7475_p11, %p7471_p1 }
 0x865   : > { %7479 = shalt.err (!%p7476_p12)
}
 0x866   : > { %6772 = dma.vmem_to_hbm [thread:$0]  (%p10437_p13), %s9972_s17, 16, %s9970_s29, %s5444_s25   ;;  %v5388_v61 = vmul.f32 %v7170_v38, %v5355_v50 }
 0x868   : > { %5415 = vst [vmem:[%s9958_s12 + $0x8] sm:$0x1] %v5388_v61 }
 0x869 PF: > { %s5487_s20 = sand.u32 1, %s7506_s21   ;;  %p10438_p4 = scmp.ne.s32.totalorder %s10174_s9, 0 }
 0x86a   : > { %p10439_p5 = scmp.ge.s32.totalorder %s7518_s24, 2  ;;  %s5488_s26 = scalar_lea.sflag [#allocation4], %s5487_s20 }
 0x86c   : > { %p6779_p7 = pnand %p10439_p5, %p10438_p4 }
 0x86e   : > { %p6780_p8 = pneg %p6779_p7 }
 0x870   : > { %7501 = dma.done.wait (%p6780_p8), %s5488_s26, 16  }
 0x871   : > { %7503 = vsyncadd (%p6780_p8), %s5488_s26, 4294967280  ;;  %p20_p13 = scmp.ge.s32.totalorder %s7587_s27, 4   ;;  %s10440_s21 = smov %s7510_s22 }
 0x872   : > { %s10441_s22 = smov %s7514_s23  ;;  %s10442_s23 = smov %s7599_s30 }
 0x873   : > { %s10443_s24 = smov %s7587_s27  ;;  %22 = sbr.rel (!%p20_p13) target bundleno = 5 (0x5), region = 117 }
 0x878   :  { %5500 = vsyncpa [#allocation3], 1 }
 0x879   :  { %5502 = vsyncpa [#allocation3 + $0x1], 1 }
 0x87a   :  { %5503 = vsyncpa [#allocation4], 1 }
 0x87b   :  { %5505 = vsyncpa [#allocation4 + $0x1], 1 }

</bundles_post_ra>
